<compile_context>
chip_gen: v7x
topology: tpu7x:2x2x1
jax: 0.10.0
libtpu: 0.0.40
codegen_flags: <defaults>
</compile_context>

<pallas_src>
import functools

import jax
import jax.numpy as jnp
from jax import lax
from jax.experimental import pallas as pl
from jax.experimental.pallas import tpu as pltpu

# Full-f32 MXU contraction: needed to match the f32 PyTorch reference.  bf16
# production inputs hit the fast MXU path regardless of this flag.
_HIGHEST = lax.Precision.HIGHEST


# --------------------------------------------------------------------------
# Helpers
# --------------------------------------------------------------------------
def _round_up(x, m):
    return -(-x // m) * m


def _sublane(dtype):
    # minimum sublane tile: 8 rows for 4-byte, 16 for 2-byte (bf16), 32 for 1-byte
    return {4: 8, 2: 16, 1: 32}.get(jnp.dtype(dtype).itemsize, 8)


def _row_tiling(M, dtype, target=256):
    """Pick a row tile tm = sublane * 2^k (so it can be halved and still tile), and
    the padded row count Mp (multiple of tm)."""
    sub = _sublane(dtype)
    cap = max(sub, min(target, _round_up(M, sub)))
    tm = sub
    while tm * 2 <= cap:
        tm *= 2
    Mp = _round_up(M, tm)
    return Mp, tm


def _pad_rows(x, Mp):
    M = x.shape[0]
    return x if Mp == M else jnp.pad(x, ((0, Mp - M), (0, 0)))


@functools.lru_cache(maxsize=None)
def _vmem_limit_bytes():
    """Per-generation scoped-VMEM limit (v5e/v6e: 128 MiB physical, v7x: 64 MiB)."""
    cap = 128 * 1024 * 1024
    try:
        cap = int(pltpu.get_tpu_info().vmem_capacity_bytes)
    except Exception:
        pass
    return int(min(int(cap * 0.6), 100 * 1024 * 1024))


def _compiler_params(*dimension_semantics):
    return pltpu.CompilerParams(dimension_semantics=dimension_semantics,
                                vmem_limit_bytes=_vmem_limit_bytes())


def _const_spec(shape):
    """BlockSpec for operands whose block index never changes (weights, LN scales,
    biases): single-buffer them so the pipeline does not waste a second VMEM copy."""
    index_map = lambda *_: (0,) * len(shape)
    try:
        return pl.BlockSpec(shape, index_map, pipeline_mode=pl.Buffered(1))
    except Exception:  # older JAX without pipeline_mode / Buffered
        return pl.BlockSpec(shape, index_map)


def _ln_f32(x_f32, gamma, beta, eps):
    """LayerNorm with biased variance (matches torch.nn.LayerNorm); stats in f32."""
    mean = jnp.mean(x_f32, axis=-1, keepdims=True)
    xc = x_f32 - mean
    var = jnp.mean(xc * xc, axis=-1, keepdims=True)
    xn = xc * lax.rsqrt(var + eps)
    return xn * gamma.astype(jnp.float32) + beta.astype(jnp.float32)


# --------------------------------------------------------------------------
# Kernel 1: fused LayerNorm -> q/k/v projections (three lane-dense outputs).
# TODO(synk): for very large d_model (v7x 64 MiB VMEM) tile the weight blocks
#             over a K/N reduction grid with a VMEM accumulator (P1+P3).
# --------------------------------------------------------------------------
def _ln_qkv_kernel(x_ref, g_ref, b_ref, wq_ref, bq_ref, wk_ref, bk_ref,
                   wv_ref, bv_ref, q_ref, k_ref, v_ref, *, eps):
    xn = _ln_f32(x_ref[...].astype(jnp.float32), g_ref[...], b_ref[...], eps)
    xn = xn.astype(wq_ref.dtype)
    for w_ref, bias_ref, o_ref in ((wq_ref, bq_ref, q_ref),
                                   (wk_ref, bk_ref, k_ref),
                                   (wv_ref, bv_ref, v_ref)):
        y = jnp.dot(xn, w_ref[...], preferred_element_type=jnp.float32,
                    precision=_HIGHEST)
        o_ref[...] = (y + bias_ref[...].astype(jnp.float32)).astype(o_ref.dtype)


def ln_linear_qkv(x, gamma, beta, w_qkv, b_qkv, *, eps, tm):
    """x: (Mp, Din) already row-padded.  Returns (q, k, v), each (Mp, D)."""
    Mp, Din = x.shape
    D = w_qkv.shape[1] // 3
    wq, wk, wv = w_qkv[:, :D], w_qkv[:, D:2 * D], w_qkv[:, 2 * D:]
    bq, bk, bv = b_qkv[:D], b_qkv[D:2 * D], b_qkv[2 * D:]
    row_in = pl.BlockSpec((tm, Din), lambda i: (i, 0))
    row_out = pl.BlockSpec((tm, D), lambda i: (i, 0))
    out_sds = jax.ShapeDtypeStruct((Mp, D), x.dtype)
    return pl.pallas_call(
        functools.partial(_ln_qkv_kernel, eps=eps),
        out_shape=(out_sds, out_sds, out_sds),
        grid_spec=pltpu.PrefetchScalarGridSpec(
            num_scalar_prefetch=0,
            grid=(Mp // tm,),
            in_specs=[
                row_in,
                _const_spec((1, Din)), _const_spec((1, Din)),
                _const_spec((Din, D)), _const_spec((1, D)),
                _const_spec((Din, D)), _const_spec((1, D)),
                _const_spec((Din, D)), _const_spec((1, D)),
            ],
            out_specs=[row_out, row_out, row_out],
        ),
        compiler_params=_compiler_params("parallel"),
    )(x, gamma.reshape(1, Din), beta.reshape(1, Din),
      wq, bq.reshape(1, D), wk, bk.reshape(1, D), wv, bv.reshape(1, D))


# --------------------------------------------------------------------------
# Kernel 2: fused residual + LayerNorm -> Linear (inner LN -> out_proj + residual).
# --------------------------------------------------------------------------
def _ln_linear_residual_kernel(a_ref, res_ref, g_ref, b_ref, w_ref, bias_ref,
                               o_ref, *, eps):
    xn = _ln_f32(a_ref[...].astype(jnp.float32), g_ref[...], b_ref[...], eps)
    y = jnp.dot(xn.astype(w_ref.dtype), w_ref[...],
                preferred_element_type=jnp.float32, precision=_HIGHEST)
    y = y + bias_ref[...].astype(jnp.float32) + res_ref[...].astype(jnp.float32)
    o_ref[...] = y.astype(o_ref.dtype)


def ln_linear_residual(a, residual, gamma, beta, w, bias, *, eps, tm):
    Mp, Din = a.shape
    Dout = w.shape[1]
    return pl.pallas_call(
        functools.partial(_ln_linear_residual_kernel, eps=eps),
        out_shape=jax.ShapeDtypeStruct((Mp, Dout), a.dtype),
        grid_spec=pltpu.PrefetchScalarGridSpec(
            num_scalar_prefetch=0,
            grid=(Mp // tm,),
            in_specs=[
                pl.BlockSpec((tm, Din), lambda i: (i, 0)),
                pl.BlockSpec((tm, Dout), lambda i: (i, 0)),
                _const_spec((1, Din)), _const_spec((1, Din)),
                _const_spec((Din, Dout)), _const_spec((1, Dout)),
            ],
            out_specs=pl.BlockSpec((tm, Dout), lambda i: (i, 0)),
        ),
        compiler_params=_compiler_params("parallel"),
    )(a, residual, gamma.reshape(1, Din), beta.reshape(1, Din),
      w, bias.reshape(1, Dout))


# --------------------------------------------------------------------------
# Kernel 3: fully fused feed-forward block with residual:
#   out = x + LN3(relu(LN2(x) @ W1 + b1)) @ W2 + b2
# The (tm, dim_ff) intermediate lives entirely in VMEM/vregs.
# --------------------------------------------------------------------------
def _ffn_kernel(x_ref, g2_ref, b2_ref, w1_ref, bias1_ref,
                g3_ref, b3_ref, w2_ref, bias2_ref, o_ref, *, eps):
    x = x_ref[...].astype(jnp.float32)
    h = _ln_f32(x, g2_ref[...], b2_ref[...], eps)
    h = jnp.dot(h.astype(w1_ref.dtype), w1_ref[...],
                preferred_element_type=jnp.float32, precision=_HIGHEST)
    h = jnp.maximum(h + bias1_ref[...].astype(jnp.float32), 0.0)
    h = _ln_f32(h, g3_ref[...], b3_ref[...], eps)
    y = jnp.dot(h.astype(w2_ref.dtype), w2_ref[...],
                preferred_element_type=jnp.float32, precision=_HIGHEST)
    y = y + bias2_ref[...].astype(jnp.float32) + x
    o_ref[...] = y.astype(o_ref.dtype)


def _ffn_tile_rows(tm, D, F, itemsize, sub):
    """Largest halving of tm whose FFN working set fits the per-chip VMEM budget."""
    budget = (_vmem_limit_bytes() * 3) // 4
    weights = 2 * D * F * itemsize            # single-buffered via _const_spec
    vecs = (4 * D + 3 * F) * itemsize

    def working_set(t):
        io = 2 * 2 * t * D * itemsize         # x-in + out tiles, double-buffered
        inter = 3 * t * F * 4                 # f32 hidden intermediates
        return weights + vecs + io + inter

    while tm > sub and working_set(tm) > budget:
        tm //= 2
    # TODO(synk): when the weights alone exceed the budget (huge D*F on v7x's 64 MiB
    #             VMEM), tile W1 over F-chunks and W2 over a K-reduction grid axis
    #             with a f32 VMEM accumulator (P1+P3) instead of keeping both resident.
    return max(tm, sub)


def fused_ffn(x, g2, b2, w1, bias1, g3, b3, w2, bias2, *, eps, tm):
    Mp, D = x.shape
    F = w1.shape[1]
    tm = _ffn_tile_rows(tm, D, F, x.dtype.itemsize, _sublane(x.dtype))
    return pl.pallas_call(
        functools.partial(_ffn_kernel, eps=eps),
        out_shape=jax.ShapeDtypeStruct((Mp, D), x.dtype),
        grid_spec=pltpu.PrefetchScalarGridSpec(
            num_scalar_prefetch=0,
            grid=(Mp // tm,),
            in_specs=[
                pl.BlockSpec((tm, D), lambda i: (i, 0)),
                _const_spec((1, D)), _const_spec((1, D)),
                _const_spec((D, F)), _const_spec((1, F)),
                _const_spec((1, F)), _const_spec((1, F)),
                _const_spec((F, D)), _const_spec((1, D)),
            ],
            out_specs=pl.BlockSpec((tm, D), lambda i: (i, 0)),
        ),
        compiler_params=_compiler_params("parallel"),
    )(x, g2.reshape(1, D), b2.reshape(1, D), w1, bias1.reshape(1, F),
      g3.reshape(1, F), b3.reshape(1, F), w2, bias2.reshape(1, D))


# --------------------------------------------------------------------------
# Kernel 4: batched per-segment scaled-dot-product attention.
# Each grid step processes TG independent (S, Dh) problems via 3-D einsums.
# The 1/num_groups combine weight is folded into the epilogue (out_scale).
# --------------------------------------------------------------------------
def _attention_kernel(q_ref, k_ref, v_ref, o_ref, *, scale, out_scale, causal):
    q = q_ref[...]
    k = k_ref[...]
    v = v_ref[...]
    s = jnp.einsum("gqd,gkd->gqk", q, k, preferred_element_type=jnp.float32,
                   precision=_HIGHEST) * scale                    # (TG, S, S)
    if causal:
        S = s.shape[-1]
        row = lax.broadcasted_iota(jnp.int32, (S, S), 0)          # single 2-D mask,
        col = lax.broadcasted_iota(jnp.int32, (S, S), 1)          # broadcast over TG
        s = jnp.where((col <= row)[None], s, jnp.float32(-1e30))
    m = jnp.max(s, axis=-1, keepdims=True)
    p = jnp.exp(s - m)
    l = jnp.sum(p, axis=-1, keepdims=True)
    o = jnp.einsum("gqk,gkd->gqd", p.astype(v.dtype), v,
                   preferred_element_type=jnp.float32, precision=_HIGHEST)
    # Exact divide (the approx EUP reciprocal costs ~1e-3 rel err -> fails f32
    # parity with the PyTorch reference); fold the 1/num_groups combine weight in.
    o_ref[...] = (o * (out_scale / l)).astype(o_ref.dtype)


def segment_attention(q, k, v, *, causal=False, out_scale=1.0):
    """q, k, v: (G, S, Dh) — G independent attention problems, TG per grid step."""
    G, S, Dh = q.shape
    scale = 1.0 / (Dh ** 0.5)
    itemsize = q.dtype.itemsize
    # VMEM-derived problem batch: q/k/v/o tiles double-buffered + f32 score/prob temps.
    per_problem = 4 * S * Dh * itemsize * 2 + 3 * S * S * 4
    budget = _vmem_limit_bytes() // 2
    tg = int(max(1, min(G, budget // max(per_problem, 1), 1024)))
    # TODO(synk): on v7x (2 TensorCores) cap tg at ceil(G/2) so the "parallel" grid
    #             axis can split across cores; on v5e/v6e the grid is a serial loop,
    #             so one big block is strictly better.
    # TODO(synk): for LongNet-scale segments (S in the thousands) switch to a
    #             flash-style kv-chunk loop with online softmax (m/l/acc scratch)
    #             instead of materializing the full (TG, S, S) score block.
    Gp = _round_up(G, tg)
    if Gp != G:
        pad = ((0, Gp - G), (0, 0), (0, 0))
        q, k, v = jnp.pad(q, pad), jnp.pad(k, pad), jnp.pad(v, pad)
    spec = pl.BlockSpec((tg, S, Dh), lambda i: (i, 0, 0))
    out = pl.pallas_call(
        functools.partial(_attention_kernel, scale=scale, out_scale=out_scale,
                          causal=causal),
        out_shape=jax.ShapeDtypeStruct((Gp, S, Dh), q.dtype),
        grid_spec=pltpu.PrefetchScalarGridSpec(
            num_scalar_prefetch=0, grid=(Gp // tg,),
            in_specs=[spec, spec, spec], out_specs=spec),
        compiler_params=_compiler_params("parallel"),
    )(q, k, v)
    return out[:G]


# --------------------------------------------------------------------------
# DilatedAttention: segmentation / dilation is indexing glue (plain JAX); the
# attention math runs in the Pallas kernel above.  Head groups are disjoint ->
# direct writes + concat.  The dilation stride is handled by reshaping the
# segment axis to (s//r, r) and indexing the minor axis (no strided scatter).
# TODO(synk): fold this gather/scatter into the attention BlockSpec index_map
#             (scalar-prefetch offset tables + strided pl.ds) so q/k/v are read
#             straight from the (B, N, H, Dh) layout.
# --------------------------------------------------------------------------
def dilated_attention(q, k, v, segment_lengths, dilation_rates, *, causal=False):
    B, N, H, Dh = q.shape
    num_groups = len(dilation_rates)
    assert H % num_groups == 0
    g = H // num_groups
    out_scale = 1.0 / num_groups              # applied inside the attention kernel
    group_outs = []
    for i, (r, s) in enumerate(zip(dilation_rates, segment_lengths)):
        assert N % s == 0 and s % r == 0
        nseg = N // s
        offset = i % r
        hmin, hmax = i * g, (i + 1) * g

        def gather(t):
            t = t.reshape(B, nseg, s // r, r, H, Dh)[:, :, :, offset, hmin:hmax, :]
            t = jnp.transpose(t, (0, 1, 3, 2, 4))             # (B, nseg, g, s//r, Dh)
            return t.reshape(B * nseg * g, s // r, Dh)

        xi = segment_attention(gather(q), gather(k), gather(v),
                               causal=causal, out_scale=out_scale)
        xi = xi.reshape(B, nseg, g, s // r, Dh)
        xi = jnp.transpose(xi, (0, 1, 3, 2, 4))               # (B, nseg, s//r, g, Dh)
        if r == 1:
            out_i = xi
        else:
            out_i = jnp.zeros((B, nseg, s // r, r, g, Dh), xi.dtype)
            out_i = out_i.at[:, :, :, offset].set(xi)         # minor-axis set
        group_outs.append(out_i.reshape(B, N, g, Dh))
    return jnp.concatenate(group_outs, axis=2)                # (B, N, H, Dh)


# --------------------------------------------------------------------------
# Full encoder layer forward (matches DilatedTransformerEncoderLayer.forward).
# Dropout is identity in eval mode.
# --------------------------------------------------------------------------
def dilated_transformer_encoder_layer(src, params, *, nhead, segment_lengths,
                                      dilation_rates, eps=1e-5, is_causal=False):
    B, N, D = src.shape
    dh = D // nhead
    M = B * N
    # Pad rows once at layer entry; all row-tiled kernels consume the padded slab.
    Mp, tm = _row_tiling(M, src.dtype)
    x = _pad_rows(src.reshape(M, D), Mp)                      # (Mp, D)

    # ---- self-attention block: norm1 -> q/k/v -> dilated attention
    #      -> inner LN -> out_proj + residual ----
    q, k, v = ln_linear_qkv(x, params["norm1_g"], params["norm1_b"],
                            params["w_qkv"], params["b_qkv"], eps=eps, tm=tm)
    q = q[:M].reshape(B, N, nhead, dh)
    k = k[:M].reshape(B, N, nhead, dh)
    v = v[:M].reshape(B, N, nhead, dh)
    a = dilated_attention(q, k, v, segment_lengths, dilation_rates, causal=is_causal)
    a = _pad_rows(a.reshape(M, D), Mp)
    x = ln_linear_residual(a, x, params["attn_norm_g"], params["attn_norm_b"],
                           params["w_out"], params["b_out"], eps=eps, tm=tm)

    # ---- feedforward block (fused): x + linear2(norm3(relu(linear1(norm2(x))))) ----
    x = fused_ffn(x, params["norm2_g"], params["norm2_b"],
                  params["w_ff1"], params["b_ff1"],
                  params["norm3_g"], params["norm3_b"],
                  params["w_ff2"], params["b_ff2"], eps=eps, tm=tm)
    return x[:M].reshape(B, N, D)


# --------------------------------------------------------------------------
# Pure-JAX reference (for correctness check) — same HIGHEST matmul precision.
# --------------------------------------------------------------------------
def _ref_layer(src, params, *, nhead, segment_lengths, dilation_rates, eps, is_causal):
    def ln(x, gm, bt):
        m = jnp.mean(x, -1, keepdims=True)
        v = jnp.mean((x - m) ** 2, -1, keepdims=True)
        return (x - m) * lax.rsqrt(v + eps) * gm + bt

    mm = functools.partial(jnp.dot, precision=_HIGHEST)
    B, N, D = src.shape
    dh = D // nhead
    x = src.reshape(B * N, D)
    qkv = mm(ln(x, params["norm1_g"], params["norm1_b"]), params["w_qkv"]) + params["b_qkv"]
    q, k, v = jnp.split(qkv, 3, axis=-1)
    q = q.reshape(B, N, nhead, dh)
    k = k.reshape(B, N, nhead, dh)
    v = v.reshape(B, N, nhead, dh)

    num_groups = len(dilation_rates)
    gh = nhead // num_groups
    outs = []
    for i, (r, s) in enumerate(zip(dilation_rates, segment_lengths)):
        nseg = N // s
        off = i % r
        hmin, hmax = i * gh, (i + 1) * gh

        def gat(t):
            return t.reshape(B, nseg, s, nhead, dh)[:, :, off::r, hmin:hmax, :]

        qi, ki, vi = gat(q), gat(k), gat(v)                       # (B,nseg,S,g,dh)
        sc = jnp.einsum("bnqhd,bnkhd->bnhqk", qi, ki, precision=_HIGHEST) / (dh ** 0.5)
        if is_causal:
            S = sc.shape[-1]
            mask = jnp.tril(jnp.ones((S, S), bool))
            sc = jnp.where(mask, sc, -1e30)
        p = jax.nn.softmax(sc, axis=-1)
        oi = jnp.einsum("bnhqk,bnkhd->bnqhd", p, vi, precision=_HIGHEST)
        full = jnp.zeros((B, nseg, s, gh, dh), oi.dtype).at[:, :, off::r].set(oi)
        outs.append(full.reshape(B, N, gh, dh))
    a = (jnp.concatenate(outs, axis=2) / num_groups).reshape(B * N, D)
    a = mm(ln(a, params["attn_norm_g"], params["attn_norm_b"]), params["w_out"]) + params["b_out"]
    x = x + a
    h = mm(ln(x, params["norm2_g"], params["norm2_b"]), params["w_ff1"]) + params["b_ff1"]
    h = jnp.maximum(h, 0.0)
    h = mm(ln(h, params["norm3_g"], params["norm3_b"]), params["w_ff2"]) + params["b_ff2"]
    x = x + h
    return x.reshape(B, N, D)


if __name__ == "__main__":
    # Small shapes: d_model=32, nhead=4, dim_feedforward=64,
    # segment_lengths=(4, 8), dilation_rates=(1, 2), batch=2, seq=8.
    B, N, D = 2, 8, 32
    nhead = 4
    dim_ff = 64
    segment_lengths = (4, 8)
    dilation_rates = (1, 2)

    key = jax.random.PRNGKey(0)
    keys = jax.random.split(key, 8)

    def xavier(k, fan_in, fan_out, gain=1.0):
        std = gain * (2.0 / (fan_in + fan_out)) ** 0.5
        return std * jax.random.normal(k, (fan_in, fan_out), jnp.float32)

    ones = lambda n: jnp.ones((n,), jnp.float32)
    zeros = lambda n: jnp.zeros((n,), jnp.float32)

    params = dict(
        norm1_g=ones(D), norm1_b=zeros(D),
        attn_norm_g=ones(D), attn_norm_b=zeros(D),
        norm2_g=ones(D), norm2_b=zeros(D),
        norm3_g=ones(dim_ff), norm3_b=zeros(dim_ff),
        w_qkv=jnp.concatenate(
            [xavier(keys[0], D, D), xavier(keys[1], D, D), xavier(keys[2], D, D)], axis=1),
        b_qkv=zeros(3 * D),
        w_out=xavier(keys[3], D, D), b_out=zeros(D),
        w_ff1=xavier(keys[4], D, dim_ff), b_ff1=zeros(dim_ff),
        w_ff2=xavier(keys[5], dim_ff, D), b_ff2=zeros(D),
    )

    src = jax.random.normal(keys[6], (B, N, D), jnp.float32)

    layer = jax.jit(functools.partial(
        dilated_transformer_encoder_layer, nhead=nhead,
        segment_lengths=segment_lengths, dilation_rates=dilation_rates,
        is_causal=False))
    out = jax.block_until_ready(layer(src, params))
    assert out.shape == (B, N, D) and out.dtype == jnp.float32

    ref = _ref_layer(src, params, nhead=nhead,
                     segment_lengths=segment_lengths, dilation_rates=dilation_rates,
                     eps=1e-5, is_causal=False)
    err = float(jnp.max(jnp.abs(out - ref)))
    assert err < 5e-3, f"mismatch vs pure-JAX reference: max abs err = {err}"
    print("KERNEL_OK")
</pallas_src>

<mosaic_0001>
module attributes {stable_mosaic.version = 11 : i64} {
  func.func @_ln_qkv_kernel(%arg0: i32, %arg1: memref<16x32xf32, #tpu.memory_space<vmem>>, %arg2: memref<1x32xf32, #tpu.memory_space<vmem>>, %arg3: memref<1x32xf32, #tpu.memory_space<vmem>>, %arg4: memref<32x32xf32, #tpu.memory_space<vmem>>, %arg5: memref<1x32xf32, #tpu.memory_space<vmem>>, %arg6: memref<32x32xf32, #tpu.memory_space<vmem>>, %arg7: memref<1x32xf32, #tpu.memory_space<vmem>>, %arg8: memref<32x32xf32, #tpu.memory_space<vmem>>, %arg9: memref<1x32xf32, #tpu.memory_space<vmem>>, %arg10: memref<16x32xf32, #tpu.memory_space<vmem>>, %arg11: memref<16x32xf32, #tpu.memory_space<vmem>>, %arg12: memref<16x32xf32, #tpu.memory_space<vmem>>) attributes {dimension_semantics = [#tpu.dimension_semantics<parallel>], iteration_bounds = array<i64: 1>, scalar_prefetch = 0 : i64, scratch_operands = 0 : i64, tpu.core_type = #tpu.core_type<tc>, window_params = [{transform_indices = @transform_0, window_bounds = array<i64: 16, 32>}, {pipeline_mode = #tpu.pipeline_mode<synchronous>, transform_indices = @transform_1, window_bounds = array<i64: 1, 32>}, {pipeline_mode = #tpu.pipeline_mode<synchronous>, transform_indices = @transform_2, window_bounds = array<i64: 1, 32>}, {pipeline_mode = #tpu.pipeline_mode<synchronous>, transform_indices = @transform_3, window_bounds = array<i64: 32, 32>}, {pipeline_mode = #tpu.pipeline_mode<synchronous>, transform_indices = @transform_4, window_bounds = array<i64: 1, 32>}, {pipeline_mode = #tpu.pipeline_mode<synchronous>, transform_indices = @transform_5, window_bounds = array<i64: 32, 32>}, {pipeline_mode = #tpu.pipeline_mode<synchronous>, transform_indices = @transform_6, window_bounds = array<i64: 1, 32>}, {pipeline_mode = #tpu.pipeline_mode<synchronous>, transform_indices = @transform_7, window_bounds = array<i64: 32, 32>}, {pipeline_mode = #tpu.pipeline_mode<synchronous>, transform_indices = @transform_8, window_bounds = array<i64: 1, 32>}, {transform_indices = @transform_9, window_bounds = array<i64: 16, 32>}, {transform_indices = @transform_10, window_bounds = array<i64: 16, 32>}, {transform_indices = @transform_11, window_bounds = array<i64: 16, 32>}]} {
    %c0 = arith.constant 0 : index
    %c0_0 = arith.constant 0 : index
    %0 = vector.load %arg1[%c0, %c0_0] : memref<16x32xf32, #tpu.memory_space<vmem>>, vector<16x32xf32>
    %c0_1 = arith.constant 0 : index
    %c0_2 = arith.constant 0 : index
    %1 = vector.load %arg2[%c0_1, %c0_2] : memref<1x32xf32, #tpu.memory_space<vmem>>, vector<1x32xf32>
    %c0_3 = arith.constant 0 : index
    %c0_4 = arith.constant 0 : index
    %2 = vector.load %arg3[%c0_3, %c0_4] : memref<1x32xf32, #tpu.memory_space<vmem>>, vector<1x32xf32>
    %cst = arith.constant dense<0.000000e+00> : vector<16xf32>
    %3 = vector.multi_reduction <add>, %0, %cst [1] : vector<16x32xf32> to vector<16xf32>
    %4 = vector.shape_cast %3 : vector<16xf32> to vector<16x1xf32>
    %cst_5 = arith.constant 3.200000e+01 : f32
    %5 = vector.broadcast %cst_5 : f32 to vector<16x1xf32>
    %6 = arith.divf %4, %5 : vector<16x1xf32>
    %7 = vector.broadcast %6 : vector<16x1xf32> to vector<16x32xf32>
    %8 = arith.subf %0, %7 : vector<16x32xf32>
    %9 = arith.mulf %8, %8 : vector<16x32xf32>
    %cst_6 = arith.constant dense<0.000000e+00> : vector<16xf32>
    %10 = vector.multi_reduction <add>, %9, %cst_6 [1] : vector<16x32xf32> to vector<16xf32>
    %11 = vector.shape_cast %10 : vector<16xf32> to vector<16x1xf32>
    %cst_7 = arith.constant 3.200000e+01 : f32
    %12 = vector.broadcast %cst_7 : f32 to vector<16x1xf32>
    %13 = arith.divf %11, %12 : vector<16x1xf32>
    %cst_8 = arith.constant 9.99999974E-6 : f32
    %14 = vector.broadcast %cst_8 : f32 to vector<16x1xf32>
    %15 = arith.addf %13, %14 : vector<16x1xf32>
    %16 = math.rsqrt %15 : vector<16x1xf32>
    %17 = vector.broadcast %16 : vector<16x1xf32> to vector<16x32xf32>
    %18 = arith.mulf %8, %17 : vector<16x32xf32>
    %19 = vector.broadcast %1 : vector<1x32xf32> to vector<16x32xf32>
    %20 = arith.mulf %18, %19 : vector<16x32xf32>
    %21 = vector.broadcast %2 : vector<1x32xf32> to vector<16x32xf32>
    %22 = arith.addf %20, %21 : vector<16x32xf32>
    %c0_9 = arith.constant 0 : index
    %c0_10 = arith.constant 0 : index
    %23 = vector.load %arg4[%c0_9, %c0_10] : memref<32x32xf32, #tpu.memory_space<vmem>>, vector<32x32xf32>
    %cst_11 = arith.constant dense<0.000000e+00> : vector<16x32xf32>
    %24 = tpu.matmul %22, %23, %cst_11 {dimension_numbers = #tpu.dot_dimension_numbers<[1], [0], [0], [1], [0, 0, 1, 1], [], []>, precision = #tpu.contract_precision<fp32>} : vector<16x32xf32>, vector<32x32xf32>, vector<16x32xf32> -> vector<16x32xf32>
    %c0_12 = arith.constant 0 : index
    %c0_13 = arith.constant 0 : index
    %25 = vector.load %arg5[%c0_12, %c0_13] : memref<1x32xf32, #tpu.memory_space<vmem>>, vector<1x32xf32>
    %26 = vector.broadcast %25 : vector<1x32xf32> to vector<16x32xf32>
    %27 = arith.addf %24, %26 : vector<16x32xf32>
    %c0_14 = arith.constant 0 : index
    %c0_15 = arith.constant 0 : index
    %28 = vector.load %arg10[%c0_14, %c0_15] : memref<16x32xf32, #tpu.memory_space<vmem>>, vector<16x32xf32>
    tpu.vector_store %arg10[%c0_14, %c0_15], %27 {strides = array<i32>} : memref<16x32xf32, #tpu.memory_space<vmem>>, vector<16x32xf32>,
    %c0_16 = arith.constant 0 : index
    %c0_17 = arith.constant 0 : index
    %29 = vector.load %arg6[%c0_16, %c0_17] : memref<32x32xf32, #tpu.memory_space<vmem>>, vector<32x32xf32>
    %cst_18 = arith.constant dense<0.000000e+00> : vector<16x32xf32>
    %30 = tpu.matmul %22, %29, %cst_18 {dimension_numbers = #tpu.dot_dimension_numbers<[1], [0], [0], [1], [0, 0, 1, 1], [], []>, precision = #tpu.contract_precision<fp32>} : vector<16x32xf32>, vector<32x32xf32>, vector<16x32xf32> -> vector<16x32xf32>
    %c0_19 = arith.constant 0 : index
    %c0_20 = arith.constant 0 : index
    %31 = vector.load %arg7[%c0_19, %c0_20] : memref<1x32xf32, #tpu.memory_space<vmem>>, vector<1x32xf32>
    %32 = vector.broadcast %31 : vector<1x32xf32> to vector<16x32xf32>
    %33 = arith.addf %30, %32 : vector<16x32xf32>
    %c0_21 = arith.constant 0 : index
    %c0_22 = arith.constant 0 : index
    %34 = vector.load %arg11[%c0_21, %c0_22] : memref<16x32xf32, #tpu.memory_space<vmem>>, vector<16x32xf32>
    tpu.vector_store %arg11[%c0_21, %c0_22], %33 {strides = array<i32>} : memref<16x32xf32, #tpu.memory_space<vmem>>, vector<16x32xf32>,
    %c0_23 = arith.constant 0 : index
    %c0_24 = arith.constant 0 : index
    %35 = vector.load %arg8[%c0_23, %c0_24] : memref<32x32xf32, #tpu.memory_space<vmem>>, vector<32x32xf32>
    %cst_25 = arith.constant dense<0.000000e+00> : vector<16x32xf32>
    %36 = tpu.matmul %22, %35, %cst_25 {dimension_numbers = #tpu.dot_dimension_numbers<[1], [0], [0], [1], [0, 0, 1, 1], [], []>, precision = #tpu.contract_precision<fp32>} : vector<16x32xf32>, vector<32x32xf32>, vector<16x32xf32> -> vector<16x32xf32>
    %c0_26 = arith.constant 0 : index
    %c0_27 = arith.constant 0 : index
    %37 = vector.load %arg9[%c0_26, %c0_27] : memref<1x32xf32, #tpu.memory_space<vmem>>, vector<1x32xf32>
    %38 = vector.broadcast %37 : vector<1x32xf32> to vector<16x32xf32>
    %39 = arith.addf %36, %38 : vector<16x32xf32>
    %c0_28 = arith.constant 0 : index
    %c0_29 = arith.constant 0 : index
    %40 = vector.load %arg12[%c0_28, %c0_29] : memref<16x32xf32, #tpu.memory_space<vmem>>, vector<16x32xf32>
    tpu.vector_store %arg12[%c0_28, %c0_29], %39 {strides = array<i32>} : memref<16x32xf32, #tpu.memory_space<vmem>>, vector<16x32xf32>,
    return
  }
  func.func @transform_0(%arg0: i32) -> (i32, i32) {
    %c0_i32 = arith.constant 0 : i32
    %c0_i32_0 = arith.constant 0 : i32
    return %arg0, %c0_i32 : i32, i32
  }
  func.func @transform_1(%arg0: i32) -> (i32, i32) {
    %c0_i32 = arith.constant 0 : i32
    %c0_i32_0 = arith.constant 0 : i32
    %c0_i32_1 = arith.constant 0 : i32
    return %c0_i32, %c0_i32_0 : i32, i32
  }
  func.func @transform_2(%arg0: i32) -> (i32, i32) {
    %c0_i32 = arith.constant 0 : i32
    %c0_i32_0 = arith.constant 0 : i32
    %c0_i32_1 = arith.constant 0 : i32
    return %c0_i32, %c0_i32_0 : i32, i32
  }
  func.func @transform_3(%arg0: i32) -> (i32, i32) {
    %c0_i32 = arith.constant 0 : i32
    %c0_i32_0 = arith.constant 0 : i32
    %c0_i32_1 = arith.constant 0 : i32
    return %c0_i32, %c0_i32_0 : i32, i32
  }
  func.func @transform_4(%arg0: i32) -> (i32, i32) {
    %c0_i32 = arith.constant 0 : i32
    %c0_i32_0 = arith.constant 0 : i32
    %c0_i32_1 = arith.constant 0 : i32
    return %c0_i32, %c0_i32_0 : i32, i32
  }
  func.func @transform_5(%arg0: i32) -> (i32, i32) {
    %c0_i32 = arith.constant 0 : i32
    %c0_i32_0 = arith.constant 0 : i32
    %c0_i32_1 = arith.constant 0 : i32
    return %c0_i32, %c0_i32_0 : i32, i32
  }
  func.func @transform_6(%arg0: i32) -> (i32, i32) {
    %c0_i32 = arith.constant 0 : i32
    %c0_i32_0 = arith.constant 0 : i32
    %c0_i32_1 = arith.constant 0 : i32
    return %c0_i32, %c0_i32_0 : i32, i32
  }
  func.func @transform_7(%arg0: i32) -> (i32, i32) {
    %c0_i32 = arith.constant 0 : i32
    %c0_i32_0 = arith.constant 0 : i32
    %c0_i32_1 = arith.constant 0 : i32
    return %c0_i32, %c0_i32_0 : i32, i32
  }
  func.func @transform_8(%arg0: i32) -> (i32, i32) {
    %c0_i32 = arith.constant 0 : i32
    %c0_i32_0 = arith.constant 0 : i32
    %c0_i32_1 = arith.constant 0 : i32
    return %c0_i32, %c0_i32_0 : i32, i32
  }
  func.func @transform_9(%arg0: i32) -> (i32, i32) {
    %c0_i32 = arith.constant 0 : i32
    %c0_i32_0 = arith.constant 0 : i32
    return %arg0, %c0_i32 : i32, i32
  }
  func.func @transform_10(%arg0: i32) -> (i32, i32) {
    %c0_i32 = arith.constant 0 : i32
    %c0_i32_0 = arith.constant 0 : i32
    return %arg0, %c0_i32 : i32, i32
  }
  func.func @transform_11(%arg0: i32) -> (i32, i32) {
    %c0_i32 = arith.constant 0 : i32
    %c0_i32_0 = arith.constant 0 : i32
    return %arg0, %c0_i32 : i32, i32
  }
}

module attributes {stable_mosaic.version = 11 : i64} {
  func.func @_attention_kernel(%arg0: i32, %arg1: memref<4x4x8xf32, #tpu.memory_space<vmem>>, %arg2: memref<4x4x8xf32, #tpu.memory_space<vmem>>, %arg3: memref<4x4x8xf32, #tpu.memory_space<vmem>>, %arg4: memref<4x4x8xf32, #tpu.memory_space<vmem>>) attributes {dimension_semantics = [#tpu.dimension_semantics<parallel>], iteration_bounds = array<i64: 1>, scalar_prefetch = 0 : i64, scratch_operands = 0 : i64, tpu.core_type = #tpu.core_type<tc>, window_params = [{transform_indices = @transform_0, window_bounds = array<i64: 4, 4, 8>}, {transform_indices = @transform_1, window_bounds = array<i64: 4, 4, 8>}, {transform_indices = @transform_2, window_bounds = array<i64: 4, 4, 8>}, {transform_indices = @transform_3, window_bounds = array<i64: 4, 4, 8>}]} {
    %c0 = arith.constant 0 : index
    %c0_0 = arith.constant 0 : index
    %c0_1 = arith.constant 0 : index
    %0 = vector.load %arg1[%c0, %c0_0, %c0_1] : memref<4x4x8xf32, #tpu.memory_space<vmem>>, vector<4x4x8xf32>
    %c0_2 = arith.constant 0 : index
    %c0_3 = arith.constant 0 : index
    %c0_4 = arith.constant 0 : index
    %1 = vector.load %arg2[%c0_2, %c0_3, %c0_4] : memref<4x4x8xf32, #tpu.memory_space<vmem>>, vector<4x4x8xf32>
    %c0_5 = arith.constant 0 : index
    %c0_6 = arith.constant 0 : index
    %c0_7 = arith.constant 0 : index
    %2 = vector.load %arg3[%c0_5, %c0_6, %c0_7] : memref<4x4x8xf32, #tpu.memory_space<vmem>>, vector<4x4x8xf32>
    "tpu.trace_start"() <{level = 10 : i32, message = "gqd,gkd->gqk"}> : () -> ()
    %cst = arith.constant dense<0.000000e+00> : vector<4x4x4xf32>
    %3 = tpu.matmul %0, %1, %cst {dimension_numbers = #tpu.dot_dimension_numbers<[2], [2], [1], [1], [0, 0, 0, 1, 1, 1], [0], [0]>, precision = #tpu.contract_precision<fp32>} : vector<4x4x8xf32>, vector<4x4x8xf32>, vector<4x4x4xf32> -> vector<4x4x4xf32>
    "tpu.trace_stop"() : () -> ()
    %cst_8 = arith.constant 0.353553385 : f32
    %4 = vector.broadcast %cst_8 : f32 to vector<4x4x4xf32>
    %5 = arith.mulf %3, %4 : vector<4x4x4xf32>
    %cst_9 = arith.constant dense<0xFF800000> : vector<4x4xf32>
    %6 = vector.multi_reduction <maximumf>, %5, %cst_9 [2] : vector<4x4x4xf32> to vector<4x4xf32>
    %7 = vector.shape_cast %6 : vector<4x4xf32> to vector<4x4x1xf32>
    %8 = vector.broadcast %7 : vector<4x4x1xf32> to vector<4x4x4xf32>
    %9 = arith.subf %5, %8 : vector<4x4x4xf32>
    %10 = math.exp %9 : vector<4x4x4xf32>
    %cst_10 = arith.constant dense<0.000000e+00> : vector<4x4xf32>
    %11 = vector.multi_reduction <add>, %10, %cst_10 [2] : vector<4x4x4xf32> to vector<4x4xf32>
    %12 = vector.shape_cast %11 : vector<4x4xf32> to vector<4x4x1xf32>
    "tpu.trace_start"() <{level = 10 : i32, message = "gqk,gkd->gqd"}> : () -> ()
    %cst_11 = arith.constant dense<0.000000e+00> : vector<4x4x8xf32>
    %13 = tpu.matmul %10, %2, %cst_11 {dimension_numbers = #tpu.dot_dimension_numbers<[2], [1], [1], [2], [0, 0, 0, 1, 1, 2], [0], [0]>, precision = #tpu.contract_precision<fp32>} : vector<4x4x4xf32>, vector<4x4x8xf32>, vector<4x4x8xf32> -> vector<4x4x8xf32>
    "tpu.trace_stop"() : () -> ()
    %cst_12 = arith.constant 5.000000e-01 : f32
    %14 = vector.broadcast %cst_12 : f32 to vector<4x4x1xf32>
    %15 = arith.divf %14, %12 : vector<4x4x1xf32>
    %16 = vector.broadcast %15 : vector<4x4x1xf32> to vector<4x4x8xf32>
    %17 = arith.mulf %13, %16 : vector<4x4x8xf32>
    %c0_13 = arith.constant 0 : index
    %c0_14 = arith.constant 0 : index
    %c0_15 = arith.constant 0 : index
    %18 = vector.load %arg4[%c0_13, %c0_14, %c0_15] : memref<4x4x8xf32, #tpu.memory_space<vmem>>, vector<4x4x8xf32>
    tpu.vector_store %arg4[%c0_13, %c0_14, %c0_15], %17 {strides = array<i32>} : memref<4x4x8xf32, #tpu.memory_space<vmem>>, vector<4x4x8xf32>,
    return
  }
  func.func @transform_0(%arg0: i32) -> (i32, i32, i32) {
    %c0_i32 = arith.constant 0 : i32
    %c0_i32_0 = arith.constant 0 : i32
    %c0_i32_1 = arith.constant 0 : i32
    return %arg0, %c0_i32, %c0_i32_0 : i32, i32, i32
  }
  func.func @transform_1(%arg0: i32) -> (i32, i32, i32) {
    %c0_i32 = arith.constant 0 : i32
    %c0_i32_0 = arith.constant 0 : i32
    %c0_i32_1 = arith.constant 0 : i32
    return %arg0, %c0_i32, %c0_i32_0 : i32, i32, i32
  }
  func.func @transform_2(%arg0: i32) -> (i32, i32, i32) {
    %c0_i32 = arith.constant 0 : i32
    %c0_i32_0 = arith.constant 0 : i32
    %c0_i32_1 = arith.constant 0 : i32
    return %arg0, %c0_i32, %c0_i32_0 : i32, i32, i32
  }
  func.func @transform_3(%arg0: i32) -> (i32, i32, i32) {
    %c0_i32 = arith.constant 0 : i32
    %c0_i32_0 = arith.constant 0 : i32
    %c0_i32_1 = arith.constant 0 : i32
    return %arg0, %c0_i32, %c0_i32_0 : i32, i32, i32
  }
}

module attributes {stable_mosaic.version = 11 : i64} {
  func.func @_attention_kernel(%arg0: i32, %arg1: memref<8x4x8xf32, #tpu.memory_space<vmem>>, %arg2: memref<8x4x8xf32, #tpu.memory_space<vmem>>, %arg3: memref<8x4x8xf32, #tpu.memory_space<vmem>>, %arg4: memref<8x4x8xf32, #tpu.memory_space<vmem>>) attributes {dimension_semantics = [#tpu.dimension_semantics<parallel>], iteration_bounds = array<i64: 1>, scalar_prefetch = 0 : i64, scratch_operands = 0 : i64, tpu.core_type = #tpu.core_type<tc>, window_params = [{transform_indices = @transform_0, window_bounds = array<i64: 8, 4, 8>}, {transform_indices = @transform_1, window_bounds = array<i64: 8, 4, 8>}, {transform_indices = @transform_2, window_bounds = array<i64: 8, 4, 8>}, {transform_indices = @transform_3, window_bounds = array<i64: 8, 4, 8>}]} {
    %c0 = arith.constant 0 : index
    %c0_0 = arith.constant 0 : index
    %c0_1 = arith.constant 0 : index
    %0 = vector.load %arg1[%c0, %c0_0, %c0_1] : memref<8x4x8xf32, #tpu.memory_space<vmem>>, vector<8x4x8xf32>
    %c0_2 = arith.constant 0 : index
    %c0_3 = arith.constant 0 : index
    %c0_4 = arith.constant 0 : index
    %1 = vector.load %arg2[%c0_2, %c0_3, %c0_4] : memref<8x4x8xf32, #tpu.memory_space<vmem>>, vector<8x4x8xf32>
    %c0_5 = arith.constant 0 : index
    %c0_6 = arith.constant 0 : index
    %c0_7 = arith.constant 0 : index
    %2 = vector.load %arg3[%c0_5, %c0_6, %c0_7] : memref<8x4x8xf32, #tpu.memory_space<vmem>>, vector<8x4x8xf32>
    "tpu.trace_start"() <{level = 10 : i32, message = "gqd,gkd->gqk"}> : () -> ()
    %cst = arith.constant dense<0.000000e+00> : vector<8x4x4xf32>
    %3 = tpu.matmul %0, %1, %cst {dimension_numbers = #tpu.dot_dimension_numbers<[2], [2], [1], [1], [0, 0, 0, 1, 1, 1], [0], [0]>, precision = #tpu.contract_precision<fp32>} : vector<8x4x8xf32>, vector<8x4x8xf32>, vector<8x4x4xf32> -> vector<8x4x4xf32>
    "tpu.trace_stop"() : () -> ()
    %cst_8 = arith.constant 0.353553385 : f32
    %4 = vector.broadcast %cst_8 : f32 to vector<8x4x4xf32>
    %5 = arith.mulf %3, %4 : vector<8x4x4xf32>
    %cst_9 = arith.constant dense<0xFF800000> : vector<8x4xf32>
    %6 = vector.multi_reduction <maximumf>, %5, %cst_9 [2] : vector<8x4x4xf32> to vector<8x4xf32>
    %7 = vector.shape_cast %6 : vector<8x4xf32> to vector<8x4x1xf32>
    %8 = vector.broadcast %7 : vector<8x4x1xf32> to vector<8x4x4xf32>
    %9 = arith.subf %5, %8 : vector<8x4x4xf32>
    %10 = math.exp %9 : vector<8x4x4xf32>
    %cst_10 = arith.constant dense<0.000000e+00> : vector<8x4xf32>
    %11 = vector.multi_reduction <add>, %10, %cst_10 [2] : vector<8x4x4xf32> to vector<8x4xf32>
    %12 = vector.shape_cast %11 : vector<8x4xf32> to vector<8x4x1xf32>
    "tpu.trace_start"() <{level = 10 : i32, message = "gqk,gkd->gqd"}> : () -> ()
    %cst_11 = arith.constant dense<0.000000e+00> : vector<8x4x8xf32>
    %13 = tpu.matmul %10, %2, %cst_11 {dimension_numbers = #tpu.dot_dimension_numbers<[2], [1], [1], [2], [0, 0, 0, 1, 1, 2], [0], [0]>, precision = #tpu.contract_precision<fp32>} : vector<8x4x4xf32>, vector<8x4x8xf32>, vector<8x4x8xf32> -> vector<8x4x8xf32>
    "tpu.trace_stop"() : () -> ()
    %cst_12 = arith.constant 5.000000e-01 : f32
    %14 = vector.broadcast %cst_12 : f32 to vector<8x4x1xf32>
    %15 = arith.divf %14, %12 : vector<8x4x1xf32>
    %16 = vector.broadcast %15 : vector<8x4x1xf32> to vector<8x4x8xf32>
    %17 = arith.mulf %13, %16 : vector<8x4x8xf32>
    %c0_13 = arith.constant 0 : index
    %c0_14 = arith.constant 0 : index
    %c0_15 = arith.constant 0 : index
    %18 = vector.load %arg4[%c0_13, %c0_14, %c0_15] : memref<8x4x8xf32, #tpu.memory_space<vmem>>, vector<8x4x8xf32>
    tpu.vector_store %arg4[%c0_13, %c0_14, %c0_15], %17 {strides = array<i32>} : memref<8x4x8xf32, #tpu.memory_space<vmem>>, vector<8x4x8xf32>,
    return
  }
  func.func @transform_0(%arg0: i32) -> (i32, i32, i32) {
    %c0_i32 = arith.constant 0 : i32
    %c0_i32_0 = arith.constant 0 : i32
    %c0_i32_1 = arith.constant 0 : i32
    return %arg0, %c0_i32, %c0_i32_0 : i32, i32, i32
  }
  func.func @transform_1(%arg0: i32) -> (i32, i32, i32) {
    %c0_i32 = arith.constant 0 : i32
    %c0_i32_0 = arith.constant 0 : i32
    %c0_i32_1 = arith.constant 0 : i32
    return %arg0, %c0_i32, %c0_i32_0 : i32, i32, i32
  }
  func.func @transform_2(%arg0: i32) -> (i32, i32, i32) {
    %c0_i32 = arith.constant 0 : i32
    %c0_i32_0 = arith.constant 0 : i32
    %c0_i32_1 = arith.constant 0 : i32
    return %arg0, %c0_i32, %c0_i32_0 : i32, i32, i32
  }
  func.func @transform_3(%arg0: i32) -> (i32, i32, i32) {
    %c0_i32 = arith.constant 0 : i32
    %c0_i32_0 = arith.constant 0 : i32
    %c0_i32_1 = arith.constant 0 : i32
    return %arg0, %c0_i32, %c0_i32_0 : i32, i32, i32
  }
}

module attributes {stable_mosaic.version = 11 : i64} {
  func.func @_ln_linear_residual_kernel(%arg0: i32, %arg1: memref<16x32xf32, #tpu.memory_space<vmem>>, %arg2: memref<16x32xf32, #tpu.memory_space<vmem>>, %arg3: memref<1x32xf32, #tpu.memory_space<vmem>>, %arg4: memref<1x32xf32, #tpu.memory_space<vmem>>, %arg5: memref<32x32xf32, #tpu.memory_space<vmem>>, %arg6: memref<1x32xf32, #tpu.memory_space<vmem>>, %arg7: memref<16x32xf32, #tpu.memory_space<vmem>>) attributes {dimension_semantics = [#tpu.dimension_semantics<parallel>], iteration_bounds = array<i64: 1>, scalar_prefetch = 0 : i64, scratch_operands = 0 : i64, tpu.core_type = #tpu.core_type<tc>, window_params = [{transform_indices = @transform_0, window_bounds = array<i64: 16, 32>}, {transform_indices = @transform_1, window_bounds = array<i64: 16, 32>}, {pipeline_mode = #tpu.pipeline_mode<synchronous>, transform_indices = @transform_2, window_bounds = array<i64: 1, 32>}, {pipeline_mode = #tpu.pipeline_mode<synchronous>, transform_indices = @transform_3, window_bounds = array<i64: 1, 32>}, {pipeline_mode = #tpu.pipeline_mode<synchronous>, transform_indices = @transform_4, window_bounds = array<i64: 32, 32>}, {pipeline_mode = #tpu.pipeline_mode<synchronous>, transform_indices = @transform_5, window_bounds = array<i64: 1, 32>}, {transform_indices = @transform_6, window_bounds = array<i64: 16, 32>}]} {
    %c0 = arith.constant 0 : index
    %c0_0 = arith.constant 0 : index
    %0 = vector.load %arg1[%c0, %c0_0] : memref<16x32xf32, #tpu.memory_space<vmem>>, vector<16x32xf32>
    %c0_1 = arith.constant 0 : index
    %c0_2 = arith.constant 0 : index
    %1 = vector.load %arg3[%c0_1, %c0_2] : memref<1x32xf32, #tpu.memory_space<vmem>>, vector<1x32xf32>
    %c0_3 = arith.constant 0 : index
    %c0_4 = arith.constant 0 : index
    %2 = vector.load %arg4[%c0_3, %c0_4] : memref<1x32xf32, #tpu.memory_space<vmem>>, vector<1x32xf32>
    %cst = arith.constant dense<0.000000e+00> : vector<16xf32>
    %3 = vector.multi_reduction <add>, %0, %cst [1] : vector<16x32xf32> to vector<16xf32>
    %4 = vector.shape_cast %3 : vector<16xf32> to vector<16x1xf32>
    %cst_5 = arith.constant 3.200000e+01 : f32
    %5 = vector.broadcast %cst_5 : f32 to vector<16x1xf32>
    %6 = arith.divf %4, %5 : vector<16x1xf32>
    %7 = vector.broadcast %6 : vector<16x1xf32> to vector<16x32xf32>
    %8 = arith.subf %0, %7 : vector<16x32xf32>
    %9 = arith.mulf %8, %8 : vector<16x32xf32>
    %cst_6 = arith.constant dense<0.000000e+00> : vector<16xf32>
    %10 = vector.multi_reduction <add>, %9, %cst_6 [1] : vector<16x32xf32> to vector<16xf32>
    %11 = vector.shape_cast %10 : vector<16xf32> to vector<16x1xf32>
    %cst_7 = arith.constant 3.200000e+01 : f32
    %12 = vector.broadcast %cst_7 : f32 to vector<16x1xf32>
    %13 = arith.divf %11, %12 : vector<16x1xf32>
    %cst_8 = arith.constant 9.99999974E-6 : f32
    %14 = vector.broadcast %cst_8 : f32 to vector<16x1xf32>
    %15 = arith.addf %13, %14 : vector<16x1xf32>
    %16 = math.rsqrt %15 : vector<16x1xf32>
    %17 = vector.broadcast %16 : vector<16x1xf32> to vector<16x32xf32>
    %18 = arith.mulf %8, %17 : vector<16x32xf32>
    %19 = vector.broadcast %1 : vector<1x32xf32> to vector<16x32xf32>
    %20 = arith.mulf %18, %19 : vector<16x32xf32>
    %21 = vector.broadcast %2 : vector<1x32xf32> to vector<16x32xf32>
    %22 = arith.addf %20, %21 : vector<16x32xf32>
    %c0_9 = arith.constant 0 : index
    %c0_10 = arith.constant 0 : index
    %23 = vector.load %arg5[%c0_9, %c0_10] : memref<32x32xf32, #tpu.memory_space<vmem>>, vector<32x32xf32>
    %cst_11 = arith.constant dense<0.000000e+00> : vector<16x32xf32>
    %24 = tpu.matmul %22, %23, %cst_11 {dimension_numbers = #tpu.dot_dimension_numbers<[1], [0], [0], [1], [0, 0, 1, 1], [], []>, precision = #tpu.contract_precision<fp32>} : vector<16x32xf32>, vector<32x32xf32>, vector<16x32xf32> -> vector<16x32xf32>
    %c0_12 = arith.constant 0 : index
    %c0_13 = arith.constant 0 : index
    %25 = vector.load %arg6[%c0_12, %c0_13] : memref<1x32xf32, #tpu.memory_space<vmem>>, vector<1x32xf32>
    %26 = vector.broadcast %25 : vector<1x32xf32> to vector<16x32xf32>
    %27 = arith.addf %24, %26 : vector<16x32xf32>
    %c0_14 = arith.constant 0 : index
    %c0_15 = arith.constant 0 : index
    %28 = vector.load %arg2[%c0_14, %c0_15] : memref<16x32xf32, #tpu.memory_space<vmem>>, vector<16x32xf32>
    %29 = arith.addf %27, %28 : vector<16x32xf32>
    %c0_16 = arith.constant 0 : index
    %c0_17 = arith.constant 0 : index
    %30 = vector.load %arg7[%c0_16, %c0_17] : memref<16x32xf32, #tpu.memory_space<vmem>>, vector<16x32xf32>
    tpu.vector_store %arg7[%c0_16, %c0_17], %29 {strides = array<i32>} : memref<16x32xf32, #tpu.memory_space<vmem>>, vector<16x32xf32>,
    return
  }
  func.func @transform_0(%arg0: i32) -> (i32, i32) {
    %c0_i32 = arith.constant 0 : i32
    %c0_i32_0 = arith.constant 0 : i32
    return %arg0, %c0_i32 : i32, i32
  }
  func.func @transform_1(%arg0: i32) -> (i32, i32) {
    %c0_i32 = arith.constant 0 : i32
    %c0_i32_0 = arith.constant 0 : i32
    return %arg0, %c0_i32 : i32, i32
  }
  func.func @transform_2(%arg0: i32) -> (i32, i32) {
    %c0_i32 = arith.constant 0 : i32
    %c0_i32_0 = arith.constant 0 : i32
    %c0_i32_1 = arith.constant 0 : i32
    return %c0_i32, %c0_i32_0 : i32, i32
  }
  func.func @transform_3(%arg0: i32) -> (i32, i32) {
    %c0_i32 = arith.constant 0 : i32
    %c0_i32_0 = arith.constant 0 : i32
    %c0_i32_1 = arith.constant 0 : i32
    return %c0_i32, %c0_i32_0 : i32, i32
  }
  func.func @transform_4(%arg0: i32) -> (i32, i32) {
    %c0_i32 = arith.constant 0 : i32
    %c0_i32_0 = arith.constant 0 : i32
    %c0_i32_1 = arith.constant 0 : i32
    return %c0_i32, %c0_i32_0 : i32, i32
  }
  func.func @transform_5(%arg0: i32) -> (i32, i32) {
    %c0_i32 = arith.constant 0 : i32
    %c0_i32_0 = arith.constant 0 : i32
    %c0_i32_1 = arith.constant 0 : i32
    return %c0_i32, %c0_i32_0 : i32, i32
  }
  func.func @transform_6(%arg0: i32) -> (i32, i32) {
    %c0_i32 = arith.constant 0 : i32
    %c0_i32_0 = arith.constant 0 : i32
    return %arg0, %c0_i32 : i32, i32
  }
}

module attributes {stable_mosaic.version = 11 : i64} {
  func.func @_ffn_kernel(%arg0: i32, %arg1: memref<16x32xf32, #tpu.memory_space<vmem>>, %arg2: memref<1x32xf32, #tpu.memory_space<vmem>>, %arg3: memref<1x32xf32, #tpu.memory_space<vmem>>, %arg4: memref<32x64xf32, #tpu.memory_space<vmem>>, %arg5: memref<1x64xf32, #tpu.memory_space<vmem>>, %arg6: memref<1x64xf32, #tpu.memory_space<vmem>>, %arg7: memref<1x64xf32, #tpu.memory_space<vmem>>, %arg8: memref<64x32xf32, #tpu.memory_space<vmem>>, %arg9: memref<1x32xf32, #tpu.memory_space<vmem>>, %arg10: memref<16x32xf32, #tpu.memory_space<vmem>>) attributes {dimension_semantics = [#tpu.dimension_semantics<parallel>], iteration_bounds = array<i64: 1>, scalar_prefetch = 0 : i64, scratch_operands = 0 : i64, tpu.core_type = #tpu.core_type<tc>, window_params = [{transform_indices = @transform_0, window_bounds = array<i64: 16, 32>}, {pipeline_mode = #tpu.pipeline_mode<synchronous>, transform_indices = @transform_1, window_bounds = array<i64: 1, 32>}, {pipeline_mode = #tpu.pipeline_mode<synchronous>, transform_indices = @transform_2, window_bounds = array<i64: 1, 32>}, {pipeline_mode = #tpu.pipeline_mode<synchronous>, transform_indices = @transform_3, window_bounds = array<i64: 32, 64>}, {pipeline_mode = #tpu.pipeline_mode<synchronous>, transform_indices = @transform_4, window_bounds = array<i64: 1, 64>}, {pipeline_mode = #tpu.pipeline_mode<synchronous>, transform_indices = @transform_5, window_bounds = array<i64: 1, 64>}, {pipeline_mode = #tpu.pipeline_mode<synchronous>, transform_indices = @transform_6, window_bounds = array<i64: 1, 64>}, {pipeline_mode = #tpu.pipeline_mode<synchronous>, transform_indices = @transform_7, window_bounds = array<i64: 64, 32>}, {pipeline_mode = #tpu.pipeline_mode<synchronous>, transform_indices = @transform_8, window_bounds = array<i64: 1, 32>}, {transform_indices = @transform_9, window_bounds = array<i64: 16, 32>}]} {
    %c0 = arith.constant 0 : index
    %c0_0 = arith.constant 0 : index
    %0 = vector.load %arg1[%c0, %c0_0] : memref<16x32xf32, #tpu.memory_space<vmem>>, vector<16x32xf32>
    %c0_1 = arith.constant 0 : index
    %c0_2 = arith.constant 0 : index
    %1 = vector.load %arg2[%c0_1, %c0_2] : memref<1x32xf32, #tpu.memory_space<vmem>>, vector<1x32xf32>
    %c0_3 = arith.constant 0 : index
    %c0_4 = arith.constant 0 : index
    %2 = vector.load %arg3[%c0_3, %c0_4] : memref<1x32xf32, #tpu.memory_space<vmem>>, vector<1x32xf32>
    %cst = arith.constant dense<0.000000e+00> : vector<16xf32>
    %3 = vector.multi_reduction <add>, %0, %cst [1] : vector<16x32xf32> to vector<16xf32>
    %4 = vector.shape_cast %3 : vector<16xf32> to vector<16x1xf32>
    %cst_5 = arith.constant 3.200000e+01 : f32
    %5 = vector.broadcast %cst_5 : f32 to vector<16x1xf32>
    %6 = arith.divf %4, %5 : vector<16x1xf32>
    %7 = vector.broadcast %6 : vector<16x1xf32> to vector<16x32xf32>
    %8 = arith.subf %0, %7 : vector<16x32xf32>
    %9 = arith.mulf %8, %8 : vector<16x32xf32>
    %cst_6 = arith.constant dense<0.000000e+00> : vector<16xf32>
    %10 = vector.multi_reduction <add>, %9, %cst_6 [1] : vector<16x32xf32> to vector<16xf32>
    %11 = vector.shape_cast %10 : vector<16xf32> to vector<16x1xf32>
    %cst_7 = arith.constant 3.200000e+01 : f32
    %12 = vector.broadcast %cst_7 : f32 to vector<16x1xf32>
    %13 = arith.divf %11, %12 : vector<16x1xf32>
    %cst_8 = arith.constant 9.99999974E-6 : f32
    %14 = vector.broadcast %cst_8 : f32 to vector<16x1xf32>
    %15 = arith.addf %13, %14 : vector<16x1xf32>
    %16 = math.rsqrt %15 : vector<16x1xf32>
    %17 = vector.broadcast %16 : vector<16x1xf32> to vector<16x32xf32>
    %18 = arith.mulf %8, %17 : vector<16x32xf32>
    %19 = vector.broadcast %1 : vector<1x32xf32> to vector<16x32xf32>
    %20 = arith.mulf %18, %19 : vector<16x32xf32>
    %21 = vector.broadcast %2 : vector<1x32xf32> to vector<16x32xf32>
    %22 = arith.addf %20, %21 : vector<16x32xf32>
    %c0_9 = arith.constant 0 : index
    %c0_10 = arith.constant 0 : index
    %23 = vector.load %arg4[%c0_9, %c0_10] : memref<32x64xf32, #tpu.memory_space<vmem>>, vector<32x64xf32>
    %cst_11 = arith.constant dense<0.000000e+00> : vector<16x64xf32>
    %24 = tpu.matmul %22, %23, %cst_11 {dimension_numbers = #tpu.dot_dimension_numbers<[1], [0], [0], [1], [0, 0, 1, 1], [], []>, precision = #tpu.contract_precision<fp32>} : vector<16x32xf32>, vector<32x64xf32>, vector<16x64xf32> -> vector<16x64xf32>
    %c0_12 = arith.constant 0 : index
    %c0_13 = arith.constant 0 : index
    %25 = vector.load %arg5[%c0_12, %c0_13] : memref<1x64xf32, #tpu.memory_space<vmem>>, vector<1x64xf32>
    %26 = vector.broadcast %25 : vector<1x64xf32> to vector<16x64xf32>
    %27 = arith.addf %24, %26 : vector<16x64xf32>
    %cst_14 = arith.constant 0.000000e+00 : f32
    %28 = vector.broadcast %cst_14 : f32 to vector<16x64xf32>
    %29 = arith.maximumf %27, %28 : vector<16x64xf32>
    %c0_15 = arith.constant 0 : index
    %c0_16 = arith.constant 0 : index
    %30 = vector.load %arg6[%c0_15, %c0_16] : memref<1x64xf32, #tpu.memory_space<vmem>>, vector<1x64xf32>
    %c0_17 = arith.constant 0 : index
    %c0_18 = arith.constant 0 : index
    %31 = vector.load %arg7[%c0_17, %c0_18] : memref<1x64xf32, #tpu.memory_space<vmem>>, vector<1x64xf32>
    %cst_19 = arith.constant dense<0.000000e+00> : vector<16xf32>
    %32 = vector.multi_reduction <add>, %29, %cst_19 [1] : vector<16x64xf32> to vector<16xf32>
    %33 = vector.shape_cast %32 : vector<16xf32> to vector<16x1xf32>
    %cst_20 = arith.constant 6.400000e+01 : f32
    %34 = vector.broadcast %cst_20 : f32 to vector<16x1xf32>
    %35 = arith.divf %33, %34 : vector<16x1xf32>
    %36 = vector.broadcast %35 : vector<16x1xf32> to vector<16x64xf32>
    %37 = arith.subf %29, %36 : vector<16x64xf32>
    %38 = arith.mulf %37, %37 : vector<16x64xf32>
    %cst_21 = arith.constant dense<0.000000e+00> : vector<16xf32>
    %39 = vector.multi_reduction <add>, %38, %cst_21 [1] : vector<16x64xf32> to vector<16xf32>
    %40 = vector.shape_cast %39 : vector<16xf32> to vector<16x1xf32>
    %cst_22 = arith.constant 6.400000e+01 : f32
    %41 = vector.broadcast %cst_22 : f32 to vector<16x1xf32>
    %42 = arith.divf %40, %41 : vector<16x1xf32>
    %cst_23 = arith.constant 9.99999974E-6 : f32
    %43 = vector.broadcast %cst_23 : f32 to vector<16x1xf32>
    %44 = arith.addf %42, %43 : vector<16x1xf32>
    %45 = math.rsqrt %44 : vector<16x1xf32>
    %46 = vector.broadcast %45 : vector<16x1xf32> to vector<16x64xf32>
    %47 = arith.mulf %37, %46 : vector<16x64xf32>
    %48 = vector.broadcast %30 : vector<1x64xf32> to vector<16x64xf32>
    %49 = arith.mulf %47, %48 : vector<16x64xf32>
    %50 = vector.broadcast %31 : vector<1x64xf32> to vector<16x64xf32>
    %51 = arith.addf %49, %50 : vector<16x64xf32>
    %c0_24 = arith.constant 0 : index
    %c0_25 = arith.constant 0 : index
    %52 = vector.load %arg8[%c0_24, %c0_25] : memref<64x32xf32, #tpu.memory_space<vmem>>, vector<64x32xf32>
    %cst_26 = arith.constant dense<0.000000e+00> : vector<16x32xf32>
    %53 = tpu.matmul %51, %52, %cst_26 {dimension_numbers = #tpu.dot_dimension_numbers<[1], [0], [0], [1], [0, 0, 1, 1], [], []>, precision = #tpu.contract_precision<fp32>} : vector<16x64xf32>, vector<64x32xf32>, vector<16x32xf32> -> vector<16x32xf32>
    %c0_27 = arith.constant 0 : index
    %c0_28 = arith.constant 0 : index
    %54 = vector.load %arg9[%c0_27, %c0_28] : memref<1x32xf32, #tpu.memory_space<vmem>>, vector<1x32xf32>
    %55 = vector.broadcast %54 : vector<1x32xf32> to vector<16x32xf32>
    %56 = arith.addf %53, %55 : vector<16x32xf32>
    %57 = arith.addf %56, %0 : vector<16x32xf32>
    %c0_29 = arith.constant 0 : index
    %c0_30 = arith.constant 0 : index
    %58 = vector.load %arg10[%c0_29, %c0_30] : memref<16x32xf32, #tpu.memory_space<vmem>>, vector<16x32xf32>
    tpu.vector_store %arg10[%c0_29, %c0_30], %57 {strides = array<i32>} : memref<16x32xf32, #tpu.memory_space<vmem>>, vector<16x32xf32>,
    return
  }
  func.func @transform_0(%arg0: i32) -> (i32, i32) {
    %c0_i32 = arith.constant 0 : i32
    %c0_i32_0 = arith.constant 0 : i32
    return %arg0, %c0_i32 : i32, i32
  }
  func.func @transform_1(%arg0: i32) -> (i32, i32) {
    %c0_i32 = arith.constant 0 : i32
    %c0_i32_0 = arith.constant 0 : i32
    %c0_i32_1 = arith.constant 0 : i32
    return %c0_i32, %c0_i32_0 : i32, i32
  }
  func.func @transform_2(%arg0: i32) -> (i32, i32) {
    %c0_i32 = arith.constant 0 : i32
    %c0_i32_0 = arith.constant 0 : i32
    %c0_i32_1 = arith.constant 0 : i32
    return %c0_i32, %c0_i32_0 : i32, i32
  }
  func.func @transform_3(%arg0: i32) -> (i32, i32) {
    %c0_i32 = arith.constant 0 : i32
    %c0_i32_0 = arith.constant 0 : i32
    %c0_i32_1 = arith.constant 0 : i32
    return %c0_i32, %c0_i32_0 : i32, i32
  }
  func.func @transform_4(%arg0: i32) -> (i32, i32) {
    %c0_i32 = arith.constant 0 : i32
    %c0_i32_0 = arith.constant 0 : i32
    %c0_i32_1 = arith.constant 0 : i32
    return %c0_i32, %c0_i32_0 : i32, i32
  }
  func.func @transform_5(%arg0: i32) -> (i32, i32) {
    %c0_i32 = arith.constant 0 : i32
    %c0_i32_0 = arith.constant 0 : i32
    %c0_i32_1 = arith.constant 0 : i32
    return %c0_i32, %c0_i32_0 : i32, i32
  }
  func.func @transform_6(%arg0: i32) -> (i32, i32) {
    %c0_i32 = arith.constant 0 : i32
    %c0_i32_0 = arith.constant 0 : i32
    %c0_i32_1 = arith.constant 0 : i32
    return %c0_i32, %c0_i32_0 : i32, i32
  }
  func.func @transform_7(%arg0: i32) -> (i32, i32) {
    %c0_i32 = arith.constant 0 : i32
    %c0_i32_0 = arith.constant 0 : i32
    %c0_i32_1 = arith.constant 0 : i32
    return %c0_i32, %c0_i32_0 : i32, i32
  }
  func.func @transform_8(%arg0: i32) -> (i32, i32) {
    %c0_i32 = arith.constant 0 : i32
    %c0_i32_0 = arith.constant 0 : i32
    %c0_i32_1 = arith.constant 0 : i32
    return %c0_i32, %c0_i32_0 : i32, i32
  }
  func.func @transform_9(%arg0: i32) -> (i32, i32) {
    %c0_i32 = arith.constant 0 : i32
    %c0_i32_0 = arith.constant 0 : i32
    return %arg0, %c0_i32 : i32, i32
  }
}

</mosaic_0001>

<bundles_post_ra>
// kernel: dilated_transformer_encoder_layer.5
= control target key start
LH: loop header
LB: loop body
LE: loop exit
PB: predicated region body
PF: predicated region fallthrough
CT: control target
= control target key end

     0   :  { %17 = vsyncpa [#allocation3], 0  ;;  %s3120_s0 = inlined_call_operand.hbm [shape: f32[16,32], index: 0, kind: input, shape index: {}]   ;;  %s3121_s1 = inlined_call_operand.hbm [shape: f32[1,32], index: 1, kind: input, shape index: {}]   ;;  %s3122_s2 = inlined_call_operand.hbm [shape: f32[1,32], index: 2, kind: input, shape index: {}]   ;;  %s3123_s3 = inlined_call_operand.hbm [shape: f32[32,32], index: 3, kind: input, shape index: {}]   ;;  %s3124_s4 = inlined_call_operand.hbm [shape: f32[1,32], index: 4, kind: input, shape index: {}]   ;;  %s3125_s5 = inlined_call_operand.hbm [shape: f32[32,32], index: 5, kind: input, shape index: {}]   ;;  %s3126_s6 = inlined_call_operand.hbm [shape: f32[1,32], index: 6, kind: input, shape index: {}]   ;;  %s3127_s7 = inlined_call_operand.hbm [shape: f32[32,32], index: 7, kind: input, shape index: {}]   ;;  %s3128_s8 = inlined_call_operand.hbm [shape: f32[1,32], index: 8, kind: input, shape index: {}]   ;;  %s3129_s9 = inlined_call_operand.hbm [shape: f32[16,32], index: 9, kind: output, shape index: {0}]   ;;  %s3130_s10 = inlined_call_operand.hbm [shape: f32[16,32], index: 10, kind: output, shape index: {1}]   ;;  %s3131_s11 = inlined_call_operand.hbm [shape: f32[16,32], index: 11, kind: output, shape index: {2}]  }
   0x1   :  { %18 = vsyncpa [#allocation6], 0 }
   0x2   :  { %19 = vsyncpa [#allocation9], 0 }
   0x3   :  { %20 = vsyncpa [#allocation12], 0 }
   0x4   :  { %21 = vsyncpa [#allocation15], 0 }
   0x5   :  { %22 = vsyncpa [#allocation4], 0 }
   0x6   :  { %23 = vsyncpa [#allocation19], 0  ;;  %s2665_s17 = smov [#allocation5]   ;;  %s2387_s21 = scalar_lea.hbm %s3121_s1, 16 }
   0x7   :  { %s42_s18 = sshll.u32 %s2665_s17, 4  ;;  %p2388_p0 = scmp.ne.s32.totalorder %s3121_s1, %s2387_s21  ;;  %s43_s18 = int_to_ptr.vmem [resolvable:$true] %s42_s18 }
   0x8   :  { %p2391_p1 = scmp.lt.u32.totalorder %s2387_s21, %s3121_s1 }
   0xa   :  { %p2393_p2 = pnand %p2391_p1, %p2388_p0 }
   0xc   :  { %2396 = shalt.err (!%p2393_p2)
}
   0xd   :  { %s2397_s26 = scalar_lea.vmem %s43_s18, 16  ;;  %s2401_s27 = scalar_lea.vmem %s43_s18, 32 }
   0xe   :  { %p2398_p3 = scmp.ne.s32.totalorder %s43_s18, %s2397_s26  ;;  %p2402_p4 = scmp.lt.s32.totalorder %s43_s18, %s43_s18 }
   0xf   :  { %p2403_p5 = scmp.lt.s32.totalorder %s2401_s27, %s2397_s26 }
  0x11   :  { %p2404_p6 = por %p2403_p5, %p2402_p4 }
  0x13   :  { %p2405_p7 = pnand %p2404_p6, %p2398_p3 }
  0x15   :  { %2408 = shalt.err (!%p2405_p7)
}
  0x16   :  { %45 = dma.hbm_to_vmem [thread:$0]  %s3121_s1, 16, %s43_s18, [#allocation6]  }
  0x17   :  { %s2666_s30 = smov [#allocation8]   ;;  %s2667_s13 = smov [#allocation11]  }
  0x18   :  { %s61_s12 = sshll.u32 %s2666_s30, 4  ;;  %s83_s14 = sshll.u32 %s2667_s13, 4  ;;  %s62_s12 = int_to_ptr.vmem [resolvable:$true] %s61_s12  ;;  %s84_s14 = int_to_ptr.vmem [resolvable:$true] %s83_s14 }
  0x19   :  { %s2409_s17 = scalar_lea.hbm %s3123_s3, 512 }
  0x1a   :  { %p2410_p8 = scmp.ne.s32.totalorder %s3123_s3, %s2409_s17  ;;  %p2413_p9 = scmp.lt.u32.totalorder %s2409_s17, %s3123_s3 }
  0x1c   :  { %p2415_p10 = pnand %p2413_p9, %p2410_p8 }
  0x1e   :  { %2418 = shalt.err (!%p2415_p10)
}
  0x1f   :  { %s2419_s1 = scalar_lea.vmem %s62_s12, 512  ;;  %p2424_p12 = scmp.lt.s32.totalorder %s62_s12, %s62_s12 }
  0x20   :  { %p2420_p11 = scmp.ne.s32.totalorder %s62_s12, %s2419_s1  ;;  %p2425_p13 = scmp.lt.s32.totalorder %s2419_s1, %s2419_s1 }
  0x22   :  { %p2426_p0 = por %p2425_p13, %p2424_p12 }
  0x24   :  { %p2427_p1 = pnand %p2426_p0, %p2420_p11 }
  0x26   :  { %2430 = shalt.err (!%p2427_p1)
}
  0x27   :  { %s2668_s18 = smov 128   ;;  %s2669_s23 = smov 8  }
  0x28   :  { %67 = dma.hbm_to_vmem [thread:$0]  %s3123_s3, 512, %s62_s12, [#allocation9], %s2668_s18, %s2668_s18, %s2669_s23  }
  0x29   :  { %s2431_s28 = scalar_lea.hbm %s3125_s5, 512 }
  0x2a   :  { %p2432_p2 = scmp.ne.s32.totalorder %s3125_s5, %s2431_s28  ;;  %p2435_p3 = scmp.lt.u32.totalorder %s2431_s28, %s3125_s5 }
  0x2c   :  { %p2437_p4 = pnand %p2435_p3, %p2432_p2 }
  0x2e   :  { %2440 = shalt.err (!%p2437_p4)
}
  0x2f   :  { %s2441_s16 = scalar_lea.vmem %s84_s14, 512  ;;  %p2446_p6 = scmp.lt.s32.totalorder %s84_s14, %s84_s14 }
  0x30   :  { %p2442_p5 = scmp.ne.s32.totalorder %s84_s14, %s2441_s16  ;;  %p2447_p7 = scmp.lt.s32.totalorder %s2441_s16, %s2441_s16 }
  0x32   :  { %p2448_p8 = por %p2447_p7, %p2446_p6 }
  0x34   :  { %p2449_p9 = pnand %p2448_p8, %p2442_p5 }
  0x36   :  { %2452 = shalt.err (!%p2449_p9)
}
  0x37   :  { %89 = dma.hbm_to_vmem [thread:$0]  %s3125_s5, 512, %s84_s14, [#allocation12], %s2668_s18, %s2668_s18, %s2669_s23  }
  0x38   :  { %s2670_s17 = smov [#allocation14]   ;;  %s2671_s20 = smov [#allocation2]  }
  0x39   :  { %s105_s19 = sshll.u32 %s2670_s17, 4  ;;  %s29_s21 = sshll.u32 %s2671_s20, 4  ;;  %s106_s19 = int_to_ptr.vmem [resolvable:$true] %s105_s19  ;;  %s30_s21 = int_to_ptr.vmem [resolvable:$true] %s29_s21 }
  0x3a   :  { %s2453_s24 = scalar_lea.hbm %s3127_s7, 512 }
  0x3b   :  { %p2454_p10 = scmp.ne.s32.totalorder %s3127_s7, %s2453_s24  ;;  %p2457_p11 = scmp.lt.u32.totalorder %s2453_s24, %s3127_s7 }
  0x3d   :  { %p2459_p12 = pnand %p2457_p11, %p2454_p10 }
  0x3f   :  { %2462 = shalt.err (!%p2459_p12)
}
  0x40   :  { %s2463_s5 = scalar_lea.vmem %s106_s19, 512  ;;  %p2468_p0 = scmp.lt.s32.totalorder %s106_s19, %s106_s19 }
  0x41   :  { %p2464_p13 = scmp.ne.s32.totalorder %s106_s19, %s2463_s5  ;;  %p2469_p1 = scmp.lt.s32.totalorder %s2463_s5, %s2463_s5 }
  0x43   :  { %p2470_p2 = por %p2469_p1, %p2468_p0 }
  0x45   :  { %p2471_p3 = pnand %p2470_p2, %p2464_p13 }
  0x47   :  { %2474 = shalt.err (!%p2471_p3)
}
  0x48   :  { %111 = dma.hbm_to_vmem [thread:$0]  %s3127_s7, 512, %s106_s19, [#allocation15], %s2668_s18, %s2668_s18, %s2669_s23  }
  0x49   :  { %s2475_s15 = scalar_lea.hbm %s3120_s0, 256 }
  0x4a   :  { %p2476_p4 = scmp.ne.s32.totalorder %s3120_s0, %s2475_s15  ;;  %p2479_p5 = scmp.lt.u32.totalorder %s2475_s15, %s3120_s0 }
  0x4c   :  { %p2481_p6 = pnand %p2479_p5, %p2476_p4 }
  0x4e   :  { %2484 = shalt.err (!%p2481_p6)
}
  0x4f   :  { %s2485_s20 = scalar_lea.vmem %s30_s21, 256  ;;  %p2490_p8 = scmp.lt.s32.totalorder %s30_s21, %s30_s21 }
  0x50   :  { %p2486_p7 = scmp.ne.s32.totalorder %s30_s21, %s2485_s20  ;;  %p2491_p9 = scmp.lt.s32.totalorder %s2485_s20, %s2485_s20 }
  0x52   :  { %p2492_p10 = por %p2491_p9, %p2490_p8 }
  0x54   :  { %p2493_p11 = pnand %p2492_p10, %p2486_p7 }
  0x56   :  { %2496 = shalt.err (!%p2493_p11)
}
  0x57   :  { %35 = dma.hbm_to_vmem [thread:$0]  %s3120_s0, 256, %s30_s21, [#allocation3], %s2668_s18, %s2668_s18, %s2669_s23  }
  0x58   :  { %s2672_s22 = smov [#allocation7]   ;;  %s2673_s24 = smov [#allocation10]  }
  0x59   :  { %s52_s1 = sshll.u32 %s2672_s22, 4  ;;  %s74_s25 = sshll.u32 %s2673_s24, 4  ;;  %s53_s1 = int_to_ptr.vmem [resolvable:$true] %s52_s1  ;;  %s75_s25 = int_to_ptr.vmem [resolvable:$true] %s74_s25 }
  0x5a   :  { %s2497_s28 = scalar_lea.hbm %s3122_s2, 16 }
  0x5b   :  { %p2498_p12 = scmp.ne.s32.totalorder %s3122_s2, %s2497_s28  ;;  %p2501_p13 = scmp.lt.u32.totalorder %s2497_s28, %s3122_s2 }
  0x5d   :  { %p2503_p0 = pnand %p2501_p13, %p2498_p12 }
  0x5f   :  { %2506 = shalt.err (!%p2503_p0)
}
  0x60   :  { %s2507_s0 = scalar_lea.vmem %s53_s1, 16  ;;  %s2511_s21 = scalar_lea.vmem %s53_s1, 32 }
  0x61   :  { %p2508_p1 = scmp.ne.s32.totalorder %s53_s1, %s2507_s0  ;;  %p2512_p2 = scmp.lt.s32.totalorder %s53_s1, %s53_s1 }
  0x62   :  { %p2513_p3 = scmp.lt.s32.totalorder %s2511_s21, %s2507_s0 }
  0x64   :  { %p2514_p4 = por %p2513_p3, %p2512_p2 }
  0x66   :  { %p2515_p5 = pnand %p2514_p4, %p2508_p1 }
  0x68   :  { %2518 = shalt.err (!%p2515_p5)
}
  0x69   :  { %55 = dma.hbm_to_vmem [thread:$0]  %s3122_s2, 16, %s53_s1, [#allocation6]  }
  0x6a   :  { %s2519_s12 = scalar_lea.hbm %s3124_s4, 16 }
  0x6b   :  { %p2520_p6 = scmp.ne.s32.totalorder %s3124_s4, %s2519_s12  ;;  %p2523_p7 = scmp.lt.u32.totalorder %s2519_s12, %s3124_s4 }
  0x6d   :  { %p2525_p8 = pnand %p2523_p7, %p2520_p6 }
  0x6f   :  { %2528 = shalt.err (!%p2525_p8)
}
  0x70   :  { %s2529_s22 = scalar_lea.vmem %s75_s25, 16  ;;  %s2533_s24 = scalar_lea.vmem %s75_s25, 32 }
  0x71   :  { %p2530_p9 = scmp.ne.s32.totalorder %s75_s25, %s2529_s22  ;;  %p2534_p10 = scmp.lt.s32.totalorder %s75_s25, %s75_s25 }
  0x72   :  { %p2535_p11 = scmp.lt.s32.totalorder %s2533_s24, %s2529_s22 }
  0x74   :  { %p2536_p12 = por %p2535_p11, %p2534_p10 }
  0x76   :  { %p2537_p13 = pnand %p2536_p12, %p2530_p9 }
  0x78   :  { %2540 = shalt.err (!%p2537_p13)
}
  0x79   :  { %77 = dma.hbm_to_vmem [thread:$0]  %s3124_s4, 16, %s75_s25, [#allocation9]  }
  0x7a   :  { %s2674_s26 = smov [#allocation13]   ;;  %s2675_s28 = smov [#allocation16]  }
  0x7b   :  { %s96_s27 = sshll.u32 %s2674_s26, 4  ;;  %s118_s5 = sshll.u32 %s2675_s28, 4  ;;  %s97_s27 = int_to_ptr.vmem [resolvable:$true] %s96_s27  ;;  %s119_s5 = int_to_ptr.vmem [resolvable:$true] %s118_s5 }
  0x7c   :  { %s2541_s30 = scalar_lea.hbm %s3126_s6, 16 }
  0x7d   :  { %p2542_p0 = scmp.ne.s32.totalorder %s3126_s6, %s2541_s30  ;;  %p2545_p1 = scmp.lt.u32.totalorder %s2541_s30, %s3126_s6 }
  0x7f   :  { %p2547_p2 = pnand %p2545_p1, %p2542_p0 }
  0x81   :  { %2550 = shalt.err (!%p2547_p2)
}
  0x82   :  { %s2551_s4 = scalar_lea.vmem %s97_s27, 16  ;;  %s2555_s25 = scalar_lea.vmem %s97_s27, 32 }
  0x83   :  { %p2552_p3 = scmp.ne.s32.totalorder %s97_s27, %s2551_s4  ;;  %p2556_p4 = scmp.lt.s32.totalorder %s97_s27, %s97_s27 }
  0x84   :  { %p2557_p5 = scmp.lt.s32.totalorder %s2555_s25, %s2551_s4 }
  0x86   :  { %p2558_p6 = por %p2557_p5, %p2556_p4 }
  0x88   :  { %p2559_p7 = pnand %p2558_p6, %p2552_p3 }
  0x8a   :  { %2562 = shalt.err (!%p2559_p7)
}
  0x8b   :  { %99 = dma.hbm_to_vmem [thread:$0]  %s3126_s6, 16, %s97_s27, [#allocation12]  }
  0x8c   :  { %s2563_s20 = scalar_lea.hbm %s3128_s8, 16 }
  0x8d   :  { %p2564_p8 = scmp.ne.s32.totalorder %s3128_s8, %s2563_s20  ;;  %p2567_p9 = scmp.lt.u32.totalorder %s2563_s20, %s3128_s8 }
  0x8f   :  { %p2569_p10 = pnand %p2567_p9, %p2564_p8 }
  0x91   :  { %2572 = shalt.err (!%p2569_p10)
}
  0x92   :  { %s2573_s2 = scalar_lea.vmem %s119_s5, 16  ;;  %s2577_s1 = scalar_lea.vmem %s119_s5, 32 }
  0x93   :  { %p2574_p11 = scmp.ne.s32.totalorder %s119_s5, %s2573_s2  ;;  %p2578_p12 = scmp.lt.s32.totalorder %s119_s5, %s119_s5 }
  0x94   :  { %p2579_p13 = scmp.lt.s32.totalorder %s2577_s1, %s2573_s2 }
  0x96   :  { %p2580_p0 = por %p2579_p13, %p2578_p12 }
  0x98   :  { %p2581_p1 = pnand %p2580_p0, %p2574_p11 }
  0x9a   :  { %2584 = shalt.err (!%p2581_p1)
}
  0x9b   :  { %121 = dma.hbm_to_vmem [thread:$0]  %s3128_s8, 16, %s119_s5, [#allocation15]  }
  0x9c   :  { %2651 = dma.done.wait [#allocation3], 256  }
  0x9d   :  { %2652 = vsyncadd [#allocation3], 4294967040 }
  0x9e   :  { %2653 = dma.done.wait [#allocation6], 32  }
  0x9f   :  { %2654 = vsyncadd [#allocation6], 4294967264 }
  0xa0   :  { %2655 = dma.done.wait [#allocation9], 528  }
  0xa1   :  { %2656 = vsyncadd [#allocation9], 4294966768 }
  0xa2   :  { %2657 = dma.done.wait [#allocation12], 528  }
  0xa3   :  { %2658 = vsyncadd [#allocation12], 4294966768 }
  0xa4   :  { %2659 = dma.done.wait [#allocation15], 528  }
  0xa5   :  { %2660 = vsyncadd [#allocation15], 4294966768  ;;  %vm153_vm0 = vcmask 261120   ;;  %v149_v0 = vld [vmem:[#allocation2] sm:$0xff]  ;;  %v150_v1 = vld [vmem:[#allocation2 + $0x8] sm:$0xff]  ;;  %s2676_s8 = smov [#allocation17]  }
  0xa6   :  { %v154_v2 = vsel %vm153_vm0, %v149_v0, 0.0  ;;  %v157_v3 = vsel %vm153_vm0, %v150_v1, 0.0  ;;  %v197_v14 = vld [vmem:[#allocation8] sm:$0xff]  ;;  %v198_v15 = vld [vmem:[#allocation8 + $0x8] sm:$0xff]  ;;  %v199_v19 = vld [vmem:[#allocation8 + $0x10] sm:$0xff]  ;;  %s1831_s27 = sshll.u32 %s2676_s8, 4  ;;  %s1832_s27 = int_to_ptr.vmem [resolvable:$true] %s1831_s27 }
  0xa7   :  { %155 = vadd.xlane.f32.xlu0 %v154_v2  ;;  %v215_v16 = vand.u32 4294901760, %v197_v14  ;;  %v218_v17 = vand.u32 4294901760, %v198_v15  ;;  %v200_v20 = vld [vmem:[#allocation8 + $0x18] sm:$0xff]  ;;  %v221_v21 = vand.u32 4294901760, %v199_v19  ;;  %s2585_s28 = scalar_lea.vmem %s1832_s27, 256  ;;  %p2590_p3 = scmp.lt.s32.totalorder %s1832_s27, %s1832_s27 }
  0xa8   :  { %v224_v22 = vand.u32 4294901760, %v200_v20  ;;  %v1878_v53 = vld [vmem:[#allocation5] ss:$0 sm:$0xff]  ;;  %v1879_v55 = vld [vmem:[#allocation7] ss:$0 sm:$0xff]  ;;  %p2586_p2 = scmp.ne.s32.totalorder %s1832_s27, %s2585_s28  ;;  %p2591_p4 = scmp.lt.s32.totalorder %s2585_s28, %s2585_s28 }
  0xa9   :  { %v2867_v18 = vpack.c.bf16 %v218_v17, %v215_v16  ;;  %v305_v24 = vsub.f32 %v197_v14, %v215_v16  ;;  %v312_v25 = vsub.f32 %v198_v15, %v218_v17  ;;  %v319_v31 = vsub.f32 %v199_v19, %v221_v21  ;;  %v1287_v15 = vld [vmem:[#allocation14 + $0x10] sm:$0xff]  ;;  %v1288_v16 = vld [vmem:[#allocation14 + $0x18] sm:$0xff] }
  0xaa   :  { %v2873_v23 = vpack.c.bf16 %v224_v22, %v221_v21  ;;  %v326_v32 = vsub.f32 %v200_v20, %v224_v22  ;;  %v1303_v21 = vand.u32 4294901760, %v1287_v15  ;;  %v1306_v22 = vand.u32 4294901760, %v1288_v16  ;;  %p2592_p5 = por %p2591_p4, %p2590_p3 }
  0xab   :  { %158 = vadd.xlane.f32.xlu0 %v157_v3  ;;  %2214 = vmatprep.subr.bf16.mxu0 %v2867_v18  ;;  %v306_v26 = vand.u32 4294901760, %v305_v24  ;;  %v313_v27 = vand.u32 4294901760, %v312_v25  ;;  %v320_v35 = vand.u32 4294901760, %v319_v31  ;;  %v2881_v44 = vpack.c.bf16 %v312_v25, %v305_v24 }
  0xac   :  { %2190 = vmatprep.subr.bf16.mxu1 %v2867_v18  ;;  %2216 = vmatpush3.bf16.msra.mxu0 %v2867_v18  ;;  %v327_v36 = vand.u32 4294901760, %v326_v32  ;;  %v2883_v45 = vpack.c.bf16 %v326_v32, %v319_v31  ;;  %p2593_p6 = pnand %p2592_p5, %p2586_p2 }
  0xad   :  { %2192 = vmatpush3.bf16.msra.mxu1 %v2867_v18  ;;  %2218 = vmatprep.subr.bf16.mxu0 %v2873_v23  ;;  %v2221_v28 = vpack.c.bf16 %v313_v27, %v306_v26  ;;  %v307_v29 = vsub.f32 %v305_v24, %v306_v26  ;;  %v314_v30 = vsub.f32 %v312_v25, %v313_v27  ;;  %v746_v24 = vld [vmem:[#allocation11 + $0x10] sm:$0xff]  ;;  %v747_v25 = vld [vmem:[#allocation11 + $0x18] sm:$0xff] }
  0xae   :  { %2194 = vmatprep.subr.bf16.mxu1 %v2873_v23  ;;  %v2225_v38 = vpack.c.bf16 %v327_v36, %v320_v35  ;;  %v321_v39 = vsub.f32 %v319_v31, %v320_v35  ;;  %v328_v40 = vsub.f32 %v326_v32, %v327_v36  ;;  %v2932_v35 = vsub.f32 %v1288_v16, %v1306_v22 }
  0xaf   :  { %v308_v33 = vand.u32 4294901760, %v307_v29  ;;  %v315_v34 = vand.u32 4294901760, %v314_v30  ;;  %v765_v29 = vand.u32 4294901760, %v747_v25 }
  0xb0   :  { %2220 = vmatpush3.bf16.msra.mxu0 %v2873_v23  ;;  %v322_v41 = vand.u32 4294901760, %v321_v39  ;;  %v329_v42 = vand.u32 4294901760, %v328_v40 }
  0xb1   :  { %2196 = vmatpush3.bf16.msra.mxu1 %v2873_v23  ;;  %2222 = vmatprep.subr.bf16.mxu0 %v2221_v28  ;;  %v2197_v37 = vpack.c.bf16 %v315_v34, %v308_v33  ;;  %v2930_v34 = vsub.f32 %v1287_v15, %v1303_v21  ;;  %v2945_v40 = vsub.f32 %v747_v25, %v765_v29 }
  0xb2   :  { %v2879_v43 = vpack.c.bf16 %v329_v42, %v322_v41 }
  0xb3   :  { %2198 = vmatprep.subr.bf16.mxu1 %v2197_v37  ;;  %v1402_v42 = vand.u32 4294901760, %v2930_v34 }
 0x134   :  { %v156_v4 = vpop.xlane.xlu0 %155 }
 0x135   :  { %v161_v5 = vmul.f32 0.03125, %v156_v4 }
 0x137   :  { %v163_v6 = vsub.f32 %v149_v0, %v161_v5 }
 0x138   :  { %v159_v7 = vpop.xlane.xlu0 %158 }
 0x139   :  { %v162_v8 = vmul.f32 0.03125, %v159_v7  ;;  %v165_v9 = vmul.f32 %v163_v6, %v163_v6  ;;  %v1286_v7 = vld [vmem:[#allocation14 + $0x8] sm:$0xff] }
 0x13b   :  { %v2861_v10 = vsub.f32 %v150_v1, %v162_v8  ;;  %v167_v11 = vsel %vm153_vm0, %v165_v9, 0.0 }
 0x13c   :  { %168 = vadd.xlane.f32.xlu1 %v167_v11  ;;  %v1300_v11 = vand.u32 4294901760, %v1286_v7 }
 0x13d   :  { %v166_v12 = vmul.f32 %v2861_v10, %v2861_v10 }
 0x13e   :  { %v2918_v27 = vsub.f32 %v1286_v7, %v1300_v11 }
 0x13f   :  { %v170_v13 = vsel %vm153_vm0, %v166_v12, 0.0  ;;  %v744_v12 = vld [vmem:[#allocation11] sm:$0xff] }
 0x140   :  { %171 = vadd.xlane.f32.xlu1 %v170_v13  ;;  %v745_v13 = vld [vmem:[#allocation11 + $0x8] sm:$0xff]  ;;  %v756_v19 = vand.u32 4294901760, %v744_v12  ;;  %v1395_v33 = vand.u32 4294901760, %v2918_v27 }
 0x141   :  { %v759_v20 = vand.u32 4294901760, %v745_v13 }
 0x142   :  { %v2923_v30 = vsub.f32 %v744_v12, %v756_v19  ;;  %v1396_v41 = vsub.f32 %v2918_v27, %v1395_v33 }
 0x143   :  { %v2925_v31 = vsub.f32 %v745_v13, %v759_v20 }
 0x1c9   :  { %v169_v46 = vpop.xlane.xlu1 %168 }
 0x1ca   :  { %v173_v47 = vmul.f32 0.03125, %v169_v46  ;;  %v2959_v46 = vpack.c.bf16 %v759_v20, %v756_v19 }
 0x1cc   :  { %v175_v48 = vadd.f32 1e-05, %v173_v47  ;;  %v2961_v47 = vpack.c.bf16 %v1306_v22, %v1303_v21 }
 0x1cd   :  { %v172_v49 = vpop.xlane.xlu1 %171 }
 0x1ce   :  { %2383 = vrsqrt.f32 %v175_v48  ;;  %v174_v50 = vmul.f32 0.03125, %v172_v49 }
 0x1d0   :  { %v176_v51 = vadd.f32 1e-05, %v174_v50 }
 0x1d2   :  { %2385 = vrsqrt.f32 %v176_v51  ;;  %v1397_v51 = vand.u32 4294901760, %v1396_v41 }
 0x1d8   :  { %v2384_v52 = vpop.eup %2383 }
 0x1d9   :  { %v179_v54 = vmul.f32 %v2384_v52, %v163_v6  ;;  %v1285_v6 = vld [vmem:[#allocation14] sm:$0xff]  ;;  %v1403_v52 = vsub.f32 %v2930_v34, %v1402_v42 }
 0x1db   :  { %v187_v56 = vmul.f32 %v1878_v53, %v179_v54 }
 0x1dc   :  { %v2386_v57 = vpop.eup %2385 }
 0x1dd   :  { %v195_v58 = vadd.f32 %v1879_v55, %v187_v56  ;;  %v180_v59 = vmul.f32 %v2386_v57, %v2861_v10  ;;  %v1297_v10 = vand.u32 4294901760, %v1285_v6 }
 0x1df   :  { %v209_v60 = vsel %vm153_vm0, %v195_v58, 0  ;;  %v188_v61 = vmul.f32 %v1878_v53, %v180_v59  ;;  %v2916_v26 = vsub.f32 %v1285_v6, %v1297_v10  ;;  %v2937_v36 = vpack.c.bf16 %v1300_v11, %v1297_v10 }
 0x1e0   :  { %v2887_v62 = vand.u32 4294901760, %v209_v60  ;;  %v1404_v59 = vand.u32 4294901760, %v1403_v52  ;;  %v2305_v10 = vpack.c.bf16 %v2932_v35, %v2930_v34 }
 0x1e1   :  { %v196_v63 = vadd.f32 %v1879_v55, %v188_v61  ;;  %v1388_v32 = vand.u32 4294901760, %v2916_v26  ;;  %v2301_v7 = vpack.c.bf16 %v2918_v27, %v2916_v26 }
 0x1e2   :  { %v2890_v0 = vsub.f32 %v209_v60, %v2887_v62 }
 0x1e3   :  { %v212_v1 = vsel %vm153_vm0, %v196_v63, 0 }
 0x1e4   :  { %v2893_v2 = vand.u32 4294901760, %v212_v1  ;;  %v2896_v3 = vand.u32 4294901760, %v2890_v0 }
 0x1e6   :  { %v2899_v4 = vsub.f32 %v212_v1, %v2893_v2  ;;  %2032 = vmatprep.mubr.f32.mxu0 %v2896_v3  ;;  %v286_v5 = vsub.f32 %v2890_v0, %v2896_v3 }
 0x1e8   :  { %v2904_v8 = vand.u32 4294901760, %v286_v5  ;;  %v2907_v9 = vand.u32 4294901760, %v2899_v4 }
 0x1ea   :  { %1999 = vmatprep.mubr.f32.mxu1 %v2904_v8  ;;  %2033 = vmatmul.mubr.f32.vlgmr.msra.gmra.mrb[0].mxu0 %v2907_v9  ;;  %v296_v14 = vsub.f32 %v2899_v4, %v2907_v9 }
 0x1eb   :  { %2224 = vmatpush3.bf16.msra.mxu0 %v2221_v28  ;;  %2043 = vmatprep.mubr.f32.mxu0 %v2887_v62  ;;  %v762_v28 = vand.u32 4294901760, %v746_v24 }
 0x1ec   :  { %2226 = vmatprep.subr.bf16.mxu0 %v2225_v38  ;;  %v2914_v17 = vand.u32 4294901760, %v296_v14  ;;  %v1880_v14 = vld [vmem:[#allocation10] ss:$0 sm:$0xff] }
 0x1ed   :  { %v2943_v39 = vsub.f32 %v746_v24, %v762_v28  ;;  %v2983_v54 = vpack.c.bf16 %v765_v29, %v762_v28 }
 0x1ee   :  { %2000 = vmatmul.mubr.f32.vlgmr.msra.gmra.mrb[0].mxu1 %v2914_v17 }
 0x1ef   :  { %2200 = vmatpush3.bf16.msra.mxu1 %v2197_v37  ;;  %2228 = vmatpush3.bf16.msra.mxu0 %v2225_v38  ;;  %v847_v37 = vand.u32 4294901760, %v2923_v30  ;;  %v854_v38 = vand.u32 4294901760, %v2925_v31  ;;  %v2257_v11 = vpack.c.bf16 %v2945_v40, %v2943_v39 }
 0x1f0   :  { %2010 = vmatprep.mubr.f32.mxu1 %v2887_v62  ;;  %2202 = vmatprep.subr.bf16.mxu1 %v2879_v43 }
 0x1f1   :  { %2230 = vmatprep.subr.bf16.mxu0 %v2867_v18  ;;  %v848_v48 = vsub.f32 %v2923_v30, %v847_v37  ;;  %v855_v49 = vsub.f32 %v2925_v31, %v854_v38  ;;  %v2269_v12 = vpack.c.bf16 %v854_v38, %v847_v37 }
 0x1f2   :  { %2044 = vmatmul.mubr.f32.vlgmr.msra.gmra.mrb[0].mxu0 %v2893_v2 }
 0x1f3   :  { %2204 = vmatpush3.bf16.msra.mxu1 %v2879_v43  ;;  %2232 = vmatpush3.bf16.msra.mxu0 %v2867_v18  ;;  %v1389_v18 = vsub.f32 %v2916_v26, %v1388_v32  ;;  %v1409_v43 = vand.u32 4294901760, %v2932_v35  ;;  %v849_v55 = vand.u32 4294901760, %v848_v48  ;;  %v856_v56 = vand.u32 4294901760, %v855_v49 }
 0x1f4   :  { %2054 = vmatprep.mubr.f32.mxu0 %v2887_v62  ;;  %2206 = vmatprep.subr.bf16.mxu1 %v2881_v44 }
 0x1f5   :  { %2234 = vmatprep.subr.bf16.mxu0 %v2873_v23  ;;  %v1390_v50 = vand.u32 4294901760, %v1389_v18  ;;  %v1410_v53 = vsub.f32 %v2932_v35, %v1409_v43  ;;  %v2245_v61 = vpack.c.bf16 %v856_v56, %v849_v55  ;;  %v2321_v13 = vpack.c.bf16 %v1409_v43, %v1402_v42 }
 0x1f6   :  { %2011 = vmatmul.mubr.f32.vlgmr.msra.gmra.mrb[0].mxu1 %v2893_v2 }
 0x1f7   :  { %2208 = vmatpush3.bf16.msra.mxu1 %v2881_v44  ;;  %2236 = vmatpush3.bf16.msra.mxu0 %v2873_v23  ;;  %v861_v44 = vand.u32 4294901760, %v2943_v39  ;;  %v868_v23 = vand.u32 4294901760, %v2945_v40  ;;  %v1411_v60 = vand.u32 4294901760, %v1410_v53 }
 0x1f8   :  { %2021 = vmatprep.mubr.f32.mxu1 %v2890_v0  ;;  %2210 = vmatprep.subr.bf16.mxu1 %v2883_v45 }
 0x1f9   :  { %2286 = vmatprep.subr.bf16.mxu0 %v2937_v36  ;;  %v862_v57 = vsub.f32 %v2943_v39, %v861_v44  ;;  %v869_v58 = vsub.f32 %v2945_v40, %v868_v23  ;;  %v2297_v5 = vpack.c.bf16 %v1411_v60, %v1404_v59 }
 0x1fa   :  { %2055 = vmatmul.mubr.f32.vlgmr.msra.gmra.mrb[0].mxu0 %v2893_v2 }
 0x1fb   :  { %2212 = vmatpush3.bf16.msra.mxu1 %v2883_v45  ;;  %2288 = vmatpush3.bf16.msra.mxu0 %v2937_v36  ;;  %v2293_v45 = vpack.c.bf16 %v1397_v51, %v1390_v50  ;;  %v863_v63 = vand.u32 4294901760, %v862_v57  ;;  %v870_v1 = vand.u32 4294901760, %v869_v58 }
 0x1fc   :  { %2131 = vmatprep.mubr.f32.mxu0 %v2904_v8  ;;  %2238 = vmatprep.subr.bf16.mxu1 %v2959_v46 }
 0x1fd   :  { %2290 = vmatprep.subr.bf16.mxu0 %v2961_v47  ;;  %v2249_v6 = vpack.c.bf16 %v870_v1, %v863_v63 }
 0x1fe   :  { %2022 = vmatmul.mubr.f32.vlgmr.msra.gmra.mrb[0].mxu1 %v2899_v4 }
 0x1ff   :  { %2240 = vmatpush3.bf16.msra.mxu1 %v2959_v46  ;;  %2292 = vmatpush3.bf16.msra.mxu0 %v2961_v47 }
 0x200   :  { %2065 = vmatprep.mubr.f32.mxu1 %v2904_v8  ;;  %2242 = vmatprep.subr.bf16.mxu1 %v2983_v54  ;;  %v2253_v8 = vpack.c.bf16 %v2925_v31, %v2923_v30 }
 0x201   :  { %2294 = vmatprep.subr.bf16.mxu0 %v2293_v45 }
 0x202   :  { %2132 = vmatmul.mubr.f32.vlgmr.msra.gmra.mrb[2].mxu0 %v2914_v17 }
 0x203   :  { %2244 = vmatpush3.bf16.msra.mxu1 %v2983_v54  ;;  %2296 = vmatpush3.bf16.msra.mxu0 %v2293_v45 }
 0x204   :  { %2142 = vmatprep.mubr.f32.mxu0 %v2887_v62  ;;  %2246 = vmatprep.subr.bf16.mxu1 %v2245_v61 }
 0x205   :  { %2298 = vmatprep.subr.bf16.mxu0 %v2297_v5 }
 0x206   :  { %2066 = vmatmul.mubr.f32.vlgmr.msra.gmra.mrb[2].mxu1 %v2914_v17 }
 0x207   :  { %2248 = vmatpush3.bf16.msra.mxu1 %v2245_v61  ;;  %2076 = vmatprep.mubr.f32.mxu1 %v2887_v62 }
 0x208   :  { %2300 = vmatpush3.bf16.msra.mxu0 %v2297_v5  ;;  %2250 = vmatprep.subr.bf16.mxu1 %v2249_v6 }
 0x209   :  { %2302 = vmatprep.subr.bf16.mxu0 %v2301_v7 }
 0x20b   :  { %2143 = vmatmul.mubr.f32.vlgmr.msra.gmra.mrb[2].mxu0 %v2893_v2  ;;  %2252 = vmatpush3.bf16.msra.mxu1 %v2249_v6 }
 0x20c   :  { %2304 = vmatpush3.bf16.msra.mxu0 %v2301_v7  ;;  %2153 = vmatprep.mubr.f32.mxu0 %v2890_v0 }
 0x20d   :  { %2254 = vmatprep.subr.bf16.mxu1 %v2253_v8  ;;  %2306 = vmatprep.subr.bf16.mxu0 %v2305_v10 }
 0x20e   :  { %2077 = vmatmul.mubr.f32.vlgmr.msra.gmra.mrb[2].mxu1 %v2893_v2 }
 0x20f   :  { %2256 = vmatpush3.bf16.msra.mxu1 %v2253_v8  ;;  %2087 = vmatprep.mubr.f32.mxu1 %v2890_v0  ;;  %v2317_v0 = vpack.c.bf16 %v1395_v33, %v1388_v32 }
 0x210   :  { %2308 = vmatpush3.bf16.msra.mxu0 %v2305_v10  ;;  %2258 = vmatprep.subr.bf16.mxu1 %v2257_v11 }
 0x211   :  { %2310 = vmatprep.subr.bf16.mxu0 %v2937_v36 }
 0x213   :  { %2154 = vmatmul.mubr.f32.vlgmr.msra.gmra.mrb[2].mxu0 %v2899_v4  ;;  %2260 = vmatpush3.bf16.msra.mxu1 %v2257_v11 }
 0x214   :  { %2312 = vmatpush3.bf16.msra.mxu0 %v2937_v36  ;;  %2164 = vmatprep.mubr.f32.mxu0 %v2896_v3 }
 0x215   :  { %2262 = vmatprep.subr.bf16.mxu1 %v2959_v46  ;;  %2314 = vmatprep.subr.bf16.mxu0 %v2961_v47 }
 0x216   :  { %2088 = vmatmul.mubr.f32.vlgmr.msra.gmra.mrb[2].mxu1 %v2899_v4 }
 0x217   :  { %2264 = vmatpush3.bf16.msra.mxu1 %v2959_v46  ;;  %2098 = vmatprep.mubr.f32.mxu1 %v2896_v3  ;;  %v2273_v3 = vpack.c.bf16 %v868_v23, %v861_v44 }
 0x218   :  { %2316 = vmatpush3.bf16.msra.mxu0 %v2961_v47  ;;  %2266 = vmatprep.subr.bf16.mxu1 %v2983_v54 }
 0x219   :  { %2318 = vmatprep.subr.bf16.mxu0 %v2317_v0 }
 0x21b   :  { %2165 = vmatmul.mubr.f32.vlgmr.msra.gmra.mrb[2].mxu0 %v2907_v9  ;;  %2268 = vmatpush3.bf16.msra.mxu1 %v2983_v54 }
 0x21c   :  { %2320 = vmatpush3.bf16.msra.mxu0 %v2317_v0  ;;  %2175 = vmatprep.mubr.f32.mxu0 %v2887_v62 }
 0x21d   :  { %2270 = vmatprep.subr.bf16.mxu1 %v2269_v12  ;;  %2322 = vmatprep.subr.bf16.mxu0 %v2321_v13 }
 0x21e   :  { %2099 = vmatmul.mubr.f32.vlgmr.msra.gmra.mrb[2].mxu1 %v2907_v9 }
 0x21f   :  { %2272 = vmatpush3.bf16.msra.mxu1 %v2269_v12  ;;  %2109 = vmatprep.mubr.f32.mxu1 %v2887_v62 }
 0x220   :  { %2324 = vmatpush3.bf16.msra.mxu0 %v2321_v13  ;;  %2274 = vmatprep.subr.bf16.mxu1 %v2273_v3 }
 0x221   :  { %2326 = vmatprep.subr.bf16.mxu0 %v2937_v36 }
 0x223   :  { %2176 = vmatmul.mubr.f32.vlgmr.msra.gmra.mrb[2].mxu0 %v2893_v2  ;;  %2276 = vmatpush3.bf16.msra.mxu1 %v2273_v3 }
 0x224   :  { %2328 = vmatpush3.bf16.msra.mxu0 %v2937_v36  ;;  %2186 = vmatprep.mubr.f32.mxu0 %v2887_v62 }
 0x225   :  { %2278 = vmatprep.subr.bf16.mxu1 %v2959_v46  ;;  %2330 = vmatprep.subr.bf16.mxu0 %v2961_v47 }
 0x226   :  { %2110 = vmatmul.mubr.f32.vlgmr.msra.gmra.mrb[2].mxu1 %v2893_v2 }
 0x227   :  { %2280 = vmatpush3.bf16.msra.mxu1 %v2959_v46  ;;  %2120 = vmatprep.mubr.f32.mxu1 %v2887_v62 }
 0x228   :  { %2332 = vmatpush3.bf16.msra.mxu0 %v2961_v47  ;;  %2282 = vmatprep.subr.bf16.mxu1 %v2983_v54 }
 0x22b   :  { %2187 = vmatmul.mubr.f32.vlgmr.msra.gmra.mrb[2].mxu0 %v2893_v2  ;;  %2284 = vmatpush3.bf16.msra.mxu1 %v2983_v54 }
 0x22e   :  { %2121 = vmatmul.mubr.f32.vlgmr.msra.gmra.mrb[2].mxu1 %v2893_v2 }
 0x2cd   :  { %v2056_v4 = vpop.f32.mrb[0].mxu0 }
 0x2ce   :  { %v732_v9 = vpop.f32.mrb[1].mxu0 }
 0x2d1   :  { %v2023_v15 = vpop.f32.mrb[0].mxu1 }
 0x2d2   :  { %v2333_v16 = vadd.f32 %v2023_v15, %v1880_v14  ;;  %v476_v17 = vpop.f32.mrb[1].mxu1 }
 0x2d3   :  { %v2335_v19 = vadd.f32 %v1880_v14, %v476_v17 }
 0x2d4   :  { %v2334_v62 = vadd.f32 %v2333_v16, %v2056_v4 }
 0x2d5   :  { %v2336_v20 = vadd.f32 %v2335_v19, %v732_v9 }
 0x2d6   :  { %743 = vst.msk [vmem:[#allocation17 + $0x8] sm:$0xff] %vm153_vm0, %v2334_v62 }
 0x2d7   :  { %742 = vst.msk [vmem:[#allocation17] sm:$0xff] %vm153_vm0, %v2336_v20 }
 0x2d8   :  { %2596 = shalt.err (!%p2593_p6)
}
 0x2d9   :  { %s2597_s29 = scalar_lea.hbm %s3129_s9, 256 }
 0x2da   :  { %p2598_p7 = scmp.ne.s32.totalorder %s3129_s9, %s2597_s29  ;;  %p2601_p8 = scmp.lt.u32.totalorder %s2597_s29, %s3129_s9 }
 0x2dc   :  { %p2603_p9 = pnand %p2601_p8, %p2598_p7 }
 0x2de   :  { %2606 = shalt.err (!%p2603_p9)
}
 0x2df   :  { %1837 = dma.vmem_to_hbm [thread:$0]  %s1832_s27, 256, %s3129_s9, [#allocation4], %s2668_s18, %s2668_s18, %s2669_s23   ;;  %v1882_v2 = vld [vmem:[#allocation16] ss:$0 sm:$0xff]  ;;  %v1881_v25 = vld [vmem:[#allocation13] ss:$0 sm:$0xff] }
 0x2e0   :  { %s2677_s25 = smov [#allocation18]   ;;  %s2678_s3 = smov [#allocation20]  }
 0x2e1   :  { %s1843_s16 = sshll.u32 %s2677_s25, 4  ;;  %s1855_s12 = sshll.u32 %s2678_s3, 4  ;;  %s1844_s16 = int_to_ptr.vmem [resolvable:$true] %s1843_s16  ;;  %s3082_s12 = int_to_ptr.vmem [resolvable:$true] %s1855_s12 }
 0x2e2   :  { %s2607_s9 = scalar_lea.vmem %s1844_s16, 256  ;;  %p2612_p11 = scmp.lt.s32.totalorder %s1844_s16, %s1844_s16 }
 0x2e3   :  { %p2608_p10 = scmp.ne.s32.totalorder %s1844_s16, %s2607_s9  ;;  %p2613_p12 = scmp.lt.s32.totalorder %s2607_s9, %s2607_s9 }
 0x2e5   :  { %p2614_p13 = por %p2613_p12, %p2612_p11 }
 0x2e7   :  { %p2615_p0 = pnand %p2614_p13, %p2608_p10 }
 0x2fe   :  { %v2188_v21 = vpop.f32.mrb[2].mxu0 }
 0x2ff   :  { %v2339_v22 = vadd.f32 %v2188_v21, %v1882_v2  ;;  %v1814_v24 = vpop.f32.mrb[3].mxu0 }
 0x300   :  { %v2340_v26 = vadd.f32 %v1882_v2, %v1814_v24 }
 0x301   :  { %1825 = vst.msk [vmem:[#allocation20 + $0x8] sm:$0xff] %vm153_vm0, %v2339_v22  ;;  %v2122_v27 = vpop.f32.mrb[2].mxu1 }
 0x302   :  { %1824 = vst.msk [vmem:[#allocation20] sm:$0xff] %vm153_vm0, %v2340_v26  ;;  %v2337_v28 = vadd.f32 %v2122_v27, %v1881_v25  ;;  %v1273_v29 = vpop.f32.mrb[3].mxu1 }
 0x303   :  { %v2338_v30 = vadd.f32 %v1881_v25, %v1273_v29 }
 0x304   :  { %1284 = vst.msk [vmem:[#allocation18 + $0x8] sm:$0xff] %vm153_vm0, %v2337_v28 }
 0x305   :  { %1283 = vst.msk [vmem:[#allocation18] sm:$0xff] %vm153_vm0, %v2338_v30 }
 0x306   :  { %2618 = shalt.err (!%p2615_p0)
}
 0x307   :  { %s2619_s7 = scalar_lea.hbm %s3130_s10, 256 }
 0x308   :  { %p2620_p1 = scmp.ne.s32.totalorder %s3130_s10, %s2619_s7  ;;  %p2623_p2 = scmp.lt.u32.totalorder %s2619_s7, %s3130_s10 }
 0x30a   :  { %p2625_p3 = pnand %p2623_p2, %p2620_p1 }
 0x30c   :  { %2628 = shalt.err (!%p2625_p3)
}
 0x30d   :  { %1849 = dma.vmem_to_hbm [thread:$0]  %s1844_s16, 256, %s3130_s10, [#allocation19], %s2668_s18, %s2668_s18, %s2669_s23  }
 0x30e   :  { %s2629_s26 = scalar_lea.vmem %s3082_s12, 256  ;;  %p2634_p5 = scmp.lt.s32.totalorder %s3082_s12, %s3082_s12 }
 0x30f   :  { %p2630_p4 = scmp.ne.s32.totalorder %s3082_s12, %s2629_s26  ;;  %p2635_p6 = scmp.lt.s32.totalorder %s2629_s26, %s2629_s26 }
 0x311   :  { %p2636_p7 = por %p2635_p6, %p2634_p5 }
 0x313   :  { %p2637_p8 = pnand %p2636_p7, %p2630_p4 }
 0x315   :  { %2640 = shalt.err (!%p2637_p8)
}
 0x316   :  { %s2641_s28 = scalar_lea.hbm %s3131_s11, 256 }
 0x317   :  { %p2642_p9 = scmp.ne.s32.totalorder %s3131_s11, %s2641_s28  ;;  %p2645_p10 = scmp.lt.u32.totalorder %s2641_s28, %s3131_s11 }
 0x319   :  { %p2647_p11 = pnand %p2645_p10, %p2642_p9 }
 0x31b   :  { %2650 = shalt.err (!%p2647_p11)
}
 0x31c   :  { %1861 = dma.vmem_to_hbm [thread:$0]  %s3082_s12, 256, %s3131_s11, [#allocation19], %s2668_s18, %s2668_s18, %s2669_s23  }
 0x31d   :  { %2661 = dma.done.wait [#allocation4], 256  }
 0x31e   :  { %2662 = vsyncadd [#allocation4], 4294967040 }
 0x31f   :  { %2663 = dma.done.wait [#allocation19], 512  }
 0x320   :  { %2664 = vsyncadd [#allocation19], 4294966784 }
 0x321   :  { %1871 = vsyncpa [#allocation3], 1 }
 0x322   :  { %1872 = vsyncpa [#allocation6], 1 }
 0x323   :  { %1873 = vsyncpa [#allocation9], 1 }
 0x324   :  { %1874 = vsyncpa [#allocation12], 1 }
 0x325   :  { %1875 = vsyncpa [#allocation15], 1 }
 0x326   :  { %1876 = vsyncpa [#allocation4], 1 }
 0x327   :  { %1877 = vsyncpa [#allocation19], 1 }

// kernel: dilated_transformer_encoder_layer.8
= control target key start
LH: loop header
LB: loop body
LE: loop exit
PB: predicated region body
PF: predicated region fallthrough
CT: control target
= control target key end

     0   :  { %11 = vsyncpa [#allocation3], 0  ;;  %s1233_s0 = inlined_call_operand.hbm [shape: f32[16,32], index: 0, kind: input, shape index: {}]   ;;  %s1234_s1 = inlined_call_operand.hbm [shape: f32[16,32], index: 1, kind: input, shape index: {}]   ;;  %s1235_s2 = inlined_call_operand.hbm [shape: f32[1,32], index: 2, kind: input, shape index: {}]   ;;  %s1236_s3 = inlined_call_operand.hbm [shape: f32[1,32], index: 3, kind: input, shape index: {}]   ;;  %s1237_s4 = inlined_call_operand.hbm [shape: f32[32,32], index: 4, kind: input, shape index: {}]   ;;  %s1238_s5 = inlined_call_operand.hbm [shape: f32[1,32], index: 5, kind: input, shape index: {}]   ;;  %s1239_s6 = inlined_call_operand.hbm [shape: f32[16,32], index: 6, kind: output, shape index: {}]  }
   0x1   :  { %12 = vsyncpa [#allocation6], 0 }
   0x2   :  { %13 = vsyncpa [#allocation9], 0 }
   0x3   :  { %14 = vsyncpa [#allocation12], 0 }
   0x4   :  { %15 = vsyncpa [#allocation4], 0  ;;  %s1061_s21 = smov [#allocation5]   ;;  %s1062_s23 = smov [#allocation8]  }
   0x5   :  { %s33_s22 = sshll.u32 %s1061_s21, 4  ;;  %s56_s24 = sshll.u32 %s1062_s23, 4  ;;  %s34_s22 = int_to_ptr.vmem [resolvable:$true] %s33_s22  ;;  %s1105_s24 = int_to_ptr.vmem [resolvable:$true] %s56_s24 }
   0x6   :  { %s897_s27 = scalar_lea.hbm %s1234_s1, 256 }
   0x7   :  { %p898_p0 = scmp.ne.s32.totalorder %s1234_s1, %s897_s27  ;;  %p901_p1 = scmp.lt.u32.totalorder %s897_s27, %s1234_s1 }
   0x9   :  { %p903_p2 = pnand %p901_p1, %p898_p0 }
   0xb   :  { %906 = shalt.err (!%p903_p2)
}
   0xc   :  { %s907_s8 = scalar_lea.vmem %s34_s22, 256  ;;  %p912_p4 = scmp.lt.s32.totalorder %s34_s22, %s34_s22 }
   0xd   :  { %p908_p3 = scmp.ne.s32.totalorder %s34_s22, %s907_s8  ;;  %p913_p5 = scmp.lt.s32.totalorder %s907_s8, %s907_s8 }
   0xf   :  { %p914_p6 = por %p913_p5, %p912_p4 }
  0x11   :  { %p915_p7 = pnand %p914_p6, %p908_p3 }
  0x13   :  { %918 = shalt.err (!%p915_p7)
}
  0x14   :  { %s1063_s9 = smov 128   ;;  %s1064_s10 = smov 8  }
  0x15   :  { %39 = dma.hbm_to_vmem [thread:$0]  %s1234_s1, 256, %s34_s22, [#allocation6], %s1063_s9, %s1063_s9, %s1064_s10  }
  0x16   :  { %s919_s15 = scalar_lea.hbm %s1236_s3, 16 }
  0x17   :  { %p920_p8 = scmp.ne.s32.totalorder %s1236_s3, %s919_s15  ;;  %p923_p9 = scmp.lt.u32.totalorder %s919_s15, %s1236_s3 }
  0x19   :  { %p925_p10 = pnand %p923_p9, %p920_p8 }
  0x1b   :  { %928 = shalt.err (!%p925_p10)
}
  0x1c   :  { %s929_s20 = scalar_lea.vmem %s1105_s24, 16  ;;  %s933_s1 = scalar_lea.vmem %s1105_s24, 32 }
  0x1d   :  { %p930_p11 = scmp.ne.s32.totalorder %s1105_s24, %s929_s20  ;;  %p934_p12 = scmp.lt.s32.totalorder %s1105_s24, %s1105_s24 }
  0x1e   :  { %p935_p13 = scmp.lt.s32.totalorder %s933_s1, %s929_s20 }
  0x20   :  { %p936_p0 = por %p935_p13, %p934_p12 }
  0x22   :  { %p937_p1 = pnand %p936_p0, %p930_p11 }
  0x24   :  { %940 = shalt.err (!%p937_p1)
}
  0x25   :  { %59 = dma.hbm_to_vmem [thread:$0]  %s1236_s3, 16, %s1105_s24, [#allocation9]  }
  0x26   :  { %s1065_s23 = smov [#allocation2]   ;;  %s1066_s26 = smov [#allocation7]  }
  0x27   :  { %s21_s25 = sshll.u32 %s1065_s23, 4  ;;  %s46_s27 = sshll.u32 %s1066_s26, 4  ;;  %s22_s25 = int_to_ptr.vmem [resolvable:$true] %s21_s25  ;;  %s47_s27 = int_to_ptr.vmem [resolvable:$true] %s46_s27 }
  0x28   :  { %s941_s30 = scalar_lea.hbm %s1233_s0, 256 }
  0x29   :  { %p942_p2 = scmp.ne.s32.totalorder %s1233_s0, %s941_s30  ;;  %p945_p3 = scmp.lt.u32.totalorder %s941_s30, %s1233_s0 }
  0x2b   :  { %p947_p4 = pnand %p945_p3, %p942_p2 }
  0x2d   :  { %950 = shalt.err (!%p947_p4)
}
  0x2e   :  { %s951_s3 = scalar_lea.vmem %s22_s25, 256  ;;  %p956_p6 = scmp.lt.s32.totalorder %s22_s25, %s22_s25 }
  0x2f   :  { %p952_p5 = scmp.ne.s32.totalorder %s22_s25, %s951_s3  ;;  %p957_p7 = scmp.lt.s32.totalorder %s951_s3, %s951_s3 }
  0x31   :  { %p958_p8 = por %p957_p7, %p956_p6 }
  0x33   :  { %p959_p9 = pnand %p958_p8, %p952_p5 }
  0x35   :  { %962 = shalt.err (!%p959_p9)
}
  0x36   :  { %27 = dma.hbm_to_vmem [thread:$0]  %s1233_s0, 256, %s22_s25, [#allocation3], %s1063_s9, %s1063_s9, %s1064_s10  }
  0x37   :  { %s963_s16 = scalar_lea.hbm %s1235_s2, 16 }
  0x38   :  { %p964_p10 = scmp.ne.s32.totalorder %s1235_s2, %s963_s16  ;;  %p967_p11 = scmp.lt.u32.totalorder %s963_s16, %s1235_s2 }
  0x3a   :  { %p969_p12 = pnand %p967_p11, %p964_p10 }
  0x3c   :  { %972 = shalt.err (!%p969_p12)
}
  0x3d   :  { %s973_s1 = scalar_lea.vmem %s47_s27, 16  ;;  %s977_s21 = scalar_lea.vmem %s47_s27, 32 }
  0x3e   :  { %p974_p13 = scmp.ne.s32.totalorder %s47_s27, %s973_s1  ;;  %p978_p0 = scmp.lt.s32.totalorder %s47_s27, %s47_s27 }
  0x3f   :  { %p979_p1 = scmp.lt.s32.totalorder %s977_s21, %s973_s1 }
  0x41   :  { %p980_p2 = por %p979_p1, %p978_p0 }
  0x43   :  { %p981_p3 = pnand %p980_p2, %p974_p13 }
  0x45   :  { %984 = shalt.err (!%p981_p3)
}
  0x46   :  { %49 = dma.hbm_to_vmem [thread:$0]  %s1235_s2, 16, %s47_s27, [#allocation6]  }
  0x47   :  { %s1067_s23 = smov [#allocation10]   ;;  %s1068_s26 = smov [#allocation11]  }
  0x48   :  { %s65_s25 = sshll.u32 %s1067_s23, 4  ;;  %s78_s28 = sshll.u32 %s1068_s26, 4  ;;  %s66_s25 = int_to_ptr.vmem [resolvable:$true] %s65_s25  ;;  %s79_s28 = int_to_ptr.vmem [resolvable:$true] %s78_s28 }
  0x49   :  { %s985_s7 = scalar_lea.hbm %s1237_s4, 512 }
  0x4a   :  { %p986_p4 = scmp.ne.s32.totalorder %s1237_s4, %s985_s7  ;;  %p989_p5 = scmp.lt.u32.totalorder %s985_s7, %s1237_s4 }
  0x4c   :  { %p991_p6 = pnand %p989_p5, %p986_p4 }
  0x4e   :  { %994 = shalt.err (!%p991_p6)
}
  0x4f   :  { %s995_s2 = scalar_lea.vmem %s66_s25, 512  ;;  %p1000_p8 = scmp.lt.s32.totalorder %s66_s25, %s66_s25 }
  0x50   :  { %p996_p7 = scmp.ne.s32.totalorder %s66_s25, %s995_s2  ;;  %p1001_p9 = scmp.lt.s32.totalorder %s995_s2, %s995_s2 }
  0x52   :  { %p1002_p10 = por %p1001_p9, %p1000_p8 }
  0x54   :  { %p1003_p11 = pnand %p1002_p10, %p996_p7 }
  0x56   :  { %1006 = shalt.err (!%p1003_p11)
}
  0x57   :  { %71 = dma.hbm_to_vmem [thread:$0]  %s1237_s4, 512, %s66_s25, [#allocation9], %s1063_s9, %s1063_s9, %s1064_s10  }
  0x58   :  { %s1007_s15 = scalar_lea.hbm %s1238_s5, 16 }
  0x59   :  { %p1008_p12 = scmp.ne.s32.totalorder %s1238_s5, %s1007_s15  ;;  %p1011_p13 = scmp.lt.u32.totalorder %s1007_s15, %s1238_s5 }
  0x5b   :  { %p1013_p0 = pnand %p1011_p13, %p1008_p12 }
  0x5d   :  { %1016 = shalt.err (!%p1013_p0)
}
  0x5e   :  { %s1017_s20 = scalar_lea.vmem %s79_s28, 16  ;;  %s1021_s1 = scalar_lea.vmem %s79_s28, 32 }
  0x5f   :  { %p1018_p1 = scmp.ne.s32.totalorder %s79_s28, %s1017_s20  ;;  %p1022_p2 = scmp.lt.s32.totalorder %s79_s28, %s79_s28 }
  0x60   :  { %p1023_p3 = scmp.lt.s32.totalorder %s1021_s1, %s1017_s20 }
  0x62   :  { %p1024_p4 = por %p1023_p3, %p1022_p2 }
  0x64   :  { %p1025_p5 = pnand %p1024_p4, %p1018_p1 }
  0x66   :  { %1028 = shalt.err (!%p1025_p5)
}
  0x67   :  { %81 = dma.hbm_to_vmem [thread:$0]  %s1238_s5, 16, %s79_s28, [#allocation12]  }
  0x68   :  { %1051 = dma.done.wait [#allocation3], 256  }
  0x69   :  { %1052 = vsyncadd [#allocation3], 4294967040 }
  0x6a   :  { %1053 = dma.done.wait [#allocation6], 272  }
  0x6b   :  { %1054 = vsyncadd [#allocation6], 4294967024 }
  0x6c   :  { %1055 = dma.done.wait [#allocation9], 528  }
  0x6d   :  { %1056 = vsyncadd [#allocation9], 4294966768 }
  0x6e   :  { %1057 = dma.done.wait [#allocation12], 16  }
  0x6f   :  { %1058 = vsyncadd [#allocation12], 4294967280  ;;  %vm104_vm0 = vcmask 261120   ;;  %v100_v0 = vld [vmem:[#allocation2] sm:$0xff]  ;;  %v101_v1 = vld [vmem:[#allocation2 + $0x8] sm:$0xff]  ;;  %s1069_s5 = smov [#allocation13]  }
  0x70   :  { %v105_v2 = vsel %vm104_vm0, %v100_v0, 0.0  ;;  %v108_v3 = vsel %vm104_vm0, %v101_v1, 0.0  ;;  %v148_v14 = vld [vmem:[#allocation10] sm:$0xff]  ;;  %v149_v15 = vld [vmem:[#allocation10 + $0x8] sm:$0xff]  ;;  %v150_v16 = vld [vmem:[#allocation10 + $0x10] sm:$0xff]  ;;  %s704_s0 = sshll.u32 %s1069_s5, 4  ;;  %s705_s0 = int_to_ptr.vmem [resolvable:$true] %s704_s0 }
  0x71   :  { %106 = vadd.xlane.f32.xlu0 %v105_v2  ;;  %v166_v17 = vand.u32 4294901760, %v148_v14  ;;  %v169_v18 = vand.u32 4294901760, %v149_v15  ;;  %v151_v19 = vld [vmem:[#allocation10 + $0x18] sm:$0xff]  ;;  %v172_v20 = vand.u32 4294901760, %v150_v16  ;;  %s1029_s22 = scalar_lea.vmem %s705_s0, 256  ;;  %p1034_p7 = scmp.lt.s32.totalorder %s705_s0, %s705_s0 }
  0x72   :  { %v175_v21 = vand.u32 4294901760, %v151_v19  ;;  %v719_v53 = vld [vmem:[#allocation7] ss:$0 sm:$0xff]  ;;  %v720_v55 = vld [vmem:[#allocation8] ss:$0 sm:$0xff]  ;;  %p1030_p6 = scmp.ne.s32.totalorder %s705_s0, %s1029_s22  ;;  %p1035_p8 = scmp.lt.s32.totalorder %s1029_s22, %s1029_s22 }
  0x73   :  { %v1198_v22 = vpack.c.bf16 %v169_v18, %v166_v17  ;;  %v256_v24 = vsub.f32 %v148_v14, %v166_v17  ;;  %v263_v25 = vsub.f32 %v149_v15, %v169_v18  ;;  %v270_v31 = vsub.f32 %v150_v16, %v172_v20  ;;  %v694_v16 = vld [vmem:[#allocation5 + $0x8] sm:$0xff] }
  0x74   :  { %v1200_v23 = vpack.c.bf16 %v175_v21, %v172_v20  ;;  %v277_v32 = vsub.f32 %v151_v19, %v175_v21  ;;  %v693_v19 = vld [vmem:[#allocation5] sm:$0xff]  ;;  %p1036_p9 = por %p1035_p8, %p1034_p7 }
  0x75   :  { %109 = vadd.xlane.f32.xlu0 %v108_v3  ;;  %849 = vmatprep.subr.bf16.mxu0 %v1198_v22  ;;  %v257_v26 = vand.u32 4294901760, %v256_v24  ;;  %v264_v27 = vand.u32 4294901760, %v263_v25  ;;  %v271_v35 = vand.u32 4294901760, %v270_v31  ;;  %v840_v44 = vpack.c.bf16 %v263_v25, %v256_v24 }
  0x76   :  { %825 = vmatprep.subr.bf16.mxu1 %v1198_v22  ;;  %851 = vmatpush3.bf16.msra.mxu0 %v1198_v22  ;;  %v278_v36 = vand.u32 4294901760, %v277_v32  ;;  %v844_v45 = vpack.c.bf16 %v277_v32, %v270_v31  ;;  %p1037_p10 = pnand %p1036_p9, %p1030_p6 }
  0x77   :  { %827 = vmatpush3.bf16.msra.mxu1 %v1198_v22  ;;  %853 = vmatprep.subr.bf16.mxu0 %v1200_v23  ;;  %v856_v28 = vpack.c.bf16 %v264_v27, %v257_v26  ;;  %v258_v29 = vsub.f32 %v256_v24, %v257_v26  ;;  %v265_v30 = vsub.f32 %v263_v25, %v264_v27 }
  0x78   :  { %829 = vmatprep.subr.bf16.mxu1 %v1200_v23  ;;  %v860_v38 = vpack.c.bf16 %v278_v36, %v271_v35  ;;  %v272_v39 = vsub.f32 %v270_v31, %v271_v35  ;;  %v279_v40 = vsub.f32 %v277_v32, %v278_v36 }
  0x79   :  { %v259_v33 = vand.u32 4294901760, %v258_v29  ;;  %v266_v34 = vand.u32 4294901760, %v265_v30 }
  0x7a   :  { %855 = vmatpush3.bf16.msra.mxu0 %v1200_v23  ;;  %v273_v41 = vand.u32 4294901760, %v272_v39  ;;  %v280_v42 = vand.u32 4294901760, %v279_v40 }
  0x7b   :  { %831 = vmatpush3.bf16.msra.mxu1 %v1200_v23  ;;  %857 = vmatprep.subr.bf16.mxu0 %v856_v28  ;;  %v832_v37 = vpack.c.bf16 %v266_v34, %v259_v33 }
  0x7c   :  { %v836_v43 = vpack.c.bf16 %v280_v42, %v273_v41 }
  0x7d   :  { %833 = vmatprep.subr.bf16.mxu1 %v832_v37 }
  0xfe   :  { %v107_v4 = vpop.xlane.xlu0 %106 }
  0xff   :  { %v112_v5 = vmul.f32 0.03125, %v107_v4 }
 0x101   :  { %v114_v6 = vsub.f32 %v100_v0, %v112_v5 }
 0x102   :  { %v110_v7 = vpop.xlane.xlu0 %109 }
 0x103   :  { %v113_v8 = vmul.f32 0.03125, %v110_v7  ;;  %v116_v9 = vmul.f32 %v114_v6, %v114_v6 }
 0x105   :  { %v115_v10 = vsub.f32 %v101_v1, %v113_v8  ;;  %v118_v11 = vsel %vm104_vm0, %v116_v9, 0.0 }
 0x106   :  { %119 = vadd.xlane.f32.xlu1 %v118_v11 }
 0x107   :  { %v117_v12 = vmul.f32 %v115_v10, %v115_v10 }
 0x109   :  { %v121_v13 = vsel %vm104_vm0, %v117_v12, 0.0  ;;  %v721_v12 = vld [vmem:[#allocation11] ss:$0 sm:$0xff] }
 0x10a   :  { %122 = vadd.xlane.f32.xlu1 %v121_v13 }
 0x193   :  { %v120_v46 = vpop.xlane.xlu1 %119 }
 0x194   :  { %v124_v47 = vmul.f32 0.03125, %v120_v46 }
 0x196   :  { %v126_v48 = vadd.f32 1e-05, %v124_v47 }
 0x197   :  { %v123_v49 = vpop.xlane.xlu1 %122 }
 0x198   :  { %893 = vrsqrt.f32 %v126_v48  ;;  %v125_v50 = vmul.f32 0.03125, %v123_v49 }
 0x19a   :  { %v127_v51 = vadd.f32 1e-05, %v125_v50 }
 0x19c   :  { %895 = vrsqrt.f32 %v127_v51 }
 0x1a2   :  { %v894_v52 = vpop.eup %893 }
 0x1a3   :  { %v130_v54 = vmul.f32 %v894_v52, %v114_v6 }
 0x1a5   :  { %v138_v56 = vmul.f32 %v719_v53, %v130_v54 }
 0x1a6   :  { %v896_v57 = vpop.eup %895 }
 0x1a7   :  { %v131_v58 = vmul.f32 %v896_v57, %v115_v10  ;;  %v146_v59 = vadd.f32 %v720_v55, %v138_v56 }
 0x1a9   :  { %v139_v60 = vmul.f32 %v719_v53, %v131_v58  ;;  %v160_v61 = vsel %vm104_vm0, %v146_v59, 0 }
 0x1aa   :  { %v234_v62 = vand.u32 4294901760, %v160_v61 }
 0x1ab   :  { %v147_v63 = vadd.f32 %v720_v55, %v139_v60 }
 0x1ac   :  { %v235_v0 = vsub.f32 %v160_v61, %v234_v62 }
 0x1ad   :  { %v163_v1 = vsel %vm104_vm0, %v147_v63, 0 }
 0x1ae   :  { %v236_v2 = vand.u32 4294901760, %v235_v0  ;;  %v244_v3 = vand.u32 4294901760, %v163_v1 }
 0x1b0   :  { %799 = vmatprep.mubr.f32.mxu0 %v236_v2  ;;  %v237_v4 = vsub.f32 %v235_v0, %v236_v2  ;;  %v245_v5 = vsub.f32 %v163_v1, %v244_v3 }
 0x1b2   :  { %v238_v7 = vand.u32 4294901760, %v237_v4  ;;  %v246_v6 = vand.u32 4294901760, %v245_v5 }
 0x1b4   :  { %766 = vmatprep.mubr.f32.mxu1 %v238_v7  ;;  %800 = vmatmul.mubr.f32.vlgmr.msra.gmra.mrb[0].mxu0 %v246_v6  ;;  %v247_v8 = vsub.f32 %v245_v5, %v246_v6 }
 0x1b5   :  { %859 = vmatpush3.bf16.msra.mxu0 %v856_v28  ;;  %810 = vmatprep.mubr.f32.mxu0 %v234_v62 }
 0x1b6   :  { %v248_v9 = vand.u32 4294901760, %v247_v8  ;;  %861 = vmatprep.subr.bf16.mxu0 %v860_v38 }
 0x1b8   :  { %767 = vmatmul.mubr.f32.vlgmr.msra.gmra.mrb[0].mxu1 %v248_v9 }
 0x1b9   :  { %835 = vmatpush3.bf16.msra.mxu1 %v832_v37  ;;  %777 = vmatprep.mubr.f32.mxu1 %v234_v62 }
 0x1ba   :  { %863 = vmatpush3.bf16.msra.mxu0 %v860_v38  ;;  %837 = vmatprep.subr.bf16.mxu1 %v836_v43 }
 0x1bb   :  { %865 = vmatprep.subr.bf16.mxu0 %v1198_v22 }
 0x1bd   :  { %839 = vmatpush3.bf16.msra.mxu1 %v836_v43  ;;  %811 = vmatmul.mubr.f32.vlgmr.msra.gmra.mrb[0].mxu0 %v244_v3 }
 0x1be   :  { %867 = vmatpush3.bf16.msra.mxu0 %v1198_v22  ;;  %821 = vmatprep.mubr.f32.mxu0 %v234_v62 }
 0x1bf   :  { %841 = vmatprep.subr.bf16.mxu1 %v840_v44  ;;  %869 = vmatprep.subr.bf16.mxu0 %v1200_v23 }
 0x1c0   :  { %778 = vmatmul.mubr.f32.vlgmr.msra.gmra.mrb[0].mxu1 %v244_v3 }
 0x1c1   :  { %843 = vmatpush3.bf16.msra.mxu1 %v840_v44  ;;  %788 = vmatprep.mubr.f32.mxu1 %v235_v0 }
 0x1c2   :  { %871 = vmatpush3.bf16.msra.mxu0 %v1200_v23  ;;  %845 = vmatprep.subr.bf16.mxu1 %v844_v45 }
 0x1c5   :  { %847 = vmatpush3.bf16.msra.mxu1 %v844_v45  ;;  %822 = vmatmul.mubr.f32.vlgmr.msra.gmra.mrb[0].mxu0 %v244_v3 }
 0x1c8   :  { %789 = vmatmul.mubr.f32.vlgmr.msra.gmra.mrb[0].mxu1 %v245_v5 }
 0x298   :  { %v823_v10 = vpop.f32.mrb[0].mxu0 }
 0x299   :  { %v683_v11 = vpop.f32.mrb[1].mxu0 }
 0x29b   :  { %v790_v13 = vpop.f32.mrb[0].mxu1 }
 0x29c   :  { %v872_v14 = vadd.f32 %v790_v13, %v721_v12  ;;  %v427_v15 = vpop.f32.mrb[1].mxu1 }
 0x29d   :  { %v874_v17 = vadd.f32 %v721_v12, %v427_v15 }
 0x29e   :  { %v873_v18 = vadd.f32 %v872_v14, %v823_v10 }
 0x29f   :  { %v875_v20 = vadd.f32 %v874_v17, %v683_v11 }
 0x2a0   :  { %v696_v21 = vadd.f32 %v873_v18, %v694_v16 }
 0x2a1   :  { %v695_v22 = vadd.f32 %v875_v20, %v693_v19 }
 0x2a2   :  { %698 = vst.msk [vmem:[#allocation13 + $0x8] sm:$0xff] %vm104_vm0, %v696_v21 }
 0x2a3   :  { %697 = vst.msk [vmem:[#allocation13] sm:$0xff] %vm104_vm0, %v695_v22 }
 0x2a4   :  { %1040 = shalt.err (!%p1037_p10)
}
 0x2a5   :  { %s1041_s26 = scalar_lea.hbm %s1239_s6, 256 }
 0x2a6   :  { %p1042_p11 = scmp.ne.s32.totalorder %s1239_s6, %s1041_s26  ;;  %p1045_p12 = scmp.lt.u32.totalorder %s1041_s26, %s1239_s6 }
 0x2a8   :  { %p1047_p13 = pnand %p1045_p12, %p1042_p11 }
 0x2aa   :  { %1050 = shalt.err (!%p1047_p13)
}
 0x2ab   :  { %710 = dma.vmem_to_hbm [thread:$0]  %s705_s0, 256, %s1239_s6, [#allocation4], %s1063_s9, %s1063_s9, %s1064_s10  }
 0x2ac   :  { %1059 = dma.done.wait [#allocation4], 256  }
 0x2ad   :  { %1060 = vsyncadd [#allocation4], 4294967040 }
 0x2ae   :  { %714 = vsyncpa [#allocation3], 1 }
 0x2af   :  { %715 = vsyncpa [#allocation6], 1 }
 0x2b0   :  { %716 = vsyncpa [#allocation9], 1 }
 0x2b1   :  { %717 = vsyncpa [#allocation12], 1 }
 0x2b2   :  { %718 = vsyncpa [#allocation4], 1 }

// kernel: dilated_transformer_encoder_layer.7
= control target key start
LH: loop header
LB: loop body
LE: loop exit
PB: predicated region body
PF: predicated region fallthrough
CT: control target
= control target key end

     0   :  { %8 = vsyncpa [#allocation3], 0  ;;  %s4677_s0 = inlined_call_operand.hbm [shape: f32[4,4,8], index: 0, kind: input, shape index: {}]   ;;  %s4678_s1 = inlined_call_operand.hbm [shape: f32[4,4,8], index: 1, kind: input, shape index: {}]   ;;  %s4679_s2 = inlined_call_operand.hbm [shape: f32[4,4,8], index: 2, kind: input, shape index: {}]   ;;  %s4680_s3 = inlined_call_operand.hbm [shape: f32[4,4,8], index: 3, kind: output, shape index: {}]  }
   0x1   :  { %9 = vsyncpa [#allocation6], 0 }
   0x2   :  { %10 = vsyncpa [#allocation4], 0  ;;  %s4297_s12 = smov [#allocation5]   ;;  %s4298_s14 = smov [#allocation2]  }
   0x3   :  { %s28_s13 = sshll.u32 %s4297_s12, 4  ;;  %s16_s15 = sshll.u32 %s4298_s14, 4  ;;  %s29_s13 = int_to_ptr.vmem [resolvable:$true] %s28_s13  ;;  %s4325_s15 = int_to_ptr.vmem [resolvable:$true] %s16_s15 }
   0x4   :  { %s4203_s18 = scalar_lea.hbm %s4678_s1, 256 }
   0x5   :  { %p4204_p0 = scmp.ne.s32.totalorder %s4678_s1, %s4203_s18  ;;  %p4207_p1 = scmp.lt.u32.totalorder %s4203_s18, %s4678_s1 }
   0x7   :  { %p4209_p2 = pnand %p4207_p1, %p4204_p0 }
   0x9   :  { %4212 = shalt.err (!%p4209_p2)
}
   0xa   :  { %s4213_s23 = scalar_lea.vmem %s29_s13, 256  ;;  %p4218_p4 = scmp.lt.s32.totalorder %s29_s13, %s29_s13 }
   0xb   :  { %p4214_p3 = scmp.ne.s32.totalorder %s29_s13, %s4213_s23  ;;  %p4219_p5 = scmp.lt.s32.totalorder %s4213_s23, %s4213_s23 }
   0xd   :  { %p4220_p6 = por %p4219_p5, %p4218_p4 }
   0xf   :  { %p4221_p7 = pnand %p4220_p6, %p4214_p3 }
  0x11   :  { %4224 = shalt.err (!%p4221_p7)
}
  0x12   :  { %s4299_s24 = smov 64   ;;  %s4300_s25 = smov 4  }
  0x13   :  { %34 = dma.hbm_to_vmem [thread:$0]  %s4678_s1, 256, %s29_s13, [#allocation6], %s4299_s24, %s4299_s24, %s4300_s25  }
  0x14   :  { %s4225_s30 = scalar_lea.hbm %s4677_s0, 256 }
  0x15   :  { %p4226_p8 = scmp.ne.s32.totalorder %s4677_s0, %s4225_s30  ;;  %p4229_p9 = scmp.lt.u32.totalorder %s4225_s30, %s4677_s0 }
  0x17   :  { %p4231_p10 = pnand %p4229_p9, %p4226_p8 }
  0x19   :  { %4234 = shalt.err (!%p4231_p10)
}
  0x1a   :  { %s4235_s8 = scalar_lea.vmem %s4325_s15, 256  ;;  %p4240_p12 = scmp.lt.s32.totalorder %s4325_s15, %s4325_s15 }
  0x1b   :  { %p4236_p11 = scmp.ne.s32.totalorder %s4325_s15, %s4235_s8  ;;  %p4241_p13 = scmp.lt.s32.totalorder %s4235_s8, %s4235_s8 }
  0x1d   :  { %p4242_p0 = por %p4241_p13, %p4240_p12 }
  0x1f   :  { %p4243_p1 = pnand %p4242_p0, %p4236_p11 }
  0x21   :  { %4246 = shalt.err (!%p4243_p1)
}
  0x22   :  { %22 = dma.hbm_to_vmem [thread:$0]  %s4677_s0, 256, %s4325_s15, [#allocation3], %s4299_s24, %s4299_s24, %s4300_s25  }
  0x23   :  { %s4301_s10 = smov [#allocation7]   ;;  %s4247_s14 = scalar_lea.hbm %s4679_s2, 256 }
  0x24   :  { %s40_s11 = sshll.u32 %s4301_s10, 4  ;;  %p4248_p2 = scmp.ne.s32.totalorder %s4679_s2, %s4247_s14  ;;  %s41_s11 = int_to_ptr.vmem [resolvable:$true] %s40_s11 }
  0x25   :  { %p4251_p3 = scmp.lt.u32.totalorder %s4247_s14, %s4679_s2 }
  0x27   :  { %p4253_p4 = pnand %p4251_p3, %p4248_p2 }
  0x29   :  { %4256 = shalt.err (!%p4253_p4)
}
  0x2a   :  { %s4257_s20 = scalar_lea.vmem %s41_s11, 256  ;;  %p4262_p6 = scmp.lt.s32.totalorder %s41_s11, %s41_s11 }
  0x2b   :  { %p4258_p5 = scmp.ne.s32.totalorder %s41_s11, %s4257_s20  ;;  %p4263_p7 = scmp.lt.s32.totalorder %s4257_s20, %s4257_s20 }
  0x2d   :  { %p4264_p8 = por %p4263_p7, %p4262_p6 }
  0x2f   :  { %p4265_p9 = pnand %p4264_p8, %p4258_p5 }
  0x31   :  { %4268 = shalt.err (!%p4265_p9)
}
  0x32   :  { %46 = dma.hbm_to_vmem [thread:$0]  %s4679_s2, 256, %s41_s11, [#allocation6], %s4299_s24, %s4299_s24, %s4300_s25  }
  0x33   :  { %4291 = dma.done.wait [#allocation3], 256  }
  0x34   :  { %4292 = vsyncadd [#allocation3], 4294967040 }
  0x35   :  { %4293 = dma.done.wait [#allocation6], 512  }
  0x36   :  { %4294 = vsyncadd [#allocation6], 4294966784  ;;  %v4302_v0 = vmov 0.0   ;;  %vm4303_vm0 = vmmov 0   ;;  %vm68_vm1 = vcmask 64512   ;;  %vm1881_vm2 = vcmask 27648  }
  0x37   :  { %3859 = vmatprep.subr.mxu0 %v4302_v0  ;;  %3889 = vmatprep.subr.mxu1 %v4302_v0  ;;  %v60_v1 = vld [vmem:[#allocation5] sm:$0xf]  ;;  %v61_v2 = vld [vmem:[#allocation5 + $0x4] sm:$0xf]  ;;  %v56_v3 = vld [vmem:[#allocation2] sm:$0xf] }
  0x38   :  { %3861 = vmatprep.mubr.msk.f32.mxu0 %vm4303_vm0, %v4302_v0  ;;  %3891 = vmatprep.mubr.msk.f32.mxu1 %vm4303_vm0, %v4302_v0  ;;  %v73_v4 = vsel %vm68_vm1, %v60_v1, 0  ;;  %v525_v5 = vsel %vm68_vm1, %v61_v2, 0  ;;  %v70_v6 = vsel %vm68_vm1, %v56_v3, 0  ;;  %v57_v7 = vld [vmem:[#allocation2 + $0x4] sm:$0xf]  ;;  %vm1922_vm3 = vcmask 1043456  }
  0x39   :  { %v4386_v8 = vand.u32 4294901760, %v73_v4  ;;  %v4388_v9 = vand.u32 4294901760, %v525_v5  ;;  %v4390_v10 = vand.u32 4294901760, %v70_v6  ;;  %v522_v11 = vsel %vm68_vm1, %v57_v7, 0  ;;  %v58_v29 = vld [vmem:[#allocation2 + $0x8] sm:$0xf] }
  0x3a   :  { %v4393_v12 = vand.u32 4294901760, %v522_v11  ;;  %v62_v30 = vld [vmem:[#allocation5 + $0x8] sm:$0xf]  ;;  %v59_v31 = vld [vmem:[#allocation2 + $0xc] sm:$0xf]  ;;  %v974_v33 = vsel %vm68_vm1, %v58_v29, 0 }
  0x3b   :  { %3860 = vmatpush3.xpose.msra.mxu0 %v4386_v8  ;;  %v153_v13 = vsub.f32 %v73_v4, %v4386_v8  ;;  %3890 = vmatpush3.xpose.msra.mxu1 %v4388_v9  ;;  %v605_v14 = vsub.f32 %v525_v5, %v4388_v9  ;;  %v142_v15 = vsub.f32 %v70_v6, %v4390_v10  ;;  %v63_v32 = vld [vmem:[#allocation5 + $0xc] sm:$0xf]  ;;  %v977_v34 = vsel %vm68_vm1, %v62_v30, 0  ;;  %v64_v2 = vld [vmem:[#allocation7] sm:$0xf]  ;;  %s4304_s2 = smov [#allocation8]  }
  0x3c   :  { %3864 = vmatprep.subr.mxu0 %v4302_v0  ;;  %v594_v16 = vsub.f32 %v522_v11, %v4393_v12  ;;  %3894 = vmatprep.subr.mxu1 %v4302_v0  ;;  %v1426_v35 = vsel %vm68_vm1, %v59_v31, 0  ;;  %v1429_v36 = vsel %vm68_vm1, %v63_v32, 0  ;;  %v4429_v37 = vand.u32 4294901760, %v974_v33  ;;  %v65_v6 = vld [vmem:[#allocation7 + $0x4] sm:$0xf]  ;;  %s3750_s21 = sshll.u32 %s4304_s2, 4  ;;  %s3751_s21 = int_to_ptr.vmem [resolvable:$true] %s3750_s21 }
  0x3d   :  { %v143_v17 = vand.u32 4294901760, %v142_v15  ;;  %v154_v18 = vand.u32 4294901760, %v153_v13  ;;  %v606_v19 = vand.u32 4294901760, %v605_v14  ;;  %v4431_v38 = vand.u32 4294901760, %v977_v34  ;;  %s4269_s22 = scalar_lea.vmem %s3751_s21, 256  ;;  %p4274_p11 = scmp.lt.s32.totalorder %s3751_s21, %s3751_s21 }
  0x3e   :  { %v595_v20 = vand.u32 4294901760, %v594_v16  ;;  %v4433_v39 = vand.u32 4294901760, %v1426_v35  ;;  %v4437_v40 = vand.u32 4294901760, %v1429_v36  ;;  %v1046_v41 = vsub.f32 %v974_v33, %v4429_v37  ;;  %p4270_p10 = scmp.ne.s32.totalorder %s3751_s21, %s4269_s22  ;;  %p4275_p12 = scmp.lt.s32.totalorder %s4269_s22, %s4269_s22 }
  0x3f   :  { %v144_v21 = vsub.f32 %v142_v15, %v143_v17  ;;  %v155_v22 = vsub.f32 %v153_v13, %v154_v18  ;;  %v607_v23 = vsub.f32 %v605_v14, %v606_v19  ;;  %v1057_v42 = vsub.f32 %v977_v34, %v4431_v38 }
  0x40   :  { %v596_v24 = vsub.f32 %v594_v16, %v595_v20  ;;  %v1498_v43 = vsub.f32 %v1426_v35, %v4433_v39  ;;  %v1509_v44 = vsub.f32 %v1429_v36, %v4437_v40  ;;  %v1047_v45 = vand.u32 4294901760, %v1046_v41  ;;  %p4276_p13 = por %p4275_p12, %p4274_p11 }
  0x41   :  { %v145_v25 = vand.u32 4294901760, %v144_v21  ;;  %v156_v26 = vand.u32 4294901760, %v155_v22  ;;  %v608_v27 = vand.u32 4294901760, %v607_v23  ;;  %v1058_v46 = vand.u32 4294901760, %v1057_v42 }
  0x42   :  { %v597_v28 = vand.u32 4294901760, %v596_v24  ;;  %v1499_v47 = vand.u32 4294901760, %v1498_v43  ;;  %v1510_v48 = vand.u32 4294901760, %v1509_v44  ;;  %v1048_v49 = vsub.f32 %v1046_v41, %v1047_v45  ;;  %p4277_p0 = pnand %p4276_p13, %p4270_p10 }
  0x43   :  { %3862 = vmatmul.mubr.f32.vlgmr.msra.gmra.mrb[0].mxu0 %v145_v25  ;;  %v1059_v50 = vsub.f32 %v1057_v42, %v1058_v46  ;;  %v1924_v3 = vsel %vm1922_vm3, %v64_v2, 0  ;;  %vm1918_vm4 = vcmask 31744   ;;  %vm3740_vm5 = vcmask 60416  }
  0x44   :  { %3865 = vmatpush3.xpose.msra.mxu0 %v156_v26  ;;  %3892 = vmatmul.mubr.f32.vlgmr.msra.gmra.mrb[0].mxu1 %v597_v28  ;;  %v1500_v51 = vsub.f32 %v1498_v43, %v1499_v47  ;;  %v1511_v52 = vsub.f32 %v1509_v44, %v1510_v48  ;;  %v1049_v53 = vand.u32 4294901760, %v1048_v49  ;;  %v4514_v4 = vand.u32 4294901760, %v1924_v3  ;;  %v66_v49 = vld [vmem:[#allocation7 + $0x8] sm:$0xf] }
  0x45   :  { %3895 = vmatpush3.xpose.msra.mxu1 %v608_v27  ;;  %3866 = vmatprep.mubr.msk.f32.mxu0 %vm4303_vm0, %v4302_v0  ;;  %v1060_v54 = vand.u32 4294901760, %v1059_v50 }
  0x46   :  { %3869 = vmatprep.subr.mxu0 %v4302_v0  ;;  %3896 = vmatprep.mubr.msk.f32.mxu1 %vm4303_vm0, %v4302_v0  ;;  %v1501_v55 = vand.u32 4294901760, %v1500_v51  ;;  %v1512_v56 = vand.u32 4294901760, %v1511_v52  ;;  %v2004_v22 = vsub.f32 %v1924_v3, %v4514_v4  ;;  %v2828_v52 = vsel %vm1922_vm3, %v66_v49, 0 }
  0x47   :  { %3899 = vmatprep.subr.mxu1 %v4302_v0 }
  0x48   :  { %v2005_v27 = vand.u32 4294901760, %v2004_v22 }
  0x4a   :  { %v2006_v33 = vsub.f32 %v2004_v22, %v2005_v27 }
  0x4b   :  { %3867 = vmatmul.mubr.f32.vlgmr.msra.gmra.mrb[0].mxu0 %v4390_v10 }
  0x4c   :  { %3870 = vmatpush3.xpose.msra.mxu0 %v153_v13  ;;  %3897 = vmatmul.mubr.f32.vlgmr.msra.gmra.mrb[0].mxu1 %v4393_v12 }
  0x4d   :  { %3900 = vmatpush3.xpose.msra.mxu1 %v605_v14  ;;  %3871 = vmatprep.mubr.msk.f32.mxu0 %vm4303_vm0, %v4302_v0 }
  0x4e   :  { %3874 = vmatprep.subr.mxu0 %v4302_v0  ;;  %3901 = vmatprep.mubr.msk.f32.mxu1 %vm4303_vm0, %v4302_v0 }
  0x4f   :  { %3904 = vmatprep.subr.mxu1 %v4302_v0 }
  0x53   :  { %3872 = vmatmul.mubr.f32.vlgmr.msra.gmra.mrb[0].mxu0 %v142_v15 }
  0x54   :  { %3875 = vmatpush3.xpose.msra.mxu0 %v4386_v8  ;;  %3902 = vmatmul.mubr.f32.vlgmr.msra.gmra.mrb[0].mxu1 %v594_v16 }
  0x55   :  { %3905 = vmatpush3.xpose.msra.mxu1 %v4388_v9  ;;  %3876 = vmatprep.mubr.msk.f32.mxu0 %vm4303_vm0, %v4302_v0 }
  0x56   :  { %3879 = vmatprep.subr.mxu0 %v4302_v0  ;;  %3906 = vmatprep.mubr.msk.f32.mxu1 %vm4303_vm0, %v4302_v0 }
  0x57   :  { %3909 = vmatprep.subr.mxu1 %v4302_v0 }
  0x5b   :  { %3877 = vmatmul.mubr.f32.vlgmr.msra.gmra.mrb[0].mxu0 %v143_v17 }
  0x5c   :  { %3880 = vmatpush3.xpose.msra.mxu0 %v154_v18  ;;  %3907 = vmatmul.mubr.f32.vlgmr.msra.gmra.mrb[0].mxu1 %v595_v20 }
  0x5d   :  { %3910 = vmatpush3.xpose.msra.mxu1 %v606_v19  ;;  %3881 = vmatprep.mubr.msk.f32.mxu0 %vm4303_vm0, %v4302_v0 }
  0x5e   :  { %3884 = vmatprep.subr.mxu0 %v4302_v0  ;;  %3911 = vmatprep.mubr.msk.f32.mxu1 %vm4303_vm0, %v4302_v0 }
  0x5f   :  { %3914 = vmatprep.subr.mxu1 %v4302_v0 }
  0x63   :  { %3882 = vmatmul.mubr.f32.vlgmr.msra.gmra.mrb[0].mxu0 %v4390_v10 }
  0x64   :  { %3885 = vmatpush3.xpose.msra.mxu0 %v4386_v8  ;;  %3912 = vmatmul.mubr.f32.vlgmr.msra.gmra.mrb[0].mxu1 %v4393_v12 }
  0x65   :  { %3915 = vmatpush3.xpose.msra.mxu1 %v4388_v9  ;;  %3886 = vmatprep.mubr.msk.f32.mxu0 %vm4303_vm0, %v4302_v0 }
  0x66   :  { %3916 = vmatprep.mubr.msk.f32.mxu1 %vm4303_vm0, %v4302_v0  ;;  %3919 = vmatprep.subr.mxu0 %v4302_v0 }
  0x67   :  { %3949 = vmatprep.subr.mxu1 %v4302_v0 }
  0x6b   :  { %3887 = vmatmul.mubr.f32.vlgmr.msra.gmra.mrb[0].mxu0 %v4390_v10  ;;  %v2376_v10 = vsel %vm1922_vm3, %v65_v6, 0 }
  0x6c   :  { %3917 = vmatmul.mubr.f32.vlgmr.msra.gmra.mrb[0].mxu1 %v4393_v12  ;;  %3920 = vmatpush3.xpose.msra.mxu0 %v4431_v38  ;;  %v4521_v12 = vand.u32 4294901760, %v2376_v10 }
  0x6d   :  { %3950 = vmatpush3.xpose.msra.mxu1 %v4437_v40  ;;  %3921 = vmatprep.mubr.msk.f32.mxu0 %vm4303_vm0, %v4302_v0 }
  0x6e   :  { %3924 = vmatprep.subr.mxu0 %v4302_v0  ;;  %3951 = vmatprep.mubr.msk.f32.mxu1 %vm4303_vm0, %v4302_v0  ;;  %v4535_v26 = vsub.f32 %v2376_v10, %v4521_v12 }
  0x6f   :  { %3922 = vmatmul.mubr.f32.vlgmr.msra.gmra.mrb[2].mxu0 %v1049_v53  ;;  %3954 = vmatprep.subr.mxu1 %v4302_v0  ;;  %v67_v53 = vld [vmem:[#allocation7 + $0xc] sm:$0xf] }
  0x70   :  { %3925 = vmatpush3.xpose.msra.mxu0 %v1060_v54  ;;  %3952 = vmatmul.mubr.f32.vlgmr.msra.gmra.mrb[2].mxu1 %v1501_v55  ;;  %v2457_v34 = vand.u32 4294901760, %v4535_v26  ;;  %v4576_v55 = vand.u32 4294901760, %v2828_v52 }
  0x71   :  { %3955 = vmatpush3.xpose.msra.mxu1 %v1512_v56  ;;  %3926 = vmatprep.mubr.msk.f32.mxu0 %vm4303_vm0, %v4302_v0  ;;  %v3280_v56 = vsel %vm1922_vm3, %v67_v53, 0 }
  0x72   :  { %3929 = vmatprep.subr.mxu0 %v4302_v0  ;;  %3956 = vmatprep.mubr.msk.f32.mxu1 %vm4303_vm0, %v4302_v0 }
  0x73   :  { %3959 = vmatprep.subr.mxu1 %v4302_v0 }
  0x77   :  { %3927 = vmatmul.mubr.f32.vlgmr.msra.gmra.mrb[2].mxu0 %v4429_v37 }
  0x78   :  { %3930 = vmatpush3.xpose.msra.mxu0 %v1057_v42  ;;  %3957 = vmatmul.mubr.f32.vlgmr.msra.gmra.mrb[2].mxu1 %v4433_v39 }
  0x79   :  { %3960 = vmatpush3.xpose.msra.mxu1 %v1509_v44  ;;  %3931 = vmatprep.mubr.msk.f32.mxu0 %vm4303_vm0, %v4302_v0 }
  0x7a   :  { %3934 = vmatprep.subr.mxu0 %v4302_v0  ;;  %3961 = vmatprep.mubr.msk.f32.mxu1 %vm4303_vm0, %v4302_v0 }
  0x7b   :  { %3964 = vmatprep.subr.mxu1 %v4302_v0 }
  0x7f   :  { %3932 = vmatmul.mubr.f32.vlgmr.msra.gmra.mrb[2].mxu0 %v1046_v41 }
  0x80   :  { %3935 = vmatpush3.xpose.msra.mxu0 %v4431_v38  ;;  %3962 = vmatmul.mubr.f32.vlgmr.msra.gmra.mrb[2].mxu1 %v1498_v43 }
  0x81   :  { %3965 = vmatpush3.xpose.msra.mxu1 %v4437_v40  ;;  %3936 = vmatprep.mubr.msk.f32.mxu0 %vm4303_vm0, %v4302_v0 }
  0x82   :  { %3939 = vmatprep.subr.mxu0 %v4302_v0  ;;  %3966 = vmatprep.mubr.msk.f32.mxu1 %vm4303_vm0, %v4302_v0 }
  0x83   :  { %3969 = vmatprep.subr.mxu1 %v4302_v0 }
  0x87   :  { %3937 = vmatmul.mubr.f32.vlgmr.msra.gmra.mrb[2].mxu0 %v1047_v45 }
  0x88   :  { %3940 = vmatpush3.xpose.msra.mxu0 %v1058_v46  ;;  %3967 = vmatmul.mubr.f32.vlgmr.msra.gmra.mrb[2].mxu1 %v1499_v47 }
  0x89   :  { %3970 = vmatpush3.xpose.msra.mxu1 %v1510_v48  ;;  %3941 = vmatprep.mubr.msk.f32.mxu0 %vm4303_vm0, %v4302_v0 }
  0x8a   :  { %3944 = vmatprep.subr.mxu0 %v4302_v0  ;;  %3971 = vmatprep.mubr.msk.f32.mxu1 %vm4303_vm0, %v4302_v0 }
  0x8b   :  { %3974 = vmatprep.subr.mxu1 %v4302_v0 }
  0x8f   :  { %3942 = vmatmul.mubr.f32.vlgmr.msra.gmra.mrb[2].mxu0 %v4429_v37 }
  0x90   :  { %3945 = vmatpush3.xpose.msra.mxu0 %v4431_v38  ;;  %3972 = vmatmul.mubr.f32.vlgmr.msra.gmra.mrb[2].mxu1 %v4433_v39 }
  0x91   :  { %3975 = vmatpush3.xpose.msra.mxu1 %v4437_v40  ;;  %3946 = vmatprep.mubr.msk.f32.mxu0 %vm4303_vm0, %v4302_v0  ;;  %v2458_v40 = vsub.f32 %v4535_v26, %v2457_v34 }
  0x92   :  { %3976 = vmatprep.mubr.msk.f32.mxu1 %vm4303_vm0, %v4302_v0  ;;  %3979 = vmatprep.subr.mxu0 %v4302_v0 }
  0x93   :  { %4009 = vmatprep.subr.mxu1 %v4302_v0  ;;  %v2459_v44 = vand.u32 4294901760, %v2458_v40 }
  0x97   :  { %3947 = vmatmul.mubr.f32.vlgmr.msra.gmra.mrb[2].mxu0 %v4429_v37 }
  0x98   :  { %3977 = vmatmul.mubr.f32.vlgmr.msra.gmra.mrb[2].mxu1 %v4433_v39  ;;  %3981 = vmatprep.mubr.msk.f32.mxu0 %vm4303_vm0, %v4302_v0  ;;  %v2007_v39 = vand.u32 4294901760, %v2006_v33 }
  0x99   :  { %4011 = vmatprep.mubr.msk.f32.mxu1 %vm4303_vm0, %v4302_v0  ;;  %3980 = vmatpush3.msra.mxu0 %v4514_v4 }
  0x9a   :  { %3984 = vmatprep.subr.mxu0 %v4302_v0  ;;  %4010 = vmatpush3.msra.mxu1 %v4521_v12 }
  0x9b   :  { %4014 = vmatprep.subr.mxu1 %v4302_v0 }
 0x13e   :  { %v517_v57 = vpop.f32.mrb[0].mxu0 }
 0x13f   :  { %v1877_v58 = vmul.f32 0.35355338, %v517_v57  ;;  %v969_v59 = vpop.f32.mrb[0].mxu1  ;;  %v3888_v60 = vpop.f32.mrb[1].mxu0  ;;  %v4581_v57 = vand.u32 4294901760, %v3280_v56 }
 0x140   :  { %v3918_v61 = vpop.f32.mrb[1].mxu1  ;;  %v1878_v62 = vmul.f32 0.35355338, %v969_v59 }
 0x141   :  { %v1882_v63 = vsel %vm1881_vm2, %v1877_v58, -inf }
 0x142   :  { %1883 = vmax.xlane.f32.xlu0 %v1882_v63  ;;  %v1885_v1 = vsel %vm1881_vm2, %v1878_v62, -inf }
 0x146   :  { %1886 = vmax.xlane.f32.xlu0 %v1885_v1 }
 0x16a   :  { %v1421_v5 = vpop.f32.mrb[2].mxu0 }
 0x16b   :  { %v4518_v7 = vmul.f32 0.35355338, %v1421_v5  ;;  %v1873_v8 = vpop.f32.mrb[2].mxu1  ;;  %v3948_v9 = vpop.f32.mrb[3].mxu0 }
 0x16c   :  { %v3978_v11 = vpop.f32.mrb[3].mxu1  ;;  %v4523_v13 = vmul.f32 0.35355338, %v1873_v8 }
 0x16d   :  { %v1888_v14 = vsel %vm1881_vm2, %v4518_v7, -inf }
 0x16e   :  { %1889 = vmax.xlane.f32.xlu1 %v1888_v14  ;;  %v1891_v15 = vsel %vm1881_vm2, %v4523_v13, -inf }
 0x172   :  { %1892 = vmax.xlane.f32.xlu1 %v1891_v15 }
 0x1cf   :  { %v1884_v16 = vpop.xlane.xlu0 %1883 }
 0x1d0   :  { %v1894_v17 = vsub.f32 %v1877_v58, %v1884_v16  ;;  %v4585_v58 = vsub.f32 %v2828_v52, %v4576_v55 }
 0x1d2   :  { %v1898_v18 = vmul.f32 1.442695, %v1894_v17  ;;  %v2909_v1 = vand.u32 4294901760, %v4585_v58 }
 0x1d3   :  { %v1887_v19 = vpop.xlane.xlu0 %1886 }
 0x1d4   :  { %4187 = vpow2.f32 %v1898_v18  ;;  %v1895_v20 = vsub.f32 %v1878_v62, %v1887_v19  ;;  %v4594_v62 = vsub.f32 %v3280_v56, %v4581_v57  ;;  %v2910_v9 = vsub.f32 %v4585_v58, %v2909_v1 }
 0x1d6   :  { %v1900_v21 = vmul.f32 1.442695, %v1895_v20  ;;  %v3361_v6 = vand.u32 4294901760, %v4594_v62  ;;  %v2911_v14 = vand.u32 4294901760, %v2910_v9 }
 0x1d8   :  { %4189 = vpow2.f32 %v1900_v21 }
 0x1de   :  { %v4188_v23 = vpop.eup %4187 }
 0x1df   :  { %v1920_v24 = vsel %vm1918_vm4, %v4188_v23, 0  ;;  %v1906_v25 = vsel %vm1881_vm2, %v4188_v23, 0.0 }
 0x1e0   :  { %v4537_v28 = vand.u32 4294901760, %v1920_v24  ;;  %1907 = vadd.xlane.f32.xlu0 %v1906_v25 }
 0x1e2   :  { %v4190_v29 = vpop.eup %4189  ;;  %v1993_v30 = vsub.f32 %v1920_v24, %v4537_v28 }
 0x1e3   :  { %v2373_v31 = vsel %vm1918_vm4, %v4190_v29, 0  ;;  %v1909_v32 = vsel %vm1881_vm2, %v4190_v29, 0.0 }
 0x1e4   :  { %v4543_v35 = vand.u32 4294901760, %v2373_v31  ;;  %1910 = vadd.xlane.f32.xlu1 %v1909_v32  ;;  %v1994_v36 = vand.u32 4294901760, %v1993_v30 }
 0x1e6   :  { %v1995_v37 = vsub.f32 %v1993_v30, %v1994_v36  ;;  %v2445_v38 = vsub.f32 %v2373_v31, %v4543_v35 }
 0x1e8   :  { %v1996_v41 = vand.u32 4294901760, %v1995_v37  ;;  %v2446_v42 = vand.u32 4294901760, %v2445_v38 }
 0x1ea   :  { %3982 = vmatmul.mubr.f32.vlgmr.msra.gmra.mrb[4].mxu0 %v1996_v41  ;;  %v2447_v43 = vsub.f32 %v2445_v38, %v2446_v42 }
 0x1eb   :  { %3985 = vmatpush3.msra.mxu0 %v2007_v39  ;;  %3986 = vmatprep.mubr.msk.f32.mxu0 %vm4303_vm0, %v4302_v0 }
 0x1ec   :  { %v2448_v45 = vand.u32 4294901760, %v2447_v43  ;;  %3989 = vmatprep.subr.mxu0 %v4302_v0 }
 0x1ee   :  { %4012 = vmatmul.mubr.f32.vlgmr.msra.gmra.mrb[4].mxu1 %v2448_v45 }
 0x1ef   :  { %4015 = vmatpush3.msra.mxu1 %v2459_v44  ;;  %4016 = vmatprep.mubr.msk.f32.mxu1 %vm4303_vm0, %v4302_v0 }
 0x1f0   :  { %4019 = vmatprep.subr.mxu1 %v4302_v0 }
 0x1f2   :  { %3987 = vmatmul.mubr.f32.vlgmr.msra.gmra.mrb[4].mxu0 %v4537_v28 }
 0x1f3   :  { %3990 = vmatpush3.msra.mxu0 %v2004_v22  ;;  %3991 = vmatprep.mubr.msk.f32.mxu0 %vm4303_vm0, %v4302_v0 }
 0x1f4   :  { %3994 = vmatprep.subr.mxu0 %v4302_v0 }
 0x1f6   :  { %4017 = vmatmul.mubr.f32.vlgmr.msra.gmra.mrb[4].mxu1 %v4543_v35 }
 0x1f7   :  { %4020 = vmatpush3.msra.mxu1 %v4535_v26  ;;  %4021 = vmatprep.mubr.msk.f32.mxu1 %vm4303_vm0, %v4302_v0 }
 0x1f8   :  { %4024 = vmatprep.subr.mxu1 %v4302_v0 }
 0x1fa   :  { %3992 = vmatmul.mubr.f32.vlgmr.msra.gmra.mrb[4].mxu0 %v1993_v30 }
 0x1fb   :  { %v1890_v46 = vpop.xlane.xlu1 %1889  ;;  %3995 = vmatpush3.msra.mxu0 %v4514_v4  ;;  %3996 = vmatprep.mubr.msk.f32.mxu0 %vm4303_vm0, %v4302_v0 }
 0x1fc   :  { %v1896_v47 = vsub.f32 %v4518_v7, %v1890_v46  ;;  %3999 = vmatprep.subr.mxu0 %v4302_v0 }
 0x1fe   :  { %v1902_v48 = vmul.f32 1.442695, %v1896_v47  ;;  %4022 = vmatmul.mubr.f32.vlgmr.msra.gmra.mrb[4].mxu1 %v2445_v38 }
 0x1ff   :  { %4025 = vmatpush3.msra.mxu1 %v4521_v12  ;;  %v1893_v50 = vpop.xlane.xlu1 %1892  ;;  %4026 = vmatprep.mubr.msk.f32.mxu1 %vm4303_vm0, %v4302_v0 }
 0x200   :  { %4191 = vpow2.f32 %v1902_v48  ;;  %v1897_v51 = vsub.f32 %v4523_v13, %v1893_v50  ;;  %4029 = vmatprep.subr.mxu1 %v4302_v0 }
 0x202   :  { %v1904_v54 = vmul.f32 1.442695, %v1897_v51  ;;  %3997 = vmatmul.mubr.f32.vlgmr.msra.gmra.mrb[4].mxu0 %v1994_v36 }
 0x203   :  { %4000 = vmatpush3.msra.mxu0 %v2005_v27  ;;  %4001 = vmatprep.mubr.msk.f32.mxu0 %vm4303_vm0, %v4302_v0 }
 0x204   :  { %4193 = vpow2.f32 %v1904_v54  ;;  %4004 = vmatprep.subr.mxu0 %v4302_v0 }
 0x206   :  { %4027 = vmatmul.mubr.f32.vlgmr.msra.gmra.mrb[4].mxu1 %v2446_v42 }
 0x207   :  { %4030 = vmatpush3.msra.mxu1 %v2457_v34  ;;  %4031 = vmatprep.mubr.msk.f32.mxu1 %vm4303_vm0, %v4302_v0 }
 0x208   :  { %4034 = vmatprep.subr.mxu1 %v4302_v0 }
 0x20a   :  { %v4192_v59 = vpop.eup %4191  ;;  %4002 = vmatmul.mubr.f32.vlgmr.msra.gmra.mrb[4].mxu0 %v4537_v28 }
 0x20b   :  { %v2825_v60 = vsel %vm1918_vm4, %v4192_v59, 0  ;;  %v1912_v61 = vsel %vm1881_vm2, %v4192_v59, 0.0  ;;  %4005 = vmatpush3.msra.mxu0 %v4514_v4  ;;  %4006 = vmatprep.mubr.msk.f32.mxu0 %vm4303_vm0, %v4302_v0 }
 0x20c   :  { %v4596_v63 = vand.u32 4294901760, %v2825_v60  ;;  %1913 = vadd.xlane.f32.xlu0 %v1912_v61  ;;  %4039 = vmatprep.subr.mxu0 %v4302_v0 }
 0x20e   :  { %v4194_v2 = vpop.eup %4193  ;;  %4032 = vmatmul.mubr.f32.vlgmr.msra.gmra.mrb[4].mxu1 %v4543_v35  ;;  %v2897_v3 = vsub.f32 %v2825_v60, %v4596_v63 }
 0x20f   :  { %v3277_v4 = vsel %vm1918_vm4, %v4194_v2, 0  ;;  %4035 = vmatpush3.msra.mxu1 %v4521_v12  ;;  %v1915_v5 = vsel %vm1881_vm2, %v4194_v2, 0.0  ;;  %4036 = vmatprep.mubr.msk.f32.mxu1 %vm4303_vm0, %v4302_v0  ;;  %v3362_v12 = vsub.f32 %v4594_v62, %v3361_v6 }
 0x210   :  { %v3348_v7 = vand.u32 4294901760, %v3277_v4  ;;  %1916 = vadd.xlane.f32.xlu1 %v1915_v5  ;;  %4069 = vmatprep.subr.mxu1 %v4302_v0  ;;  %v2898_v8 = vand.u32 4294901760, %v2897_v3 }
 0x211   :  { %v3363_v17 = vand.u32 4294901760, %v3362_v12 }
 0x212   :  { %4007 = vmatmul.mubr.f32.vlgmr.msra.gmra.mrb[4].mxu0 %v4537_v28  ;;  %v2899_v10 = vsub.f32 %v2897_v3, %v2898_v8  ;;  %v3349_v11 = vsub.f32 %v3277_v4, %v3348_v7 }
 0x213   :  { %4040 = vmatpush3.msra.mxu0 %v4576_v55  ;;  %4041 = vmatprep.mubr.msk.f32.mxu0 %vm4303_vm0, %v4302_v0 }
 0x214   :  { %v2900_v13 = vand.u32 4294901760, %v2899_v10  ;;  %4044 = vmatprep.subr.mxu0 %v4302_v0  ;;  %v3350_v15 = vand.u32 4294901760, %v3349_v11 }
 0x216   :  { %4037 = vmatmul.mubr.f32.vlgmr.msra.gmra.mrb[4].mxu1 %v4543_v35  ;;  %4042 = vmatmul.mubr.f32.vlgmr.msra.gmra.mrb[6].mxu0 %v2900_v13  ;;  %v3351_v16 = vsub.f32 %v3349_v11, %v3350_v15 }
 0x217   :  { %4070 = vmatpush3.msra.mxu1 %v4581_v57  ;;  %4071 = vmatprep.mubr.msk.f32.mxu1 %vm4303_vm0, %v4302_v0 }
 0x218   :  { %4074 = vmatprep.subr.mxu1 %v4302_v0  ;;  %4045 = vmatpush3.msra.mxu0 %v2911_v14  ;;  %v3352_v18 = vand.u32 4294901760, %v3351_v16 }
 0x219   :  { %4046 = vmatprep.mubr.msk.f32.mxu0 %vm4303_vm0, %v4302_v0  ;;  %4049 = vmatprep.subr.mxu0 %v4302_v0 }
 0x21a   :  { %4072 = vmatmul.mubr.f32.vlgmr.msra.gmra.mrb[6].mxu1 %v3352_v18 }
 0x21b   :  { %4075 = vmatpush3.msra.mxu1 %v3363_v17  ;;  %4076 = vmatprep.mubr.msk.f32.mxu1 %vm4303_vm0, %v4302_v0 }
 0x21c   :  { %4079 = vmatprep.subr.mxu1 %v4302_v0 }
 0x21e   :  { %4047 = vmatmul.mubr.f32.vlgmr.msra.gmra.mrb[6].mxu0 %v4596_v63 }
 0x21f   :  { %4050 = vmatpush3.msra.mxu0 %v4585_v58  ;;  %4051 = vmatprep.mubr.msk.f32.mxu0 %vm4303_vm0, %v4302_v0 }
 0x220   :  { %4054 = vmatprep.subr.mxu0 %v4302_v0 }
 0x222   :  { %4077 = vmatmul.mubr.f32.vlgmr.msra.gmra.mrb[6].mxu1 %v3348_v7 }
 0x223   :  { %4080 = vmatpush3.msra.mxu1 %v4594_v62  ;;  %4081 = vmatprep.mubr.msk.f32.mxu1 %vm4303_vm0, %v4302_v0 }
 0x224   :  { %4084 = vmatprep.subr.mxu1 %v4302_v0 }
 0x226   :  { %4052 = vmatmul.mubr.f32.vlgmr.msra.gmra.mrb[6].mxu0 %v2897_v3 }
 0x227   :  { %4055 = vmatpush3.msra.mxu0 %v4576_v55  ;;  %4056 = vmatprep.mubr.msk.f32.mxu0 %vm4303_vm0, %v4302_v0 }
 0x228   :  { %4059 = vmatprep.subr.mxu0 %v4302_v0 }
 0x22a   :  { %4082 = vmatmul.mubr.f32.vlgmr.msra.gmra.mrb[6].mxu1 %v3349_v11 }
 0x22b   :  { %4085 = vmatpush3.msra.mxu1 %v4581_v57  ;;  %4086 = vmatprep.mubr.msk.f32.mxu1 %vm4303_vm0, %v4302_v0 }
 0x22c   :  { %4089 = vmatprep.subr.mxu1 %v4302_v0 }
 0x22e   :  { %4057 = vmatmul.mubr.f32.vlgmr.msra.gmra.mrb[6].mxu0 %v2898_v8 }
 0x22f   :  { %4060 = vmatpush3.msra.mxu0 %v2909_v1  ;;  %4061 = vmatprep.mubr.msk.f32.mxu0 %vm4303_vm0, %v4302_v0 }
 0x230   :  { %4064 = vmatprep.subr.mxu0 %v4302_v0 }
 0x232   :  { %4087 = vmatmul.mubr.f32.vlgmr.msra.gmra.mrb[6].mxu1 %v3350_v15 }
 0x233   :  { %4090 = vmatpush3.msra.mxu1 %v3361_v6  ;;  %4091 = vmatprep.mubr.msk.f32.mxu1 %vm4303_vm0, %v4302_v0 }
 0x234   :  { %4094 = vmatprep.subr.mxu1 %v4302_v0 }
 0x236   :  { %4062 = vmatmul.mubr.f32.vlgmr.msra.gmra.mrb[6].mxu0 %v4596_v63 }
 0x237   :  { %4065 = vmatpush3.msra.mxu0 %v4576_v55  ;;  %4066 = vmatprep.mubr.msk.f32.mxu0 %vm4303_vm0, %v4302_v0 }
 0x23a   :  { %4092 = vmatmul.mubr.f32.vlgmr.msra.gmra.mrb[6].mxu1 %v3348_v7 }
 0x23b   :  { %4095 = vmatpush3.msra.mxu1 %v4581_v57  ;;  %4096 = vmatprep.mubr.msk.f32.mxu1 %vm4303_vm0, %v4302_v0 }
 0x23e   :  { %4067 = vmatmul.mubr.f32.vlgmr.msra.gmra.mrb[6].mxu0 %v4596_v63 }
 0x242   :  { %4097 = vmatmul.mubr.f32.vlgmr.msra.gmra.mrb[6].mxu1 %v3348_v7 }
 0x26d   :  { %v1908_v19 = vpop.xlane.xlu0 %1907 }
 0x26e   :  { %4195 = vrcp.f32 %v1908_v19 }
 0x271   :  { %v1911_v20 = vpop.xlane.xlu1 %1910 }
 0x272   :  { %4197 = vrcp.f32 %v1911_v20 }
 0x278   :  { %v4196_v21 = vpop.eup %4195 }
 0x279   :  { %v3729_v22 = vmul.f32 0.5, %v4196_v21 }
 0x27c   :  { %v4198_v23 = vpop.eup %4197 }
 0x27d   :  { %v3731_v27 = vmul.f32 0.5, %v4198_v23 }
 0x299   :  { %v1914_v30 = vpop.xlane.xlu0 %1913 }
 0x29a   :  { %4199 = vrcp.f32 %v1914_v30 }
 0x29d   :  { %v1917_v31 = vpop.xlane.xlu1 %1916 }
 0x29e   :  { %4201 = vrcp.f32 %v1917_v31 }
 0x2a4   :  { %v4200_v32 = vpop.eup %4199 }
 0x2a5   :  { %v3733_v33 = vmul.f32 0.5, %v4200_v32 }
 0x2a8   :  { %v4202_v34 = vpop.eup %4201 }
 0x2a9   :  { %v3735_v38 = vmul.f32 0.5, %v4202_v34 }
 0x2e5   :  { %v2368_v24 = vpop.f32.mrb[4].mxu0 }
 0x2e6   :  { %v3736_v25 = vmul.f32 %v3729_v22, %v2368_v24  ;;  %v4008_v26 = vpop.f32.mrb[5].mxu0 }
 0x2e8   :  { %3741 = vst.msk [vmem:[#allocation8] sm:$0xf] %vm3740_vm5, %v3736_v25 }
 0x2e9   :  { %v2820_v28 = vpop.f32.mrb[4].mxu1 }
 0x2ea   :  { %v3737_v29 = vmul.f32 %v3731_v27, %v2820_v28  ;;  %v4038_v0 = vpop.f32.mrb[5].mxu1 }
 0x2ec   :  { %3742 = vst.msk [vmem:[#allocation8 + $0x4] sm:$0xf] %vm3740_vm5, %v3737_v29 }
 0x311   :  { %v3272_v35 = vpop.f32.mrb[6].mxu0 }
 0x312   :  { %v3738_v36 = vmul.f32 %v3733_v33, %v3272_v35  ;;  %v4068_v37 = vpop.f32.mrb[7].mxu0 }
 0x314   :  { %3743 = vst.msk [vmem:[#allocation8 + $0x8] sm:$0xf] %vm3740_vm5, %v3738_v36 }
 0x315   :  { %v3724_v39 = vpop.f32.mrb[6].mxu1 }
 0x316   :  { %v3739_v40 = vmul.f32 %v3735_v38, %v3724_v39  ;;  %v4098_v41 = vpop.f32.mrb[7].mxu1 }
 0x318   :  { %3744 = vst.msk [vmem:[#allocation8 + $0xc] sm:$0xf] %vm3740_vm5, %v3739_v40 }
 0x319   :  { %4280 = shalt.err (!%p4277_p0)
}
 0x31a   :  { %s4281_s27 = scalar_lea.hbm %s4680_s3, 256 }
 0x31b   :  { %p4282_p1 = scmp.ne.s32.totalorder %s4680_s3, %s4281_s27  ;;  %p4285_p2 = scmp.lt.u32.totalorder %s4281_s27, %s4680_s3 }
 0x31d   :  { %p4287_p3 = pnand %p4285_p2, %p4282_p1 }
 0x31f   :  { %4290 = shalt.err (!%p4287_p3)
}
 0x320   :  { %3756 = dma.vmem_to_hbm [thread:$0]  %s3751_s21, 256, %s4680_s3, [#allocation4], %s4299_s24, %s4299_s24, %s4300_s25  }
 0x321   :  { %4295 = dma.done.wait [#allocation4], 256  }
 0x322   :  { %4296 = vsyncadd [#allocation4], 4294967040 }
 0x323   :  { %3760 = vsyncpa [#allocation3], 1 }
 0x324   :  { %3761 = vsyncpa [#allocation6], 1 }
 0x325   :  { %3762 = vsyncpa [#allocation4], 1 }

// kernel: dilated_transformer_encoder_layer.9
= control target key start
LH: loop header
LB: loop body
LE: loop exit
PB: predicated region body
PF: predicated region fallthrough
CT: control target
= control target key end

     0   :  { %14 = vsyncpa [#allocation3], 0  ;;  %s2416_s0 = inlined_call_operand.hbm [shape: f32[16,32], index: 0, kind: input, shape index: {}]   ;;  %s2417_s1 = inlined_call_operand.hbm [shape: f32[1,32], index: 1, kind: input, shape index: {}]   ;;  %s2418_s2 = inlined_call_operand.hbm [shape: f32[1,32], index: 2, kind: input, shape index: {}]   ;;  %s2419_s3 = inlined_call_operand.hbm [shape: f32[32,64], index: 3, kind: input, shape index: {}]   ;;  %s2420_s4 = inlined_call_operand.hbm [shape: f32[1,64], index: 4, kind: input, shape index: {}]   ;;  %s2421_s5 = inlined_call_operand.hbm [shape: f32[1,64], index: 5, kind: input, shape index: {}]   ;;  %s2422_s6 = inlined_call_operand.hbm [shape: f32[1,64], index: 6, kind: input, shape index: {}]   ;;  %s2423_s7 = inlined_call_operand.hbm [shape: f32[64,32], index: 7, kind: input, shape index: {}]   ;;  %s2424_s8 = inlined_call_operand.hbm [shape: f32[1,32], index: 8, kind: input, shape index: {}]   ;;  %s2425_s9 = inlined_call_operand.hbm [shape: f32[16,32], index: 9, kind: output, shape index: {}]  }
   0x1   :  { %15 = vsyncpa [#allocation6], 0 }
   0x2   :  { %16 = vsyncpa [#allocation9], 0 }
   0x3   :  { %17 = vsyncpa [#allocation12], 0 }
   0x4   :  { %18 = vsyncpa [#allocation15], 0 }
   0x5   :  { %19 = vsyncpa [#allocation4], 0  ;;  %s2112_s30 = smov [#allocation5]   ;;  %s1880_s13 = scalar_lea.hbm %s2417_s1, 16 }
   0x6   :  { %s38_s10 = sshll.u32 %s2112_s30, 4  ;;  %p1881_p0 = scmp.ne.s32.totalorder %s2417_s1, %s1880_s13  ;;  %s39_s10 = int_to_ptr.vmem [resolvable:$true] %s38_s10 }
   0x7   :  { %p1884_p1 = scmp.lt.u32.totalorder %s1880_s13, %s2417_s1 }
   0x9   :  { %p1886_p2 = pnand %p1884_p1, %p1881_p0 }
   0xb   :  { %1889 = shalt.err (!%p1886_p2)
}
   0xc   :  { %s1890_s18 = scalar_lea.vmem %s39_s10, 16  ;;  %s1894_s19 = scalar_lea.vmem %s39_s10, 32 }
   0xd   :  { %p1891_p3 = scmp.ne.s32.totalorder %s39_s10, %s1890_s18  ;;  %p1895_p4 = scmp.lt.s32.totalorder %s39_s10, %s39_s10 }
   0xe   :  { %p1896_p5 = scmp.lt.s32.totalorder %s1894_s19, %s1890_s18 }
  0x10   :  { %p1897_p6 = por %p1896_p5, %p1895_p4 }
  0x12   :  { %p1898_p7 = pnand %p1897_p6, %p1891_p3 }
  0x14   :  { %1901 = shalt.err (!%p1898_p7)
}
  0x15   :  { %41 = dma.hbm_to_vmem [thread:$0]  %s2417_s1, 16, %s39_s10, [#allocation6]  }
  0x16   :  { %s2113_s22 = smov [#allocation8]   ;;  %s2114_s24 = smov [#allocation11]  }
  0x17   :  { %s57_s23 = sshll.u32 %s2113_s22, 4  ;;  %s80_s25 = sshll.u32 %s2114_s24, 4  ;;  %s58_s23 = int_to_ptr.vmem [resolvable:$true] %s57_s23  ;;  %s81_s25 = int_to_ptr.vmem [resolvable:$true] %s80_s25 }
  0x18   :  { %s1902_s28 = scalar_lea.hbm %s2419_s3, 512 }
  0x19   :  { %p1903_p8 = scmp.ne.s32.totalorder %s2419_s3, %s1902_s28  ;;  %p1906_p9 = scmp.lt.u32.totalorder %s1902_s28, %s2419_s3 }
  0x1b   :  { %p1908_p10 = pnand %p1906_p9, %p1903_p8 }
  0x1d   :  { %1911 = shalt.err (!%p1908_p10)
}
  0x1e   :  { %s1912_s1 = scalar_lea.vmem %s58_s23, 512  ;;  %p1917_p12 = scmp.lt.s32.totalorder %s58_s23, %s58_s23 }
  0x1f   :  { %p1913_p11 = scmp.ne.s32.totalorder %s58_s23, %s1912_s1  ;;  %p1918_p13 = scmp.lt.s32.totalorder %s1912_s1, %s1912_s1 }
  0x21   :  { %p1919_p0 = por %p1918_p13, %p1917_p12 }
  0x23   :  { %p1920_p1 = pnand %p1919_p0, %p1913_p11 }
  0x25   :  { %1923 = shalt.err (!%p1920_p1)
}
  0x26   :  { %s2115_s10 = smov 128   ;;  %s2116_s13 = smov 8  }
  0x27   :  { %63 = dma.hbm_to_vmem [thread:$0]  %s2419_s3, 512, %s58_s23, [#allocation9], %s2115_s10, %s2115_s10, %s2116_s13  }
  0x28   :  { %s1924_s18 = scalar_lea.hbm %s2421_s5, 16 }
  0x29   :  { %p1925_p2 = scmp.ne.s32.totalorder %s2421_s5, %s1924_s18  ;;  %p1928_p3 = scmp.lt.u32.totalorder %s1924_s18, %s2421_s5 }
  0x2b   :  { %p1930_p4 = pnand %p1928_p3, %p1925_p2 }
  0x2d   :  { %1933 = shalt.err (!%p1930_p4)
}
  0x2e   :  { %s1934_s24 = scalar_lea.vmem %s81_s25, 16  ;;  %s1938_s26 = scalar_lea.vmem %s81_s25, 32 }
  0x2f   :  { %p1935_p5 = scmp.ne.s32.totalorder %s81_s25, %s1934_s24  ;;  %p1939_p6 = scmp.lt.s32.totalorder %s81_s25, %s81_s25 }
  0x30   :  { %p1940_p7 = scmp.lt.s32.totalorder %s1938_s26, %s1934_s24 }
  0x32   :  { %p1941_p8 = por %p1940_p7, %p1939_p6 }
  0x34   :  { %p1942_p9 = pnand %p1941_p8, %p1935_p5 }
  0x36   :  { %1945 = shalt.err (!%p1942_p9)
}
  0x37   :  { %83 = dma.hbm_to_vmem [thread:$0]  %s2421_s5, 16, %s81_s25, [#allocation12]  }
  0x38   :  { %s2117_s27 = smov [#allocation14]   ;;  %s2118_s29 = smov [#allocation2]  }
  0x39   :  { %s99_s28 = sshll.u32 %s2117_s27, 4  ;;  %s25_s30 = sshll.u32 %s2118_s29, 4  ;;  %s100_s28 = int_to_ptr.vmem [resolvable:$true] %s99_s28  ;;  %s26_s30 = int_to_ptr.vmem [resolvable:$true] %s25_s30 }
  0x3a   :  { %s1946_s1 = scalar_lea.hbm %s2423_s7, 1024 }
  0x3b   :  { %p1947_p10 = scmp.ne.s32.totalorder %s2423_s7, %s1946_s1  ;;  %p1950_p11 = scmp.lt.u32.totalorder %s1946_s1, %s2423_s7 }
  0x3d   :  { %p1952_p12 = pnand %p1950_p11, %p1947_p10 }
  0x3f   :  { %1955 = shalt.err (!%p1952_p12)
}
  0x40   :  { %s1956_s5 = scalar_lea.vmem %s100_s28, 1024  ;;  %p1961_p0 = scmp.lt.s32.totalorder %s100_s28, %s100_s28 }
  0x41   :  { %p1957_p13 = scmp.ne.s32.totalorder %s100_s28, %s1956_s5  ;;  %p1962_p1 = scmp.lt.s32.totalorder %s1956_s5, %s1956_s5 }
  0x43   :  { %p1963_p2 = por %p1962_p1, %p1961_p0 }
  0x45   :  { %p1964_p3 = pnand %p1963_p2, %p1957_p13 }
  0x47   :  { %1967 = shalt.err (!%p1964_p3)
}
  0x48   :  { %105 = dma.hbm_to_vmem [thread:$0]  %s2423_s7, 1024, %s100_s28, [#allocation15], %s2115_s10, %s2115_s10, %s2116_s13  }
  0x49   :  { %s1968_s21 = scalar_lea.hbm %s2416_s0, 256 }
  0x4a   :  { %p1969_p4 = scmp.ne.s32.totalorder %s2416_s0, %s1968_s21  ;;  %p1972_p5 = scmp.lt.u32.totalorder %s1968_s21, %s2416_s0 }
  0x4c   :  { %p1974_p6 = pnand %p1972_p5, %p1969_p4 }
  0x4e   :  { %1977 = shalt.err (!%p1974_p6)
}
  0x4f   :  { %s1978_s23 = scalar_lea.vmem %s26_s30, 256  ;;  %p1983_p8 = scmp.lt.s32.totalorder %s26_s30, %s26_s30 }
  0x50   :  { %p1979_p7 = scmp.ne.s32.totalorder %s26_s30, %s1978_s23  ;;  %p1984_p9 = scmp.lt.s32.totalorder %s1978_s23, %s1978_s23 }
  0x52   :  { %p1985_p10 = por %p1984_p9, %p1983_p8 }
  0x54   :  { %p1986_p11 = pnand %p1985_p10, %p1979_p7 }
  0x56   :  { %1989 = shalt.err (!%p1986_p11)
}
  0x57   :  { %31 = dma.hbm_to_vmem [thread:$0]  %s2416_s0, 256, %s26_s30, [#allocation3], %s2115_s10, %s2115_s10, %s2116_s13  }
  0x58   :  { %s2119_s28 = smov [#allocation7]   ;;  %s2120_s11 = smov [#allocation10]  }
  0x59   :  { %s48_s29 = sshll.u32 %s2119_s28, 4  ;;  %s70_s12 = sshll.u32 %s2120_s11, 4  ;;  %s49_s29 = int_to_ptr.vmem [resolvable:$true] %s48_s29  ;;  %s71_s12 = int_to_ptr.vmem [resolvable:$true] %s70_s12 }
  0x5a   :  { %s1990_s15 = scalar_lea.hbm %s2418_s2, 16 }
  0x5b   :  { %p1991_p12 = scmp.ne.s32.totalorder %s2418_s2, %s1990_s15  ;;  %p1994_p13 = scmp.lt.u32.totalorder %s1990_s15, %s2418_s2 }
  0x5d   :  { %p1996_p0 = pnand %p1994_p13, %p1991_p12 }
  0x5f   :  { %1999 = shalt.err (!%p1996_p0)
}
  0x60   :  { %s2000_s0 = scalar_lea.vmem %s49_s29, 16  ;;  %s2004_s30 = scalar_lea.vmem %s49_s29, 32 }
  0x61   :  { %p2001_p1 = scmp.ne.s32.totalorder %s49_s29, %s2000_s0  ;;  %p2005_p2 = scmp.lt.s32.totalorder %s49_s29, %s49_s29 }
  0x62   :  { %p2006_p3 = scmp.lt.s32.totalorder %s2004_s30, %s2000_s0 }
  0x64   :  { %p2007_p4 = por %p2006_p3, %p2005_p2 }
  0x66   :  { %p2008_p5 = pnand %p2007_p4, %p2001_p1 }
  0x68   :  { %2011 = shalt.err (!%p2008_p5)
}
  0x69   :  { %51 = dma.hbm_to_vmem [thread:$0]  %s2418_s2, 16, %s49_s29, [#allocation6]  }
  0x6a   :  { %s2012_s22 = scalar_lea.hbm %s2420_s4, 16 }
  0x6b   :  { %p2013_p6 = scmp.ne.s32.totalorder %s2420_s4, %s2012_s22  ;;  %p2016_p7 = scmp.lt.u32.totalorder %s2012_s22, %s2420_s4 }
  0x6d   :  { %p2018_p8 = pnand %p2016_p7, %p2013_p6 }
  0x6f   :  { %2021 = shalt.err (!%p2018_p8)
}
  0x70   :  { %s2022_s7 = scalar_lea.vmem %s71_s12, 16  ;;  %s2026_s27 = scalar_lea.vmem %s71_s12, 32 }
  0x71   :  { %p2023_p9 = scmp.ne.s32.totalorder %s71_s12, %s2022_s7  ;;  %p2027_p10 = scmp.lt.s32.totalorder %s71_s12, %s71_s12 }
  0x72   :  { %p2028_p11 = scmp.lt.s32.totalorder %s2026_s27, %s2022_s7 }
  0x74   :  { %p2029_p12 = por %p2028_p11, %p2027_p10 }
  0x76   :  { %p2030_p13 = pnand %p2029_p12, %p2023_p9 }
  0x78   :  { %2033 = shalt.err (!%p2030_p13)
}
  0x79   :  { %73 = dma.hbm_to_vmem [thread:$0]  %s2420_s4, 16, %s71_s12, [#allocation9]  }
  0x7a   :  { %s2121_s29 = smov [#allocation13]   ;;  %s2122_s1 = smov [#allocation16]  }
  0x7b   :  { %s90_s11 = sshll.u32 %s2121_s29, 4  ;;  %s112_s14 = sshll.u32 %s2122_s1, 4  ;;  %s91_s11 = int_to_ptr.vmem [resolvable:$true] %s90_s11  ;;  %s113_s14 = int_to_ptr.vmem [resolvable:$true] %s112_s14 }
  0x7c   :  { %s2034_s17 = scalar_lea.hbm %s2422_s6, 16 }
  0x7d   :  { %p2035_p0 = scmp.ne.s32.totalorder %s2422_s6, %s2034_s17  ;;  %p2038_p1 = scmp.lt.u32.totalorder %s2034_s17, %s2422_s6 }
  0x7f   :  { %p2040_p2 = pnand %p2038_p1, %p2035_p0 }
  0x81   :  { %2043 = shalt.err (!%p2040_p2)
}
  0x82   :  { %s2044_s4 = scalar_lea.vmem %s91_s11, 16  ;;  %s2048_s12 = scalar_lea.vmem %s91_s11, 32 }
  0x83   :  { %p2045_p3 = scmp.ne.s32.totalorder %s91_s11, %s2044_s4  ;;  %p2049_p4 = scmp.lt.s32.totalorder %s91_s11, %s91_s11 }
  0x84   :  { %p2050_p5 = scmp.lt.s32.totalorder %s2048_s12, %s2044_s4 }
  0x86   :  { %p2051_p6 = por %p2050_p5, %p2049_p4 }
  0x88   :  { %p2052_p7 = pnand %p2051_p6, %p2045_p3 }
  0x8a   :  { %2055 = shalt.err (!%p2052_p7)
}
  0x8b   :  { %93 = dma.hbm_to_vmem [thread:$0]  %s2422_s6, 16, %s91_s11, [#allocation12]  }
  0x8c   :  { %s2056_s22 = scalar_lea.hbm %s2424_s8, 16 }
  0x8d   :  { %p2057_p8 = scmp.ne.s32.totalorder %s2424_s8, %s2056_s22  ;;  %p2060_p9 = scmp.lt.u32.totalorder %s2056_s22, %s2424_s8 }
  0x8f   :  { %p2062_p10 = pnand %p2060_p9, %p2057_p8 }
  0x91   :  { %2065 = shalt.err (!%p2062_p10)
}
  0x92   :  { %s2066_s7 = scalar_lea.vmem %s113_s14, 16  ;;  %s2070_s27 = scalar_lea.vmem %s113_s14, 32 }
  0x93   :  { %p2067_p11 = scmp.ne.s32.totalorder %s113_s14, %s2066_s7  ;;  %p2071_p12 = scmp.lt.s32.totalorder %s113_s14, %s113_s14 }
  0x94   :  { %p2072_p13 = scmp.lt.s32.totalorder %s2070_s27, %s2066_s7 }
  0x96   :  { %p2073_p0 = por %p2072_p13, %p2071_p12 }
  0x98   :  { %p2074_p1 = pnand %p2073_p0, %p2067_p11 }
  0x9a   :  { %2077 = shalt.err (!%p2074_p1)
}
  0x9b   :  { %115 = dma.hbm_to_vmem [thread:$0]  %s2424_s8, 16, %s113_s14, [#allocation15]  }
  0x9c   :  { %2100 = dma.done.wait [#allocation3], 256  }
  0x9d   :  { %2101 = vsyncadd [#allocation3], 4294967040 }
  0x9e   :  { %2102 = dma.done.wait [#allocation6], 32  }
  0x9f   :  { %2103 = vsyncadd [#allocation6], 4294967264 }
  0xa0   :  { %2104 = dma.done.wait [#allocation9], 528  }
  0xa1   :  { %2105 = vsyncadd [#allocation9], 4294966768 }
  0xa2   :  { %2106 = dma.done.wait [#allocation12], 32  }
  0xa3   :  { %2107 = vsyncadd [#allocation12], 4294967264 }
  0xa4   :  { %2108 = dma.done.wait [#allocation15], 1040  }
  0xa5   :  { %2109 = vsyncadd [#allocation15], 4294966256  ;;  %vm147_vm0 = vcmask 261120   ;;  %v2291_v0 = vld [vmem:[#allocation2] sm:$0xff]  ;;  %v2293_v1 = vld [vmem:[#allocation2 + $0x8] sm:$0xff]  ;;  %vm740_vm1 = vcmask 523264  }
  0xa6   :  { %v148_v2 = vsel %vm147_vm0, %v2291_v0, 0.0  ;;  %v151_v3 = vsel %vm147_vm0, %v2293_v1, 0.0  ;;  %v191_v14 = vld [vmem:[#allocation8] sm:$0xff]  ;;  %v192_v15 = vld [vmem:[#allocation8 + $0x8] sm:$0xff]  ;;  %v193_v16 = vld [vmem:[#allocation8 + $0x10] sm:$0xff]  ;;  %s2123_s8 = smov [#allocation17]  }
  0xa7   :  { %149 = vadd.xlane.f32.xlu0 %v148_v2  ;;  %v209_v17 = vand.u32 4294901760, %v191_v14  ;;  %v212_v18 = vand.u32 4294901760, %v192_v15  ;;  %v194_v19 = vld [vmem:[#allocation8 + $0x18] sm:$0xff]  ;;  %v215_v20 = vand.u32 4294901760, %v193_v16  ;;  %s1394_s28 = sshll.u32 %s2123_s8, 4  ;;  %s1395_s28 = int_to_ptr.vmem [resolvable:$true] %s1394_s28 }
  0xa8   :  { %v218_v21 = vand.u32 4294901760, %v194_v19  ;;  %v1410_v53 = vld [vmem:[#allocation5] ss:$0 sm:$0xff]  ;;  %v1411_v55 = vld [vmem:[#allocation7] ss:$0 sm:$0xff]  ;;  %s2078_s29 = scalar_lea.vmem %s1395_s28, 256  ;;  %p2083_p3 = scmp.lt.s32.totalorder %s1395_s28, %s1395_s28 }
  0xa9   :  { %v2303_v22 = vpack.c.bf16 %v212_v18, %v209_v17  ;;  %v299_v24 = vsub.f32 %v191_v14, %v209_v17  ;;  %v306_v25 = vsub.f32 %v192_v15, %v212_v18  ;;  %v313_v30 = vsub.f32 %v193_v16, %v215_v20  ;;  %p2079_p2 = scmp.ne.s32.totalorder %s1395_s28, %s2078_s29  ;;  %p2084_p4 = scmp.lt.s32.totalorder %s2078_s29, %s2078_s29 }
  0xaa   :  { %v2305_v23 = vpack.c.bf16 %v218_v21, %v215_v20  ;;  %v320_v31 = vsub.f32 %v194_v19, %v218_v21 }
  0xab   :  { %152 = vadd.xlane.f32.xlu0 %v151_v3  ;;  %1693 = vmatprep.subr.bf16.mxu0 %v2303_v22  ;;  %v300_v26 = vand.u32 4294901760, %v299_v24  ;;  %v307_v27 = vand.u32 4294901760, %v306_v25  ;;  %v314_v34 = vand.u32 4294901760, %v313_v30  ;;  %v1708_v42 = vpack.c.bf16 %v306_v25, %v299_v24  ;;  %p2085_p5 = por %p2084_p4, %p2083_p3 }
  0xac   :  { %1695 = vmatpush3.bf16.msra.mxu0 %v2303_v22  ;;  %v321_v35 = vand.u32 4294901760, %v320_v31  ;;  %v1712_v43 = vpack.c.bf16 %v320_v31, %v313_v30 }
  0xad   :  { %1697 = vmatprep.subr.bf16.mxu0 %v2305_v23  ;;  %v301_v28 = vsub.f32 %v299_v24, %v300_v26  ;;  %v308_v29 = vsub.f32 %v306_v25, %v307_v27  ;;  %v315_v37 = vsub.f32 %v313_v30, %v314_v34  ;;  %v1724_v44 = vpack.c.bf16 %v307_v27, %v300_v26  ;;  %p2086_p6 = pnand %p2085_p5, %p2079_p2 }
  0xae   :  { %v322_v38 = vsub.f32 %v320_v31, %v321_v35  ;;  %v1728_v45 = vpack.c.bf16 %v321_v35, %v314_v34  ;;  %v784_v31 = vld [vmem:[#allocation14] sm:$0xff] }
  0xaf   :  { %v302_v32 = vand.u32 4294901760, %v301_v28  ;;  %v309_v33 = vand.u32 4294901760, %v308_v29  ;;  %v316_v39 = vand.u32 4294901760, %v315_v37  ;;  %v786_v37 = vld [vmem:[#allocation14 + $0x10] sm:$0xff] }
  0xb0   :  { %1699 = vmatpush3.bf16.msra.mxu0 %v2305_v23  ;;  %v323_v40 = vand.u32 4294901760, %v322_v38  ;;  %v787_v38 = vld [vmem:[#allocation14 + $0x18] sm:$0xff] }
  0xb1   :  { %v1700_v36 = vpack.c.bf16 %v309_v33, %v302_v32  ;;  %v785_v32 = vld [vmem:[#allocation14 + $0x8] sm:$0xff]  ;;  %v806_v33 = vand.u32 4294901760, %v784_v31 }
  0xb2   :  { %v1704_v41 = vpack.c.bf16 %v323_v40, %v316_v39  ;;  %v809_v34 = vand.u32 4294901760, %v785_v32 }
  0xb3   :  { %1701 = vmatprep.subr.bf16.mxu0 %v1700_v36  ;;  %v2333_v35 = vsub.f32 %v784_v31, %v806_v33 }
  0xb5   :  { %v901_v39 = vand.u32 4294901760, %v2333_v35 }
 0x134   :  { %v150_v4 = vpop.xlane.xlu0 %149 }
 0x135   :  { %v155_v5 = vmul.f32 0.03125, %v150_v4 }
 0x137   :  { %v157_v6 = vsub.f32 %v2291_v0, %v155_v5 }
 0x138   :  { %v153_v7 = vpop.xlane.xlu0 %152 }
 0x139   :  { %v156_v8 = vmul.f32 0.03125, %v153_v7  ;;  %v159_v9 = vmul.f32 %v157_v6, %v157_v6 }
 0x13b   :  { %v158_v10 = vsub.f32 %v2293_v1, %v156_v8  ;;  %v161_v11 = vsel %vm147_vm0, %v159_v9, 0.0 }
 0x13c   :  { %162 = vadd.xlane.f32.xlu1 %v161_v11 }
 0x13d   :  { %v160_v12 = vmul.f32 %v158_v10, %v158_v10 }
 0x13f   :  { %v164_v13 = vsel %vm147_vm0, %v160_v12, 0.0 }
 0x140   :  { %165 = vadd.xlane.f32.xlu1 %v164_v13 }
 0x1c9   :  { %v163_v46 = vpop.xlane.xlu1 %162 }
 0x1ca   :  { %v167_v47 = vmul.f32 0.03125, %v163_v46 }
 0x1cc   :  { %v169_v48 = vadd.f32 1e-05, %v167_v47  ;;  %v788_v47 = vld [vmem:[#allocation14 + $0x20] sm:$0xff] }
 0x1cd   :  { %v166_v49 = vpop.xlane.xlu1 %165 }
 0x1ce   :  { %1872 = vrsqrt.f32 %v169_v48  ;;  %v168_v50 = vmul.f32 0.03125, %v166_v49  ;;  %v789_v48 = vld [vmem:[#allocation14 + $0x28] sm:$0xff] }
 0x1d0   :  { %v170_v51 = vadd.f32 1e-05, %v168_v50 }
 0x1d2   :  { %1874 = vrsqrt.f32 %v170_v51 }
 0x1d8   :  { %v1873_v52 = vpop.eup %1872 }
 0x1d9   :  { %v173_v54 = vmul.f32 %v1873_v52, %v157_v6 }
 0x1db   :  { %v181_v56 = vmul.f32 %v1410_v53, %v173_v54  ;;  %v821_v54 = vand.u32 4294901760, %v789_v48 }
 0x1dc   :  { %v1875_v57 = vpop.eup %1874 }
 0x1dd   :  { %v174_v58 = vmul.f32 %v1875_v57, %v158_v10  ;;  %v189_v59 = vadd.f32 %v1411_v55, %v181_v56  ;;  %v1412_v10 = vld [vmem:[#allocation10] ss:$0 sm:$0xff] }
 0x1df   :  { %v182_v60 = vmul.f32 %v1410_v53, %v174_v58  ;;  %v203_v61 = vsel %vm147_vm0, %v189_v59, 0  ;;  %v818_v53 = vand.u32 4294901760, %v788_v47  ;;  %v935_v59 = vsub.f32 %v789_v48, %v821_v54 }
 0x1e0   :  { %v277_v62 = vand.u32 4294901760, %v203_v61 }
 0x1e1   :  { %v190_v63 = vadd.f32 %v1411_v55, %v182_v60  ;;  %v928_v58 = vsub.f32 %v788_v47, %v818_v53  ;;  %v790_v60 = vld [vmem:[#allocation14 + $0x30] sm:$0xff] }
 0x1e2   :  { %v278_v2 = vsub.f32 %v203_v61, %v277_v62  ;;  %v791_v61 = vld [vmem:[#allocation14 + $0x38] sm:$0xff] }
 0x1e3   :  { %v206_v3 = vsel %vm147_vm0, %v190_v63, 0 }
 0x1e4   :  { %v279_v4 = vand.u32 4294901760, %v278_v2  ;;  %v287_v5 = vand.u32 4294901760, %v206_v3 }
 0x1e6   :  { %v280_v7 = vsub.f32 %v278_v2, %v279_v4  ;;  %v288_v8 = vsub.f32 %v206_v3, %v287_v5  ;;  %v827_v3 = vand.u32 4294901760, %v791_v61 }
 0x1e8   :  { %v281_v9 = vand.u32 4294901760, %v280_v7  ;;  %v289_v11 = vand.u32 4294901760, %v288_v8 }
 0x1ea   :  { %1520 = vmatprep.mubr.f32.mxu0 %v281_v9  ;;  %v290_v6 = vsub.f32 %v288_v8, %v289_v11  ;;  %v949_v9 = vsub.f32 %v791_v61, %v827_v3 }
 0x1ec   :  { %v291_v12 = vand.u32 4294901760, %v290_v6 }
 0x1ee   :  { %1521 = vmatmul.mubr.f32.vlgmr.msra.gmra.mrb[0].mxu0 %v291_v12 }
 0x1ef   :  { %1703 = vmatpush3.bf16.msra.mxu0 %v1700_v36  ;;  %1531 = vmatprep.mubr.f32.mxu0 %v277_v62  ;;  %v2335_v36 = vsub.f32 %v785_v32, %v809_v34 }
 0x1f0   :  { %1705 = vmatprep.subr.bf16.mxu0 %v1704_v41 }
 0x1f1   :  { %v908_v40 = vand.u32 4294901760, %v2335_v36 }
 0x1f3   :  { %1707 = vmatpush3.bf16.msra.mxu0 %v1704_v41  ;;  %v812_v41 = vand.u32 4294901760, %v786_v37  ;;  %v1804_v31 = vpack.c.bf16 %v908_v40, %v901_v39 }
 0x1f4   :  { %1709 = vmatprep.subr.bf16.mxu0 %v1708_v42 }
 0x1f6   :  { %1532 = vmatmul.mubr.f32.vlgmr.msra.gmra.mrb[0].mxu0 %v287_v5 }
 0x1f7   :  { %1711 = vmatpush3.bf16.msra.mxu0 %v1708_v42  ;;  %1542 = vmatprep.mubr.f32.mxu0 %v278_v2  ;;  %v815_v42 = vand.u32 4294901760, %v787_v38  ;;  %v824_v2 = vand.u32 4294901760, %v790_v60 }
 0x1f8   :  { %1713 = vmatprep.subr.bf16.mxu0 %v1712_v43 }
 0x1f9   :  { %v2347_v46 = vsub.f32 %v787_v38, %v815_v42 }
 0x1fb   :  { %1715 = vmatpush3.bf16.msra.mxu0 %v1712_v43  ;;  %v902_v43 = vsub.f32 %v2333_v35, %v901_v39  ;;  %v922_v52 = vand.u32 4294901760, %v2347_v46 }
 0x1fc   :  { %1717 = vmatprep.subr.bf16.mxu0 %v2303_v22 }
 0x1fd   :  { %v903_v49 = vand.u32 4294901760, %v902_v43  ;;  %v923_v57 = vsub.f32 %v2347_v46, %v922_v52 }
 0x1fe   :  { %1543 = vmatmul.mubr.f32.vlgmr.msra.gmra.mrb[0].mxu0 %v288_v8  ;;  %v942_v8 = vsub.f32 %v790_v60, %v824_v2 }
 0x1ff   :  { %1719 = vmatpush3.bf16.msra.mxu0 %v2303_v22  ;;  %1553 = vmatprep.mubr.f32.mxu0 %v279_v4  ;;  %v924_v63 = vand.u32 4294901760, %v923_v57  ;;  %v929_v4 = vand.u32 4294901760, %v928_v58 }
 0x200   :  { %1721 = vmatprep.subr.bf16.mxu0 %v2305_v23  ;;  %v943_v12 = vand.u32 4294901760, %v942_v8 }
 0x203   :  { %1723 = vmatpush3.bf16.msra.mxu0 %v2305_v23 }
 0x204   :  { %1725 = vmatprep.subr.bf16.mxu0 %v1724_v44 }
 0x206   :  { %1554 = vmatmul.mubr.f32.vlgmr.msra.gmra.mrb[0].mxu0 %v289_v11  ;;  %v930_v11 = vsub.f32 %v928_v58, %v929_v4 }
 0x207   :  { %1727 = vmatpush3.bf16.msra.mxu0 %v1724_v44  ;;  %1564 = vmatprep.mubr.f32.mxu0 %v277_v62  ;;  %v909_v44 = vsub.f32 %v2335_v36, %v908_v40 }
 0x208   :  { %1729 = vmatprep.subr.bf16.mxu0 %v1728_v45 }
 0x209   :  { %v910_v50 = vand.u32 4294901760, %v909_v44 }
 0x20b   :  { %1731 = vmatpush3.bf16.msra.mxu0 %v1728_v45  ;;  %v2345_v45 = vsub.f32 %v786_v37, %v812_v41  ;;  %v1756_v55 = vpack.c.bf16 %v910_v50, %v903_v49 }
 0x20c   :  { %1733 = vmatprep.subr.bf16.mxu0 %v2303_v22 }
 0x20d   :  { %v915_v51 = vand.u32 4294901760, %v2345_v45  ;;  %1757 = vmatprep.subr.bf16.mxu1 %v1756_v55 }
 0x20e   :  { %1565 = vmatmul.mubr.f32.vlgmr.msra.gmra.mrb[0].mxu0 %v287_v5  ;;  %1759 = vmatpush3.bf16.msra.mxu1 %v1756_v55 }
 0x20f   :  { %1735 = vmatpush3.bf16.msra.mxu0 %v2303_v22  ;;  %1575 = vmatprep.mubr.f32.mxu0 %v277_v62  ;;  %v916_v56 = vsub.f32 %v2345_v45, %v915_v51  ;;  %v1808_v32 = vpack.c.bf16 %v922_v52, %v915_v51 }
 0x210   :  { %1737 = vmatprep.subr.bf16.mxu0 %v2305_v23 }
 0x211   :  { %v917_v62 = vand.u32 4294901760, %v916_v56 }
 0x213   :  { %1739 = vmatpush3.bf16.msra.mxu0 %v2305_v23  ;;  %v1760_v7 = vpack.c.bf16 %v924_v63, %v917_v62  ;;  %v1415_v63 = vld [vmem:[#allocation16] ss:$0 sm:$0xff] }
 0x215   :  { %1761 = vmatprep.subr.bf16.mxu1 %v1760_v7 }
 0x216   :  { %1576 = vmatmul.mubr.f32.vlgmr.msra.gmra.mrb[0].mxu0 %v287_v5  ;;  %v936_v5 = vand.u32 4294901760, %v935_v59  ;;  %1763 = vmatpush3.bf16.msra.mxu1 %v1760_v7 }
 0x218   :  { %v937_v6 = vsub.f32 %v935_v59, %v936_v5 }
 0x2e9   :  { %v1577_v13 = vpop.f32.mrb[0].mxu0 }
 0x2ea   :  { %v1836_v14 = vadd.f32 %v1577_v13, %v1412_v10  ;;  %v726_v15 = vpop.f32.mrb[1].mxu0  ;;  %v931_v13 = vand.u32 4294901760, %v930_v11 }
 0x2eb   :  { %v1837_v16 = vadd.f32 %v1412_v10, %v726_v15  ;;  %v950_v10 = vand.u32 4294901760, %v949_v9  ;;  %v944_v15 = vsub.f32 %v942_v8, %v943_v12 }
 0x2ec   :  { %v737_v17 = vmax.f32 %v1836_v14, 0.0  ;;  %v938_v14 = vand.u32 4294901760, %v937_v6 }
 0x2ed   :  { %v736_v18 = vmax.f32 %v1837_v16, 0.0  ;;  %v951_v16 = vsub.f32 %v949_v9, %v950_v10 }
 0x2ee   :  { %v744_v19 = vsel %vm740_vm1, %v737_v17, 0.0 }
 0x2ef   :  { %745 = vadd.xlane.f32.xlu1 %v744_v19  ;;  %v741_v20 = vsel %vm740_vm1, %v736_v18, 0.0  ;;  %v1764_v19 = vpack.c.bf16 %v938_v14, %v931_v13 }
 0x2f0   :  { %742 = vadd.xlane.f32.xlu0 %v741_v20  ;;  %v945_v20 = vand.u32 4294901760, %v944_v15 }
 0x2f1   :  { %1765 = vmatprep.subr.bf16.mxu1 %v1764_v19 }
 0x2f2   :  { %1767 = vmatpush3.bf16.msra.mxu1 %v1764_v19 }
 0x37c   :  { %v746_v21 = vpop.xlane.xlu1 %745 }
 0x37d   :  { %v749_v22 = vmul.f32 0.015625, %v746_v21  ;;  %v743_v24 = vpop.xlane.xlu0 %742  ;;  %v952_v21 = vand.u32 4294901760, %v951_v16 }
 0x37e   :  { %v748_v25 = vmul.f32 0.015625, %v743_v24  ;;  %v2359_v24 = vpack.c.bf16 %v821_v54, %v818_v53 }
 0x37f   :  { %v2323_v23 = vsub.f32 %v737_v17, %v749_v22  ;;  %v2353_v17 = vpack.c.bf16 %v809_v34, %v806_v33  ;;  %v1768_v22 = vpack.c.bf16 %v952_v21, %v945_v20  ;;  %v1812_v33 = vpack.c.bf16 %v936_v5, %v929_v4 }
 0x380   :  { %v2325_v26 = vsub.f32 %v736_v18, %v748_v25  ;;  %v2355_v18 = vpack.c.bf16 %v815_v42, %v812_v41  ;;  %v1772_v25 = vpack.c.bf16 %v2335_v36, %v2333_v35  ;;  %v1816_v34 = vpack.c.bf16 %v950_v10, %v943_v12  ;;  %v1414_v36 = vld [vmem:[#allocation13] ss:$0 sm:$0xff] }
 0x381   :  { %v753_v27 = vmul.f32 %v2323_v23, %v2323_v23  ;;  %1741 = vmatprep.subr.bf16.mxu0 %v2353_v17  ;;  %1769 = vmatprep.subr.bf16.mxu1 %v1768_v22 }
 0x382   :  { %v752_v28 = vmul.f32 %v2325_v26, %v2325_v26  ;;  %1743 = vmatpush3.bf16.msra.mxu0 %v2353_v17  ;;  %1771 = vmatpush3.bf16.msra.mxu1 %v1768_v22 }
 0x383   :  { %v757_v29 = vsel %vm740_vm1, %v753_v27, 0.0  ;;  %1745 = vmatprep.subr.bf16.mxu0 %v2355_v18  ;;  %v2365_v27 = vpack.c.bf16 %v827_v3, %v824_v2  ;;  %1773 = vmatprep.subr.bf16.mxu1 %v1772_v25 }
 0x384   :  { %758 = vadd.xlane.f32.xlu1 %v757_v29  ;;  %v754_v30 = vsel %vm740_vm1, %v752_v28, 0.0  ;;  %v1776_v28 = vpack.c.bf16 %v2347_v46, %v2345_v45  ;;  %v1780_v29 = vpack.c.bf16 %v935_v59, %v928_v58  ;;  %v1413_v46 = vld [vmem:[#allocation11] ss:$0 sm:$0xff] }
 0x385   :  { %755 = vadd.xlane.f32.xlu0 %v754_v30  ;;  %v1784_v30 = vpack.c.bf16 %v949_v9, %v942_v8 }
 0x386   :  { %1747 = vmatpush3.bf16.msra.mxu0 %v2355_v18 }
 0x387   :  { %1749 = vmatprep.subr.bf16.mxu0 %v2359_v24 }
 0x38a   :  { %1751 = vmatpush3.bf16.msra.mxu0 %v2359_v24 }
 0x38b   :  { %1753 = vmatprep.subr.bf16.mxu0 %v2365_v27 }
 0x38e   :  { %1755 = vmatpush3.bf16.msra.mxu0 %v2365_v27 }
 0x411   :  { %v759_v37 = vpop.xlane.xlu1 %758 }
 0x412   :  { %v761_v38 = vmul.f32 0.015625, %v759_v37  ;;  %v756_v41 = vpop.xlane.xlu0 %755 }
 0x413   :  { %v760_v42 = vmul.f32 0.015625, %v756_v41 }
 0x414   :  { %v763_v43 = vadd.f32 1e-05, %v761_v38 }
 0x415   :  { %v762_v44 = vadd.f32 1e-05, %v760_v42 }
 0x416   :  { %1876 = vrsqrt.f32 %v763_v43 }
 0x417   :  { %1878 = vrsqrt.f32 %v762_v44 }
 0x420   :  { %v1877_v45 = vpop.eup %1876 }
 0x421   :  { %v1879_v47 = vpop.eup %1878  ;;  %v767_v48 = vmul.f32 %v1877_v45, %v2323_v23 }
 0x422   :  { %v766_v35 = vmul.f32 %v1879_v47, %v2325_v26 }
 0x423   :  { %v775_v39 = vmul.f32 %v1413_v46, %v767_v48 }
 0x424   :  { %v774_v40 = vmul.f32 %v1413_v46, %v766_v35 }
 0x425   :  { %v783_v49 = vadd.f32 %v1414_v36, %v775_v39 }
 0x426   :  { %v782_v50 = vadd.f32 %v1414_v36, %v774_v40 }
 0x427   :  { %v803_v51 = vsel %vm740_vm1, %v783_v49, 0 }
 0x428   :  { %v800_v52 = vsel %vm740_vm1, %v782_v50, 0  ;;  %v888_v53 = vand.u32 4294901760, %v803_v51 }
 0x429   :  { %v878_v54 = vand.u32 4294901760, %v800_v52 }
 0x42a   :  { %v889_v55 = vsub.f32 %v803_v51, %v888_v53 }
 0x42b   :  { %1613 = vmatprep.mubr.f32.mxu1 %v878_v54  ;;  %v879_v56 = vsub.f32 %v800_v52, %v878_v54 }
 0x42c   :  { %1614 = vmatmul.mubr.f32.vlgmr.msra.gmra.mrb[0].mxu1 %v888_v53  ;;  %v890_v57 = vand.u32 4294901760, %v889_v55 }
 0x42d   :  { %1775 = vmatpush3.bf16.msra.mxu1 %v1772_v25  ;;  %1632 = vmatprep.mubr.f32.mxu1 %v879_v56  ;;  %v880_v23 = vand.u32 4294901760, %v879_v56 }
 0x42e   :  { %1777 = vmatprep.subr.bf16.mxu1 %v1776_v28  ;;  %v891_v26 = vsub.f32 %v889_v55, %v890_v57 }
 0x42f   :  { %v881_v58 = vsub.f32 %v879_v56, %v880_v23 }
 0x430   :  { %v892_v60 = vand.u32 4294901760, %v891_v26 }
 0x431   :  { %1779 = vmatpush3.bf16.msra.mxu1 %v1776_v28  ;;  %v882_v59 = vand.u32 4294901760, %v881_v58 }
 0x432   :  { %1781 = vmatprep.subr.bf16.mxu1 %v1780_v29 }
 0x433   :  { %1594 = vmatprep.mubr.f32.mxu0 %v882_v59 }
 0x434   :  { %1595 = vmatmul.mubr.f32.vlgmr.msra.gmra.mrb[2].mxu0 %v892_v60 }
 0x435   :  { %1783 = vmatpush3.bf16.msra.mxu1 %v1780_v29 }
 0x436   :  { %1785 = vmatprep.subr.bf16.mxu1 %v1784_v30 }
 0x439   :  { %1787 = vmatpush3.bf16.msra.mxu1 %v1784_v30 }
 0x43a   :  { %1789 = vmatprep.subr.bf16.mxu1 %v2353_v17 }
 0x43c   :  { %1633 = vmatmul.mubr.f32.vlgmr.msra.gmra.mrb[0].mxu1 %v889_v55 }
 0x43d   :  { %1791 = vmatpush3.bf16.msra.mxu1 %v2353_v17  ;;  %1651 = vmatprep.mubr.f32.mxu1 %v880_v23 }
 0x43e   :  { %1793 = vmatprep.subr.bf16.mxu1 %v2355_v18 }
 0x441   :  { %1795 = vmatpush3.bf16.msra.mxu1 %v2355_v18 }
 0x442   :  { %1797 = vmatprep.subr.bf16.mxu1 %v2359_v24 }
 0x445   :  { %1799 = vmatpush3.bf16.msra.mxu1 %v2359_v24 }
 0x446   :  { %1801 = vmatprep.subr.bf16.mxu1 %v2365_v27 }
 0x449   :  { %1803 = vmatpush3.bf16.msra.mxu1 %v2365_v27 }
 0x44a   :  { %1805 = vmatprep.subr.bf16.mxu1 %v1804_v31 }
 0x44c   :  { %1652 = vmatmul.mubr.f32.vlgmr.msra.gmra.mrb[0].mxu1 %v890_v57 }
 0x44d   :  { %1807 = vmatpush3.bf16.msra.mxu1 %v1804_v31  ;;  %1670 = vmatprep.mubr.f32.mxu1 %v878_v54 }
 0x44e   :  { %1809 = vmatprep.subr.bf16.mxu1 %v1808_v32 }
 0x451   :  { %1811 = vmatpush3.bf16.msra.mxu1 %v1808_v32 }
 0x452   :  { %1813 = vmatprep.subr.bf16.mxu1 %v1812_v33 }
 0x455   :  { %1815 = vmatpush3.bf16.msra.mxu1 %v1812_v33 }
 0x456   :  { %1817 = vmatprep.subr.bf16.mxu1 %v1816_v34 }
 0x459   :  { %1819 = vmatpush3.bf16.msra.mxu1 %v1816_v34 }
 0x45a   :  { %1821 = vmatprep.subr.bf16.mxu1 %v2353_v17 }
 0x45c   :  { %1671 = vmatmul.mubr.f32.vlgmr.msra.gmra.mrb[0].mxu1 %v888_v53 }
 0x45d   :  { %1823 = vmatpush3.bf16.msra.mxu1 %v2353_v17  ;;  %1689 = vmatprep.mubr.f32.mxu1 %v878_v54 }
 0x45e   :  { %1825 = vmatprep.subr.bf16.mxu1 %v2355_v18 }
 0x461   :  { %1827 = vmatpush3.bf16.msra.mxu1 %v2355_v18 }
 0x462   :  { %1829 = vmatprep.subr.bf16.mxu1 %v2359_v24 }
 0x465   :  { %1831 = vmatpush3.bf16.msra.mxu1 %v2359_v24 }
 0x466   :  { %1833 = vmatprep.subr.bf16.mxu1 %v2365_v27 }
 0x469   :  { %1835 = vmatpush3.bf16.msra.mxu1 %v2365_v27 }
 0x46c   :  { %1690 = vmatmul.mubr.f32.vlgmr.msra.gmra.mrb[0].mxu1 %v888_v53 }
 0x507   :  { %v1596_v61 = vpop.f32.mrb[2].mxu0 }
 0x508   :  { %v884_v62 = vpop.f32.mrb[3].mxu0  ;;  %v895_v2 = vadd.f32 %v1596_v61, %v1415_v63 }
 0x509   :  { %v885_v3 = vadd.f32 %v1415_v63, %v884_v62 }
 0x53f   :  { %v1691_v4 = vpop.f32.mrb[0].mxu1 }
 0x540   :  { %v1839_v5 = vadd.f32 %v1691_v4, %v895_v2  ;;  %v1375_v7 = vpop.f32.mrb[1].mxu1 }
 0x541   :  { %v1841_v8 = vadd.f32 %v1375_v7, %v885_v3 }
 0x542   :  { %v1386_v9 = vadd.f32 %v1839_v5, %v2293_v1 }
 0x543   :  { %v1385_v11 = vadd.f32 %v1841_v8, %v2291_v0 }
 0x544   :  { %1388 = vst.msk [vmem:[#allocation17 + $0x8] sm:$0xff] %vm147_vm0, %v1386_v9 }
 0x545   :  { %1387 = vst.msk [vmem:[#allocation17] sm:$0xff] %vm147_vm0, %v1385_v11 }
 0x546   :  { %2089 = shalt.err (!%p2086_p6)
}
 0x547   :  { %s2090_s14 = scalar_lea.hbm %s2425_s9, 256 }
 0x548   :  { %p2091_p7 = scmp.ne.s32.totalorder %s2425_s9, %s2090_s14  ;;  %p2094_p8 = scmp.lt.u32.totalorder %s2090_s14, %s2425_s9 }
 0x54a   :  { %p2096_p9 = pnand %p2094_p8, %p2091_p7 }
 0x54c   :  { %2099 = shalt.err (!%p2096_p9)
}
 0x54d   :  { %1400 = dma.vmem_to_hbm [thread:$0]  %s1395_s28, 256, %s2425_s9, [#allocation4], %s2115_s10, %s2115_s10, %s2116_s13  }
 0x54e   :  { %2110 = dma.done.wait [#allocation4], 256  }
 0x54f   :  { %2111 = vsyncadd [#allocation4], 4294967040 }
 0x550   :  { %1404 = vsyncpa [#allocation3], 1 }
 0x551   :  { %1405 = vsyncpa [#allocation6], 1 }
 0x552   :  { %1406 = vsyncpa [#allocation9], 1 }
 0x553   :  { %1407 = vsyncpa [#allocation12], 1 }
 0x554   :  { %1408 = vsyncpa [#allocation15], 1 }
 0x555   :  { %1409 = vsyncpa [#allocation4], 1 }

// kernel: dilated_transformer_encoder_layer.6
= control target key start
LH: loop header
LB: loop body
LE: loop exit
PB: predicated region body
PF: predicated region fallthrough
CT: control target
= control target key end

     0   :  { %8 = vsyncpa [#allocation3], 0  ;;  %s9160_s0 = inlined_call_operand.hbm [shape: f32[8,4,8], index: 0, kind: input, shape index: {}]   ;;  %s9161_s1 = inlined_call_operand.hbm [shape: f32[8,4,8], index: 1, kind: input, shape index: {}]   ;;  %s9162_s2 = inlined_call_operand.hbm [shape: f32[8,4,8], index: 2, kind: input, shape index: {}]   ;;  %s9163_s3 = inlined_call_operand.hbm [shape: f32[8,4,8], index: 3, kind: output, shape index: {}]  }
   0x1   :  { %9 = vsyncpa [#allocation6], 0 }
   0x2   :  { %10 = vsyncpa [#allocation4], 0  ;;  %s8413_s12 = smov [#allocation5]   ;;  %s8414_s14 = smov [#allocation2]  }
   0x3   :  { %s28_s13 = sshll.u32 %s8413_s12, 4  ;;  %s16_s15 = sshll.u32 %s8414_s14, 4  ;;  %s29_s13 = int_to_ptr.vmem [resolvable:$true] %s28_s13  ;;  %s8441_s15 = int_to_ptr.vmem [resolvable:$true] %s16_s15 }
   0x4   :  { %s8319_s18 = scalar_lea.hbm %s9161_s1, 512 }
   0x5   :  { %p8320_p0 = scmp.ne.s32.totalorder %s9161_s1, %s8319_s18  ;;  %p8323_p1 = scmp.lt.u32.totalorder %s8319_s18, %s9161_s1 }
   0x7   :  { %p8325_p2 = pnand %p8323_p1, %p8320_p0 }
   0x9   :  { %8328 = shalt.err (!%p8325_p2)
}
   0xa   :  { %s8329_s23 = scalar_lea.vmem %s29_s13, 512  ;;  %p8334_p4 = scmp.lt.s32.totalorder %s29_s13, %s29_s13 }
   0xb   :  { %p8330_p3 = scmp.ne.s32.totalorder %s29_s13, %s8329_s23  ;;  %p8335_p5 = scmp.lt.s32.totalorder %s8329_s23, %s8329_s23 }
   0xd   :  { %p8336_p6 = por %p8335_p5, %p8334_p4 }
   0xf   :  { %p8337_p7 = pnand %p8336_p6, %p8330_p3 }
  0x11   :  { %8340 = shalt.err (!%p8337_p7)
}
  0x12   :  { %s8415_s24 = smov 64   ;;  %s8416_s25 = smov 4  }
  0x13   :  { %34 = dma.hbm_to_vmem [thread:$0]  %s9161_s1, 512, %s29_s13, [#allocation6], %s8415_s24, %s8415_s24, %s8416_s25  }
  0x14   :  { %s8341_s30 = scalar_lea.hbm %s9160_s0, 512 }
  0x15   :  { %p8342_p8 = scmp.ne.s32.totalorder %s9160_s0, %s8341_s30  ;;  %p8345_p9 = scmp.lt.u32.totalorder %s8341_s30, %s9160_s0 }
  0x17   :  { %p8347_p10 = pnand %p8345_p9, %p8342_p8 }
  0x19   :  { %8350 = shalt.err (!%p8347_p10)
}
  0x1a   :  { %s8351_s8 = scalar_lea.vmem %s8441_s15, 512  ;;  %p8356_p12 = scmp.lt.s32.totalorder %s8441_s15, %s8441_s15 }
  0x1b   :  { %p8352_p11 = scmp.ne.s32.totalorder %s8441_s15, %s8351_s8  ;;  %p8357_p13 = scmp.lt.s32.totalorder %s8351_s8, %s8351_s8 }
  0x1d   :  { %p8358_p0 = por %p8357_p13, %p8356_p12 }
  0x1f   :  { %p8359_p1 = pnand %p8358_p0, %p8352_p11 }
  0x21   :  { %8362 = shalt.err (!%p8359_p1)
}
  0x22   :  { %22 = dma.hbm_to_vmem [thread:$0]  %s9160_s0, 512, %s8441_s15, [#allocation3], %s8415_s24, %s8415_s24, %s8416_s25  }
  0x23   :  { %s8417_s10 = smov [#allocation7]   ;;  %s8363_s14 = scalar_lea.hbm %s9162_s2, 512 }
  0x24   :  { %s40_s11 = sshll.u32 %s8417_s10, 4  ;;  %p8364_p2 = scmp.ne.s32.totalorder %s9162_s2, %s8363_s14  ;;  %s41_s11 = int_to_ptr.vmem [resolvable:$true] %s40_s11 }
  0x25   :  { %p8367_p3 = scmp.lt.u32.totalorder %s8363_s14, %s9162_s2 }
  0x27   :  { %p8369_p4 = pnand %p8367_p3, %p8364_p2 }
  0x29   :  { %8372 = shalt.err (!%p8369_p4)
}
  0x2a   :  { %s8373_s20 = scalar_lea.vmem %s41_s11, 512  ;;  %p8378_p6 = scmp.lt.s32.totalorder %s41_s11, %s41_s11 }
  0x2b   :  { %p8374_p5 = scmp.ne.s32.totalorder %s41_s11, %s8373_s20  ;;  %p8379_p7 = scmp.lt.s32.totalorder %s8373_s20, %s8373_s20 }
  0x2d   :  { %p8380_p8 = por %p8379_p7, %p8378_p6 }
  0x2f   :  { %p8381_p9 = pnand %p8380_p8, %p8374_p5 }
  0x31   :  { %8384 = shalt.err (!%p8381_p9)
}
  0x32   :  { %46 = dma.hbm_to_vmem [thread:$0]  %s9162_s2, 512, %s41_s11, [#allocation6], %s8415_s24, %s8415_s24, %s8416_s25  }
  0x33   :  { %8407 = dma.done.wait [#allocation3], 512  }
  0x34   :  { %8408 = vsyncadd [#allocation3], 4294966784 }
  0x35   :  { %8409 = dma.done.wait [#allocation6], 1024  }
  0x36   :  { %8410 = vsyncadd [#allocation6], 4294966272  ;;  %v8418_v0 = vmov 0.0   ;;  %vm8419_vm0 = vmmov 0   ;;  %vm80_vm1 = vcmask 64512   ;;  %vm3705_vm2 = vcmask 27648  }
  0x37   :  { %7639 = vmatprep.subr.mxu0 %v8418_v0  ;;  %7669 = vmatprep.subr.mxu1 %v8418_v0  ;;  %v64_v1 = vld [vmem:[#allocation5] sm:$0xf]  ;;  %v65_v2 = vld [vmem:[#allocation5 + $0x4] sm:$0xf]  ;;  %v58_v29 = vld [vmem:[#allocation2 + $0x8] sm:$0xf] }
  0x38   :  { %7641 = vmatprep.mubr.msk.f32.mxu0 %vm8419_vm0, %v8418_v0  ;;  %7671 = vmatprep.mubr.msk.f32.mxu1 %vm8419_vm0, %v8418_v0  ;;  %v56_v3 = vld [vmem:[#allocation2] sm:$0xf]  ;;  %v85_v4 = vsel %vm80_vm1, %v64_v1, 0  ;;  %v537_v5 = vsel %vm80_vm1, %v65_v2, 0  ;;  %v57_v7 = vld [vmem:[#allocation2 + $0x4] sm:$0xf] }
  0x39   :  { %v82_v6 = vsel %vm80_vm1, %v56_v3, 0  ;;  %v8502_v8 = vand.u32 4294901760, %v85_v4  ;;  %v8504_v9 = vand.u32 4294901760, %v537_v5  ;;  %v534_v11 = vsel %vm80_vm1, %v57_v7, 0  ;;  %v66_v30 = vld [vmem:[#allocation5 + $0x8] sm:$0xf] }
  0x3a   :  { %v8506_v10 = vand.u32 4294901760, %v82_v6  ;;  %v8509_v12 = vand.u32 4294901760, %v534_v11  ;;  %v59_v31 = vld [vmem:[#allocation2 + $0xc] sm:$0xf]  ;;  %v986_v33 = vsel %vm80_vm1, %v58_v29, 0  ;;  %v989_v34 = vsel %vm80_vm1, %v66_v30, 0 }
  0x3b   :  { %7640 = vmatpush3.xpose.msra.mxu0 %v8502_v8  ;;  %v165_v13 = vsub.f32 %v85_v4, %v8502_v8  ;;  %7670 = vmatpush3.xpose.msra.mxu1 %v8504_v9  ;;  %v617_v14 = vsub.f32 %v537_v5, %v8504_v9  ;;  %v67_v32 = vld [vmem:[#allocation5 + $0xc] sm:$0xf]  ;;  %v1438_v35 = vsel %vm80_vm1, %v59_v31, 0  ;;  %v8545_v37 = vand.u32 4294901760, %v986_v33  ;;  %v60_v57 = vld [vmem:[#allocation2 + $0x10] sm:$0xf] }
  0x3c   :  { %v154_v15 = vsub.f32 %v82_v6, %v8506_v10  ;;  %7644 = vmatprep.subr.mxu0 %v8418_v0  ;;  %v606_v16 = vsub.f32 %v534_v11, %v8509_v12  ;;  %7674 = vmatprep.subr.mxu1 %v8418_v0  ;;  %v1441_v36 = vsel %vm80_vm1, %v67_v32, 0  ;;  %v8547_v38 = vand.u32 4294901760, %v989_v34  ;;  %v68_v58 = vld [vmem:[#allocation5 + $0x10] sm:$0xf]  ;;  %v61_v59 = vld [vmem:[#allocation2 + $0x14] sm:$0xf] }
  0x3d   :  { %v166_v18 = vand.u32 4294901760, %v165_v13  ;;  %v618_v19 = vand.u32 4294901760, %v617_v14  ;;  %v8549_v39 = vand.u32 4294901760, %v1438_v35  ;;  %v8553_v40 = vand.u32 4294901760, %v1441_v36  ;;  %v69_v60 = vld [vmem:[#allocation5 + $0x14] sm:$0xf] }
  0x3e   :  { %v155_v17 = vand.u32 4294901760, %v154_v15  ;;  %v607_v20 = vand.u32 4294901760, %v606_v16  ;;  %v8560_v41 = vsub.f32 %v986_v33, %v8545_v37  ;;  %v8563_v42 = vsub.f32 %v989_v34, %v8547_v38  ;;  %s8420_s2 = smov [#allocation8]  }
  0x3f   :  { %v167_v22 = vsub.f32 %v165_v13, %v166_v18  ;;  %v619_v23 = vsub.f32 %v617_v14, %v618_v19  ;;  %v8566_v43 = vsub.f32 %v1438_v35, %v8549_v39  ;;  %v8569_v44 = vsub.f32 %v1441_v36, %v8553_v40  ;;  %s7434_s21 = sshll.u32 %s8420_s2, 4  ;;  %s7435_s21 = int_to_ptr.vmem [resolvable:$true] %s7434_s21 }
  0x40   :  { %v156_v21 = vsub.f32 %v154_v15, %v155_v17  ;;  %v608_v24 = vsub.f32 %v606_v16, %v607_v20  ;;  %v1059_v45 = vand.u32 4294901760, %v8560_v41  ;;  %v1070_v46 = vand.u32 4294901760, %v8563_v42  ;;  %s8385_s22 = scalar_lea.vmem %s7435_s21, 512  ;;  %p8390_p11 = scmp.lt.s32.totalorder %s7435_s21, %s7435_s21 }
  0x41   :  { %v168_v26 = vand.u32 4294901760, %v167_v22  ;;  %v620_v27 = vand.u32 4294901760, %v619_v23  ;;  %v1511_v47 = vand.u32 4294901760, %v8566_v43  ;;  %v1522_v48 = vand.u32 4294901760, %v8569_v44  ;;  %v62_v22 = vld [vmem:[#allocation2 + $0x18] sm:$0xf]  ;;  %p8386_p10 = scmp.ne.s32.totalorder %s7435_s21, %s8385_s22  ;;  %p8391_p12 = scmp.lt.s32.totalorder %s8385_s22, %s8385_s22 }
  0x42   :  { %v157_v25 = vand.u32 4294901760, %v156_v21  ;;  %v609_v28 = vand.u32 4294901760, %v608_v24  ;;  %v1060_v49 = vsub.f32 %v8560_v41, %v1059_v45  ;;  %v1071_v50 = vsub.f32 %v8563_v42, %v1070_v46  ;;  %v70_v23 = vld [vmem:[#allocation5 + $0x18] sm:$0xf]  ;;  %v63_v24 = vld [vmem:[#allocation2 + $0x1c] sm:$0xf] }
  0x43   :  { %v1512_v51 = vsub.f32 %v8566_v43, %v1511_v47  ;;  %v1523_v52 = vsub.f32 %v8569_v44, %v1522_v48  ;;  %v1890_v61 = vsel %vm80_vm1, %v60_v57, 0  ;;  %v1893_v62 = vsel %vm80_vm1, %v68_v58, 0  ;;  %v72_v58 = vld [vmem:[#allocation7] sm:$0xf]  ;;  %p8392_p13 = por %p8391_p12, %p8390_p11 }
  0x44   :  { %7642 = vmatmul.mubr.f32.vlgmr.msra.gmra.mrb[0].mxu0 %v157_v25  ;;  %7672 = vmatmul.mubr.f32.vlgmr.msra.gmra.mrb[0].mxu1 %v609_v28  ;;  %v1061_v53 = vand.u32 4294901760, %v1060_v49  ;;  %v1072_v54 = vand.u32 4294901760, %v1071_v50  ;;  %v2342_v63 = vsel %vm80_vm1, %v61_v59, 0  ;;  %v2345_v1 = vsel %vm80_vm1, %v69_v60, 0  ;;  %v71_v25 = vld [vmem:[#allocation5 + $0x1c] sm:$0xf] }
  0x45   :  { %7645 = vmatpush3.xpose.msra.mxu0 %v168_v26  ;;  %7675 = vmatpush3.xpose.msra.mxu1 %v620_v27  ;;  %v1513_v55 = vand.u32 4294901760, %v1512_v51  ;;  %v1524_v56 = vand.u32 4294901760, %v1523_v52  ;;  %v8629_v2 = vand.u32 4294901760, %v1890_v61  ;;  %v8631_v3 = vand.u32 4294901760, %v1893_v62  ;;  %p8393_p0 = pnand %p8392_p13, %p8386_p10 }
  0x46   :  { %7646 = vmatprep.mubr.msk.f32.mxu0 %vm8419_vm0, %v8418_v0  ;;  %7649 = vmatprep.subr.mxu0 %v8418_v0  ;;  %v8633_v4 = vand.u32 4294901760, %v2342_v63  ;;  %v8637_v5 = vand.u32 4294901760, %v2345_v1  ;;  %v2794_v26 = vsel %vm80_vm1, %v62_v22, 0  ;;  %v2797_v27 = vsel %vm80_vm1, %v70_v23, 0 }
  0x47   :  { %7676 = vmatprep.mubr.msk.f32.mxu1 %vm8419_vm0, %v8418_v0  ;;  %7679 = vmatprep.subr.mxu1 %v8418_v0  ;;  %v8644_v6 = vsub.f32 %v1890_v61, %v8629_v2  ;;  %v8647_v7 = vsub.f32 %v1893_v62, %v8631_v3  ;;  %v3246_v28 = vsel %vm80_vm1, %v63_v24, 0  ;;  %v3249_v29 = vsel %vm80_vm1, %v71_v25, 0  ;;  %v73_v62 = vld [vmem:[#allocation7 + $0x4] sm:$0xf] }
  0x48   :  { %v8713_v30 = vand.u32 4294901760, %v2794_v26  ;;  %v8715_v31 = vand.u32 4294901760, %v2797_v27  ;;  %v8717_v32 = vand.u32 4294901760, %v3246_v28  ;;  %v8721_v33 = vand.u32 4294901760, %v3249_v29 }
  0x49   :  { %vm3782_vm3 = vcmask 1043456   ;;  %vm3778_vm4 = vcmask 31744   ;;  %vm7420_vm5 = vcmask 60416  }
  0x4a   :  { %v2866_v34 = vsub.f32 %v2794_v26, %v8713_v30  ;;  %v2877_v35 = vsub.f32 %v2797_v27, %v8715_v31  ;;  %v3318_v36 = vsub.f32 %v3246_v28, %v8717_v32  ;;  %v3784_v59 = vsel %vm3782_vm3, %v72_v58, 0  ;;  %v74_v58 = vld [vmem:[#allocation7 + $0x8] sm:$0xf] }
  0x4b   :  { %v8798_v60 = vand.u32 4294901760, %v3784_v59 }
  0x4c   :  { %7647 = vmatmul.mubr.f32.vlgmr.msra.gmra.mrb[0].mxu0 %v8506_v10  ;;  %7677 = vmatmul.mubr.f32.vlgmr.msra.gmra.mrb[0].mxu1 %v8509_v12 }
  0x4d   :  { %7650 = vmatpush3.xpose.msra.mxu0 %v165_v13  ;;  %7680 = vmatpush3.xpose.msra.mxu1 %v617_v14 }
  0x4e   :  { %7651 = vmatprep.mubr.msk.f32.mxu0 %vm8419_vm0, %v8418_v0  ;;  %7654 = vmatprep.subr.mxu0 %v8418_v0 }
  0x4f   :  { %7681 = vmatprep.mubr.msk.f32.mxu1 %vm8419_vm0, %v8418_v0  ;;  %7684 = vmatprep.subr.mxu1 %v8418_v0 }
  0x54   :  { %7652 = vmatmul.mubr.f32.vlgmr.msra.gmra.mrb[0].mxu0 %v154_v15  ;;  %7682 = vmatmul.mubr.f32.vlgmr.msra.gmra.mrb[0].mxu1 %v606_v16 }
  0x55   :  { %7655 = vmatpush3.xpose.msra.mxu0 %v8502_v8  ;;  %7685 = vmatpush3.xpose.msra.mxu1 %v8504_v9 }
  0x56   :  { %7656 = vmatprep.mubr.msk.f32.mxu0 %vm8419_vm0, %v8418_v0  ;;  %7659 = vmatprep.subr.mxu0 %v8418_v0 }
  0x57   :  { %7686 = vmatprep.mubr.msk.f32.mxu1 %vm8419_vm0, %v8418_v0  ;;  %7689 = vmatprep.subr.mxu1 %v8418_v0 }
  0x5c   :  { %7657 = vmatmul.mubr.f32.vlgmr.msra.gmra.mrb[0].mxu0 %v155_v17  ;;  %7687 = vmatmul.mubr.f32.vlgmr.msra.gmra.mrb[0].mxu1 %v607_v20 }
  0x5d   :  { %7660 = vmatpush3.xpose.msra.mxu0 %v166_v18  ;;  %7690 = vmatpush3.xpose.msra.mxu1 %v618_v19 }
  0x5e   :  { %7661 = vmatprep.mubr.msk.f32.mxu0 %vm8419_vm0, %v8418_v0  ;;  %7664 = vmatprep.subr.mxu0 %v8418_v0 }
  0x5f   :  { %7691 = vmatprep.mubr.msk.f32.mxu1 %vm8419_vm0, %v8418_v0  ;;  %7694 = vmatprep.subr.mxu1 %v8418_v0 }
  0x64   :  { %7662 = vmatmul.mubr.f32.vlgmr.msra.gmra.mrb[0].mxu0 %v8506_v10  ;;  %7692 = vmatmul.mubr.f32.vlgmr.msra.gmra.mrb[0].mxu1 %v8509_v12 }
  0x65   :  { %7665 = vmatpush3.xpose.msra.mxu0 %v8502_v8  ;;  %7695 = vmatpush3.xpose.msra.mxu1 %v8504_v9  ;;  %v8650_v8 = vsub.f32 %v2342_v63, %v8633_v4  ;;  %v8653_v9 = vsub.f32 %v2345_v1, %v8637_v5 }
  0x66   :  { %7666 = vmatprep.mubr.msk.f32.mxu0 %vm8419_vm0, %v8418_v0  ;;  %7696 = vmatprep.mubr.msk.f32.mxu1 %vm8419_vm0, %v8418_v0 }
  0x67   :  { %7699 = vmatprep.subr.mxu0 %v8418_v0  ;;  %7729 = vmatprep.subr.mxu1 %v8418_v0  ;;  %v2415_v11 = vand.u32 4294901760, %v8650_v8  ;;  %v2426_v13 = vand.u32 4294901760, %v8653_v9 }
  0x69   :  { %v2416_v15 = vsub.f32 %v8650_v8, %v2415_v11  ;;  %v2427_v17 = vsub.f32 %v8653_v9, %v2426_v13 }
  0x6b   :  { %v2417_v19 = vand.u32 4294901760, %v2416_v15  ;;  %v2428_v21 = vand.u32 4294901760, %v2427_v17 }
  0x6c   :  { %7667 = vmatmul.mubr.f32.vlgmr.msra.gmra.mrb[0].mxu0 %v8506_v10  ;;  %7697 = vmatmul.mubr.f32.vlgmr.msra.gmra.mrb[0].mxu1 %v8509_v12  ;;  %v1963_v10 = vand.u32 4294901760, %v8644_v6  ;;  %v1974_v12 = vand.u32 4294901760, %v8647_v7 }
  0x6d   :  { %7700 = vmatpush3.xpose.msra.mxu0 %v8547_v38  ;;  %7730 = vmatpush3.xpose.msra.mxu1 %v8553_v40 }
  0x6e   :  { %7701 = vmatprep.mubr.msk.f32.mxu0 %vm8419_vm0, %v8418_v0  ;;  %7704 = vmatprep.subr.mxu0 %v8418_v0  ;;  %v1964_v14 = vsub.f32 %v8644_v6, %v1963_v10  ;;  %v1975_v16 = vsub.f32 %v8647_v7, %v1974_v12 }
  0x6f   :  { %7731 = vmatprep.mubr.msk.f32.mxu1 %vm8419_vm0, %v8418_v0  ;;  %7734 = vmatprep.subr.mxu1 %v8418_v0 }
  0x70   :  { %7702 = vmatmul.mubr.f32.vlgmr.msra.gmra.mrb[2].mxu0 %v1061_v53  ;;  %7732 = vmatmul.mubr.f32.vlgmr.msra.gmra.mrb[2].mxu1 %v1513_v55  ;;  %v1965_v18 = vand.u32 4294901760, %v1964_v14  ;;  %v1976_v20 = vand.u32 4294901760, %v1975_v16 }
  0x71   :  { %7705 = vmatpush3.xpose.msra.mxu0 %v1072_v54  ;;  %7735 = vmatpush3.xpose.msra.mxu1 %v1524_v56 }
  0x72   :  { %7706 = vmatprep.mubr.msk.f32.mxu0 %vm8419_vm0, %v8418_v0  ;;  %7709 = vmatprep.subr.mxu0 %v8418_v0 }
  0x73   :  { %7736 = vmatprep.mubr.msk.f32.mxu1 %vm8419_vm0, %v8418_v0  ;;  %7739 = vmatprep.subr.mxu1 %v8418_v0 }
  0x78   :  { %7707 = vmatmul.mubr.f32.vlgmr.msra.gmra.mrb[2].mxu0 %v8545_v37  ;;  %7737 = vmatmul.mubr.f32.vlgmr.msra.gmra.mrb[2].mxu1 %v8549_v39 }
  0x79   :  { %7710 = vmatpush3.xpose.msra.mxu0 %v8563_v42  ;;  %7740 = vmatpush3.xpose.msra.mxu1 %v8569_v44 }
  0x7a   :  { %7711 = vmatprep.mubr.msk.f32.mxu0 %vm8419_vm0, %v8418_v0  ;;  %7714 = vmatprep.subr.mxu0 %v8418_v0 }
  0x7b   :  { %7741 = vmatprep.mubr.msk.f32.mxu1 %vm8419_vm0, %v8418_v0  ;;  %7744 = vmatprep.subr.mxu1 %v8418_v0 }
  0x80   :  { %7712 = vmatmul.mubr.f32.vlgmr.msra.gmra.mrb[2].mxu0 %v8560_v41  ;;  %7742 = vmatmul.mubr.f32.vlgmr.msra.gmra.mrb[2].mxu1 %v8566_v43 }
  0x81   :  { %7715 = vmatpush3.xpose.msra.mxu0 %v8547_v38  ;;  %7745 = vmatpush3.xpose.msra.mxu1 %v8553_v40 }
  0x82   :  { %7716 = vmatprep.mubr.msk.f32.mxu0 %vm8419_vm0, %v8418_v0  ;;  %7719 = vmatprep.subr.mxu0 %v8418_v0 }
  0x83   :  { %7746 = vmatprep.mubr.msk.f32.mxu1 %vm8419_vm0, %v8418_v0  ;;  %7749 = vmatprep.subr.mxu1 %v8418_v0 }
  0x88   :  { %7717 = vmatmul.mubr.f32.vlgmr.msra.gmra.mrb[2].mxu0 %v1059_v45  ;;  %7747 = vmatmul.mubr.f32.vlgmr.msra.gmra.mrb[2].mxu1 %v1511_v47 }
  0x89   :  { %7720 = vmatpush3.xpose.msra.mxu0 %v1070_v46  ;;  %7750 = vmatpush3.xpose.msra.mxu1 %v1522_v48 }
  0x8a   :  { %7721 = vmatprep.mubr.msk.f32.mxu0 %vm8419_vm0, %v8418_v0  ;;  %7724 = vmatprep.subr.mxu0 %v8418_v0 }
  0x8b   :  { %7751 = vmatprep.mubr.msk.f32.mxu1 %vm8419_vm0, %v8418_v0  ;;  %7754 = vmatprep.subr.mxu1 %v8418_v0 }
  0x90   :  { %7722 = vmatmul.mubr.f32.vlgmr.msra.gmra.mrb[2].mxu0 %v8545_v37  ;;  %7752 = vmatmul.mubr.f32.vlgmr.msra.gmra.mrb[2].mxu1 %v8549_v39 }
  0x91   :  { %7725 = vmatpush3.xpose.msra.mxu0 %v8547_v38  ;;  %7755 = vmatpush3.xpose.msra.mxu1 %v8553_v40  ;;  %v2867_v38 = vand.u32 4294901760, %v2866_v34  ;;  %v2878_v40 = vand.u32 4294901760, %v2877_v35 }
  0x92   :  { %7726 = vmatprep.mubr.msk.f32.mxu0 %vm8419_vm0, %v8418_v0  ;;  %7756 = vmatprep.mubr.msk.f32.mxu1 %vm8419_vm0, %v8418_v0 }
  0x93   :  { %7759 = vmatprep.subr.mxu0 %v8418_v0  ;;  %7789 = vmatprep.subr.mxu1 %v8418_v0  ;;  %v2868_v42 = vsub.f32 %v2866_v34, %v2867_v38  ;;  %v2879_v44 = vsub.f32 %v2877_v35, %v2878_v40 }
  0x95   :  { %v2869_v46 = vand.u32 4294901760, %v2868_v42  ;;  %v2880_v48 = vand.u32 4294901760, %v2879_v44 }
  0x98   :  { %7727 = vmatmul.mubr.f32.vlgmr.msra.gmra.mrb[2].mxu0 %v8545_v37  ;;  %7757 = vmatmul.mubr.f32.vlgmr.msra.gmra.mrb[2].mxu1 %v8549_v39  ;;  %v3329_v37 = vsub.f32 %v3249_v29, %v8721_v33  ;;  %v3319_v39 = vand.u32 4294901760, %v3318_v36 }
  0x99   :  { %7760 = vmatpush3.xpose.msra.mxu0 %v8631_v3  ;;  %7790 = vmatpush3.xpose.msra.mxu1 %v8637_v5 }
  0x9a   :  { %7761 = vmatprep.mubr.msk.f32.mxu0 %vm8419_vm0, %v8418_v0  ;;  %7791 = vmatprep.mubr.msk.f32.mxu1 %vm8419_vm0, %v8418_v0  ;;  %v3330_v41 = vand.u32 4294901760, %v3329_v37  ;;  %v3320_v43 = vsub.f32 %v3318_v36, %v3319_v39 }
  0x9b   :  { %7764 = vmatprep.subr.mxu0 %v8418_v0  ;;  %7794 = vmatprep.subr.mxu1 %v8418_v0 }
  0x9c   :  { %7762 = vmatmul.mubr.f32.vlgmr.msra.gmra.mrb[4].mxu0 %v1965_v18  ;;  %7792 = vmatmul.mubr.f32.vlgmr.msra.gmra.mrb[4].mxu1 %v2417_v19  ;;  %v3331_v45 = vsub.f32 %v3329_v37, %v3330_v41  ;;  %v3321_v47 = vand.u32 4294901760, %v3320_v43 }
  0x9d   :  { %7765 = vmatpush3.xpose.msra.mxu0 %v1976_v20  ;;  %7795 = vmatpush3.xpose.msra.mxu1 %v2428_v21 }
  0x9e   :  { %7766 = vmatprep.mubr.msk.f32.mxu0 %vm8419_vm0, %v8418_v0  ;;  %7796 = vmatprep.mubr.msk.f32.mxu1 %vm8419_vm0, %v8418_v0  ;;  %v3332_v49 = vand.u32 4294901760, %v3331_v45 }
  0x9f   :  { %7769 = vmatprep.subr.mxu0 %v8418_v0  ;;  %7799 = vmatprep.subr.mxu1 %v8418_v0 }
  0xa4   :  { %7767 = vmatmul.mubr.f32.vlgmr.msra.gmra.mrb[4].mxu0 %v8629_v2  ;;  %7797 = vmatmul.mubr.f32.vlgmr.msra.gmra.mrb[4].mxu1 %v8633_v4 }
  0xa5   :  { %7770 = vmatpush3.xpose.msra.mxu0 %v8647_v7  ;;  %7800 = vmatpush3.xpose.msra.mxu1 %v8653_v9 }
  0xa6   :  { %7771 = vmatprep.mubr.msk.f32.mxu0 %vm8419_vm0, %v8418_v0  ;;  %7801 = vmatprep.mubr.msk.f32.mxu1 %vm8419_vm0, %v8418_v0 }
  0xa7   :  { %7774 = vmatprep.subr.mxu0 %v8418_v0  ;;  %7804 = vmatprep.subr.mxu1 %v8418_v0 }
  0xac   :  { %7772 = vmatmul.mubr.f32.vlgmr.msra.gmra.mrb[4].mxu0 %v8644_v6  ;;  %7802 = vmatmul.mubr.f32.vlgmr.msra.gmra.mrb[4].mxu1 %v8650_v8 }
  0xad   :  { %7775 = vmatpush3.xpose.msra.mxu0 %v8631_v3  ;;  %7805 = vmatpush3.xpose.msra.mxu1 %v8637_v5 }
  0xae   :  { %7776 = vmatprep.mubr.msk.f32.mxu0 %vm8419_vm0, %v8418_v0  ;;  %7806 = vmatprep.mubr.msk.f32.mxu1 %vm8419_vm0, %v8418_v0 }
  0xaf   :  { %7779 = vmatprep.subr.mxu0 %v8418_v0  ;;  %7809 = vmatprep.subr.mxu1 %v8418_v0 }
  0xb4   :  { %7777 = vmatmul.mubr.f32.vlgmr.msra.gmra.mrb[4].mxu0 %v1963_v10  ;;  %7807 = vmatmul.mubr.f32.vlgmr.msra.gmra.mrb[4].mxu1 %v2415_v11 }
  0xb5   :  { %7780 = vmatpush3.xpose.msra.mxu0 %v1974_v12  ;;  %7810 = vmatpush3.xpose.msra.mxu1 %v2426_v13 }
  0xb6   :  { %7781 = vmatprep.mubr.msk.f32.mxu0 %vm8419_vm0, %v8418_v0  ;;  %7811 = vmatprep.mubr.msk.f32.mxu1 %vm8419_vm0, %v8418_v0 }
  0xb7   :  { %7784 = vmatprep.subr.mxu0 %v8418_v0  ;;  %7814 = vmatprep.subr.mxu1 %v8418_v0 }
  0xbc   :  { %7782 = vmatmul.mubr.f32.vlgmr.msra.gmra.mrb[4].mxu0 %v8629_v2  ;;  %7812 = vmatmul.mubr.f32.vlgmr.msra.gmra.mrb[4].mxu1 %v8633_v4 }
  0xbd   :  { %7785 = vmatpush3.xpose.msra.mxu0 %v8631_v3  ;;  %7815 = vmatpush3.xpose.msra.mxu1 %v8637_v5  ;;  %v4236_v3 = vsel %vm3782_vm3, %v73_v62, 0  ;;  %v4688_v62 = vsel %vm3782_vm3, %v74_v58, 0 }
  0xbe   :  { %7786 = vmatprep.mubr.msk.f32.mxu0 %vm8419_vm0, %v8418_v0  ;;  %7816 = vmatprep.mubr.msk.f32.mxu1 %vm8419_vm0, %v8418_v0  ;;  %v8805_v5 = vand.u32 4294901760, %v4236_v3 }
  0xbf   :  { %7819 = vmatprep.subr.mxu0 %v8418_v0  ;;  %7849 = vmatprep.subr.mxu1 %v8418_v0 }
  0xc4   :  { %7787 = vmatmul.mubr.f32.vlgmr.msra.gmra.mrb[4].mxu0 %v8629_v2  ;;  %7817 = vmatmul.mubr.f32.vlgmr.msra.gmra.mrb[4].mxu1 %v8633_v4 }
  0xc5   :  { %7820 = vmatpush3.xpose.msra.mxu0 %v8715_v31  ;;  %7850 = vmatpush3.xpose.msra.mxu1 %v8721_v33 }
  0xc6   :  { %7821 = vmatprep.mubr.msk.f32.mxu0 %vm8419_vm0, %v8418_v0  ;;  %7851 = vmatprep.mubr.msk.f32.mxu1 %vm8419_vm0, %v8418_v0 }
  0xc7   :  { %7824 = vmatprep.subr.mxu0 %v8418_v0  ;;  %7854 = vmatprep.subr.mxu1 %v8418_v0 }
  0xc8   :  { %7822 = vmatmul.mubr.f32.vlgmr.msra.gmra.mrb[6].mxu0 %v2869_v46  ;;  %7852 = vmatmul.mubr.f32.vlgmr.msra.gmra.mrb[6].mxu1 %v3321_v47 }
  0xc9   :  { %7825 = vmatpush3.xpose.msra.mxu0 %v2880_v48  ;;  %7855 = vmatpush3.xpose.msra.mxu1 %v3332_v49 }
  0xca   :  { %7826 = vmatprep.mubr.msk.f32.mxu0 %vm8419_vm0, %v8418_v0  ;;  %7856 = vmatprep.mubr.msk.f32.mxu1 %vm8419_vm0, %v8418_v0 }
  0xcb   :  { %7829 = vmatprep.subr.mxu0 %v8418_v0  ;;  %7859 = vmatprep.subr.mxu1 %v8418_v0 }
  0xd0   :  { %7827 = vmatmul.mubr.f32.vlgmr.msra.gmra.mrb[6].mxu0 %v8713_v30  ;;  %7857 = vmatmul.mubr.f32.vlgmr.msra.gmra.mrb[6].mxu1 %v8717_v32 }
  0xd1   :  { %7830 = vmatpush3.xpose.msra.mxu0 %v2877_v35  ;;  %7860 = vmatpush3.xpose.msra.mxu1 %v3329_v37  ;;  %v8835_v35 = vsub.f32 %v4236_v3, %v8805_v5 }
  0xd2   :  { %7831 = vmatprep.mubr.msk.f32.mxu0 %vm8419_vm0, %v8418_v0  ;;  %7861 = vmatprep.mubr.msk.f32.mxu1 %vm8419_vm0, %v8418_v0 }
  0xd3   :  { %7834 = vmatprep.subr.mxu0 %v8418_v0  ;;  %7864 = vmatprep.subr.mxu1 %v8418_v0  ;;  %v4317_v43 = vand.u32 4294901760, %v8835_v35 }
  0xd5   :  { %v4318_v49 = vsub.f32 %v8835_v35, %v4317_v43 }
  0xd8   :  { %7832 = vmatmul.mubr.f32.vlgmr.msra.gmra.mrb[6].mxu0 %v2866_v34  ;;  %7862 = vmatmul.mubr.f32.vlgmr.msra.gmra.mrb[6].mxu1 %v3318_v36 }
  0xd9   :  { %7835 = vmatpush3.xpose.msra.mxu0 %v8715_v31  ;;  %7865 = vmatpush3.xpose.msra.mxu1 %v8721_v33 }
  0xda   :  { %7836 = vmatprep.mubr.msk.f32.mxu0 %vm8419_vm0, %v8418_v0  ;;  %7866 = vmatprep.mubr.msk.f32.mxu1 %vm8419_vm0, %v8418_v0 }
  0xdb   :  { %7839 = vmatprep.subr.mxu0 %v8418_v0  ;;  %7869 = vmatprep.subr.mxu1 %v8418_v0 }
  0xe0   :  { %7837 = vmatmul.mubr.f32.vlgmr.msra.gmra.mrb[6].mxu0 %v2867_v38  ;;  %7867 = vmatmul.mubr.f32.vlgmr.msra.gmra.mrb[6].mxu1 %v3319_v39 }
  0xe1   :  { %7840 = vmatpush3.xpose.msra.mxu0 %v2878_v40  ;;  %7870 = vmatpush3.xpose.msra.mxu1 %v3330_v41 }
  0xe2   :  { %7841 = vmatprep.mubr.msk.f32.mxu0 %vm8419_vm0, %v8418_v0  ;;  %7871 = vmatprep.mubr.msk.f32.mxu1 %vm8419_vm0, %v8418_v0 }
  0xe3   :  { %7844 = vmatprep.subr.mxu0 %v8418_v0  ;;  %7874 = vmatprep.subr.mxu1 %v8418_v0 }
  0xe8   :  { %7842 = vmatmul.mubr.f32.vlgmr.msra.gmra.mrb[6].mxu0 %v8713_v30  ;;  %7872 = vmatmul.mubr.f32.vlgmr.msra.gmra.mrb[6].mxu1 %v8717_v32 }
  0xe9   :  { %7845 = vmatpush3.xpose.msra.mxu0 %v8715_v31  ;;  %7875 = vmatpush3.xpose.msra.mxu1 %v8721_v33  ;;  %v3864_v31 = vsub.f32 %v3784_v59, %v8798_v60 }
  0xea   :  { %7846 = vmatprep.mubr.msk.f32.mxu0 %vm8419_vm0, %v8418_v0  ;;  %7876 = vmatprep.mubr.msk.f32.mxu1 %vm8419_vm0, %v8418_v0 }
  0xeb   :  { %7879 = vmatprep.subr.mxu0 %v8418_v0  ;;  %7909 = vmatprep.subr.mxu1 %v8418_v0  ;;  %v3865_v36 = vand.u32 4294901760, %v3864_v31 }
  0xed   :  { %v3866_v42 = vsub.f32 %v3864_v31, %v3865_v36 }
  0xef   :  { %v3867_v48 = vand.u32 4294901760, %v3866_v42 }
  0xf0   :  { %7847 = vmatmul.mubr.f32.vlgmr.msra.gmra.mrb[6].mxu0 %v8713_v30  ;;  %7877 = vmatmul.mubr.f32.vlgmr.msra.gmra.mrb[6].mxu1 %v8717_v32 }
  0xf1   :  { %7881 = vmatprep.mubr.msk.f32.mxu0 %vm8419_vm0, %v8418_v0  ;;  %7911 = vmatprep.mubr.msk.f32.mxu1 %vm8419_vm0, %v8418_v0 }
  0xf2   :  { %7880 = vmatpush3.msra.mxu0 %v8798_v60  ;;  %7910 = vmatpush3.msra.mxu1 %v8805_v5 }
  0xf3   :  { %7884 = vmatprep.subr.mxu0 %v8418_v0  ;;  %7914 = vmatprep.subr.mxu1 %v8418_v0 }
 0x13f   :  { %v529_v50 = vpop.f32.mrb[0].mxu0  ;;  %v981_v52 = vpop.f32.mrb[0].mxu1 }
 0x140   :  { %v3697_v51 = vmul.f32 0.35355338, %v529_v50  ;;  %v7668_v53 = vpop.f32.mrb[1].mxu0  ;;  %v7698_v54 = vpop.f32.mrb[1].mxu1  ;;  %v3698_v55 = vmul.f32 0.35355338, %v981_v52 }
 0x141   :  { %v4319_v53 = vand.u32 4294901760, %v4318_v49 }
 0x142   :  { %v3706_v56 = vsel %vm3705_vm2, %v3697_v51, -inf  ;;  %v3709_v57 = vsel %vm3705_vm2, %v3698_v55, -inf }
 0x143   :  { %3707 = vmax.xlane.f32.xlu0 %v3706_v56 }
 0x147   :  { %3710 = vmax.xlane.f32.xlu0 %v3709_v57 }
 0x16b   :  { %v1433_v61 = vpop.f32.mrb[2].mxu0  ;;  %v1885_v1 = vpop.f32.mrb[2].mxu1 }
 0x16c   :  { %v8802_v63 = vmul.f32 0.35355338, %v1433_v61  ;;  %v7728_v2 = vpop.f32.mrb[3].mxu0  ;;  %v7758_v4 = vpop.f32.mrb[3].mxu1  ;;  %v8807_v6 = vmul.f32 0.35355338, %v1885_v1 }
 0x16d   :  { %v75_v1 = vld [vmem:[#allocation7 + $0xc] sm:$0xf]  ;;  %v8876_v2 = vand.u32 4294901760, %v4688_v62 }
 0x16e   :  { %v3712_v7 = vsel %vm3705_vm2, %v8802_v63, -inf  ;;  %v3715_v8 = vsel %vm3705_vm2, %v8807_v6, -inf  ;;  %v5140_v3 = vsel %vm3782_vm3, %v75_v1, 0 }
 0x16f   :  { %3713 = vmax.xlane.f32.xlu1 %v3712_v7  ;;  %v8881_v4 = vand.u32 4294901760, %v5140_v3 }
 0x173   :  { %3716 = vmax.xlane.f32.xlu1 %v3715_v8 }
 0x197   :  { %v2337_v9 = vpop.f32.mrb[4].mxu0  ;;  %v2789_v11 = vpop.f32.mrb[4].mxu1 }
 0x198   :  { %v8815_v10 = vmul.f32 0.35355338, %v2337_v9  ;;  %v7788_v12 = vpop.f32.mrb[5].mxu0  ;;  %v8817_v13 = vmul.f32 0.35355338, %v2789_v11  ;;  %v7818_v14 = vpop.f32.mrb[5].mxu1  ;;  %v8894_v11 = vsub.f32 %v5140_v3, %v8881_v4 }
 0x19a   :  { %v3718_v15 = vsel %vm3705_vm2, %v8815_v10, -inf  ;;  %v3721_v16 = vsel %vm3705_vm2, %v8817_v13, -inf }
 0x19b   :  { %3719 = vmax.xlane.f32.xlu0 %v3718_v15  ;;  %3722 = vmax.xlane.f32.xlu1 %v3721_v16 }
 0x1c3   :  { %v3241_v17 = vpop.f32.mrb[6].mxu0  ;;  %v3693_v19 = vpop.f32.mrb[6].mxu1 }
 0x1c4   :  { %v8823_v18 = vmul.f32 0.35355338, %v3241_v17  ;;  %v7848_v20 = vpop.f32.mrb[7].mxu0  ;;  %v8825_v21 = vmul.f32 0.35355338, %v3693_v19  ;;  %v7878_v22 = vpop.f32.mrb[7].mxu1 }
 0x1c5   :  { %v5221_v19 = vand.u32 4294901760, %v8894_v11 }
 0x1c6   :  { %v3724_v23 = vsel %vm3705_vm2, %v8823_v18, -inf  ;;  %v3727_v24 = vsel %vm3705_vm2, %v8825_v21, -inf }
 0x1c7   :  { %3725 = vmax.xlane.f32.xlu0 %v3724_v23  ;;  %3728 = vmax.xlane.f32.xlu1 %v3727_v24 }
 0x1d0   :  { %v3708_v25 = vpop.xlane.xlu0 %3707 }
 0x1d1   :  { %v3730_v26 = vsub.f32 %v3697_v51, %v3708_v25  ;;  %v5222_v25 = vsub.f32 %v8894_v11, %v5221_v19 }
 0x1d3   :  { %v3738_v27 = vmul.f32 1.442695, %v3730_v26 }
 0x1d4   :  { %v3711_v28 = vpop.xlane.xlu0 %3710 }
 0x1d5   :  { %8287 = vpow2.f32 %v3738_v27  ;;  %v3731_v29 = vsub.f32 %v3698_v55, %v3711_v28 }
 0x1d7   :  { %v3740_v30 = vmul.f32 1.442695, %v3731_v29 }
 0x1d9   :  { %8289 = vpow2.f32 %v3740_v30  ;;  %v5223_v30 = vand.u32 4294901760, %v5222_v25 }
 0x1df   :  { %v8288_v32 = vpop.eup %8287 }
 0x1e0   :  { %v3780_v33 = vsel %vm3778_vm4, %v8288_v32, 0  ;;  %v3754_v34 = vsel %vm3705_vm2, %v8288_v32, 0.0 }
 0x1e1   :  { %v8837_v37 = vand.u32 4294901760, %v3780_v33  ;;  %3755 = vadd.xlane.f32.xlu0 %v3754_v34 }
 0x1e3   :  { %v8290_v38 = vpop.eup %8289  ;;  %v3853_v39 = vsub.f32 %v3780_v33, %v8837_v37 }
 0x1e4   :  { %v4233_v40 = vsel %vm3778_vm4, %v8290_v38, 0  ;;  %v3757_v41 = vsel %vm3705_vm2, %v8290_v38, 0.0 }
 0x1e5   :  { %v8843_v44 = vand.u32 4294901760, %v4233_v40  ;;  %3758 = vadd.xlane.f32.xlu1 %v3757_v41  ;;  %v3854_v45 = vand.u32 4294901760, %v3853_v39 }
 0x1e7   :  { %v3855_v46 = vsub.f32 %v3853_v39, %v3854_v45  ;;  %v4305_v47 = vsub.f32 %v4233_v40, %v8843_v44 }
 0x1e9   :  { %v3856_v50 = vand.u32 4294901760, %v3855_v46  ;;  %v4306_v51 = vand.u32 4294901760, %v4305_v47 }
 0x1eb   :  { %7882 = vmatmul.mubr.f32.vlgmr.msra.gmra.mrb[8].mxu0 %v3856_v50  ;;  %v4307_v52 = vsub.f32 %v4305_v47, %v4306_v51 }
 0x1ec   :  { %7885 = vmatpush3.msra.mxu0 %v3867_v48  ;;  %7886 = vmatprep.mubr.msk.f32.mxu0 %vm8419_vm0, %v8418_v0 }
 0x1ed   :  { %v4308_v54 = vand.u32 4294901760, %v4307_v52  ;;  %7889 = vmatprep.subr.mxu0 %v8418_v0 }
 0x1ef   :  { %7912 = vmatmul.mubr.f32.vlgmr.msra.gmra.mrb[8].mxu1 %v4308_v54 }
 0x1f0   :  { %7915 = vmatpush3.msra.mxu1 %v4319_v53  ;;  %7916 = vmatprep.mubr.msk.f32.mxu1 %vm8419_vm0, %v8418_v0 }
 0x1f1   :  { %7919 = vmatprep.subr.mxu1 %v8418_v0 }
 0x1f3   :  { %7887 = vmatmul.mubr.f32.vlgmr.msra.gmra.mrb[8].mxu0 %v8837_v37 }
 0x1f4   :  { %7890 = vmatpush3.msra.mxu0 %v3864_v31  ;;  %7891 = vmatprep.mubr.msk.f32.mxu0 %vm8419_vm0, %v8418_v0 }
 0x1f5   :  { %7894 = vmatprep.subr.mxu0 %v8418_v0 }
 0x1f7   :  { %7917 = vmatmul.mubr.f32.vlgmr.msra.gmra.mrb[8].mxu1 %v8843_v44 }
 0x1f8   :  { %7920 = vmatpush3.msra.mxu1 %v8835_v35  ;;  %7921 = vmatprep.mubr.msk.f32.mxu1 %vm8419_vm0, %v8418_v0 }
 0x1f9   :  { %7924 = vmatprep.subr.mxu1 %v8418_v0 }
 0x1fb   :  { %7892 = vmatmul.mubr.f32.vlgmr.msra.gmra.mrb[8].mxu0 %v3853_v39 }
 0x1fc   :  { %v3714_v55 = vpop.xlane.xlu1 %3713  ;;  %7895 = vmatpush3.msra.mxu0 %v8798_v60  ;;  %7896 = vmatprep.mubr.msk.f32.mxu0 %vm8419_vm0, %v8418_v0 }
 0x1fd   :  { %v3732_v56 = vsub.f32 %v8802_v63, %v3714_v55  ;;  %7899 = vmatprep.subr.mxu0 %v8418_v0 }
 0x1ff   :  { %v3742_v57 = vmul.f32 1.442695, %v3732_v56  ;;  %7922 = vmatmul.mubr.f32.vlgmr.msra.gmra.mrb[8].mxu1 %v4305_v47 }
 0x200   :  { %7925 = vmatpush3.msra.mxu1 %v8805_v5  ;;  %v3717_v59 = vpop.xlane.xlu1 %3716  ;;  %7926 = vmatprep.mubr.msk.f32.mxu1 %vm8419_vm0, %v8418_v0 }
 0x201   :  { %8291 = vpow2.f32 %v3742_v57  ;;  %v3733_v61 = vsub.f32 %v8807_v6, %v3717_v59  ;;  %7929 = vmatprep.subr.mxu1 %v8418_v0  ;;  %v8885_v6 = vsub.f32 %v4688_v62, %v8876_v2 }
 0x203   :  { %v3744_v63 = vmul.f32 1.442695, %v3733_v61  ;;  %7897 = vmatmul.mubr.f32.vlgmr.msra.gmra.mrb[8].mxu0 %v3854_v45  ;;  %v4769_v14 = vand.u32 4294901760, %v8885_v6 }
 0x204   :  { %7900 = vmatpush3.msra.mxu0 %v3865_v36  ;;  %7901 = vmatprep.mubr.msk.f32.mxu0 %vm8419_vm0, %v8418_v0 }
 0x205   :  { %8293 = vpow2.f32 %v3744_v63  ;;  %7904 = vmatprep.subr.mxu0 %v8418_v0  ;;  %v4770_v23 = vsub.f32 %v8885_v6, %v4769_v14 }
 0x207   :  { %7927 = vmatmul.mubr.f32.vlgmr.msra.gmra.mrb[8].mxu1 %v4306_v51  ;;  %v4771_v27 = vand.u32 4294901760, %v4770_v23 }
 0x208   :  { %7930 = vmatpush3.msra.mxu1 %v4317_v43  ;;  %7931 = vmatprep.mubr.msk.f32.mxu1 %vm8419_vm0, %v8418_v0 }
 0x209   :  { %7934 = vmatprep.subr.mxu1 %v8418_v0 }
 0x20b   :  { %v8292_v7 = vpop.eup %8291  ;;  %7902 = vmatmul.mubr.f32.vlgmr.msra.gmra.mrb[8].mxu0 %v8837_v37 }
 0x20c   :  { %v4685_v8 = vsel %vm3778_vm4, %v8292_v7, 0  ;;  %v3760_v9 = vsel %vm3705_vm2, %v8292_v7, 0.0  ;;  %7905 = vmatpush3.msra.mxu0 %v8798_v60  ;;  %7906 = vmatprep.mubr.msk.f32.mxu0 %vm8419_vm0, %v8418_v0 }
 0x20d   :  { %v8896_v12 = vand.u32 4294901760, %v4685_v8  ;;  %3761 = vadd.xlane.f32.xlu0 %v3760_v9  ;;  %7939 = vmatprep.subr.mxu0 %v8418_v0 }
 0x20f   :  { %v8294_v15 = vpop.eup %8293  ;;  %7932 = vmatmul.mubr.f32.vlgmr.msra.gmra.mrb[8].mxu1 %v8843_v44  ;;  %v8902_v16 = vsub.f32 %v4685_v8, %v8896_v12 }
 0x210   :  { %v5137_v60 = vsel %vm3778_vm4, %v8294_v15, 0  ;;  %7935 = vmatpush3.msra.mxu1 %v8805_v5  ;;  %v3763_v17 = vsel %vm3705_vm2, %v8294_v15, 0.0  ;;  %7936 = vmatprep.mubr.msk.f32.mxu1 %vm8419_vm0, %v8418_v0 }
 0x211   :  { %v8910_v20 = vand.u32 4294901760, %v5137_v60  ;;  %3764 = vadd.xlane.f32.xlu1 %v3763_v17  ;;  %7969 = vmatprep.subr.mxu1 %v8418_v0  ;;  %v4758_v22 = vand.u32 4294901760, %v8902_v16 }
 0x213   :  { %7907 = vmatmul.mubr.f32.vlgmr.msra.gmra.mrb[8].mxu0 %v8837_v37  ;;  %v4759_v5 = vsub.f32 %v8902_v16, %v4758_v22  ;;  %v5209_v24 = vsub.f32 %v5137_v60, %v8910_v20  ;;  %v76_v37 = vld [vmem:[#allocation7 + $0x10] sm:$0xf] }
 0x214   :  { %7940 = vmatpush3.msra.mxu0 %v8876_v2  ;;  %7941 = vmatprep.mubr.msk.f32.mxu0 %vm8419_vm0, %v8418_v0  ;;  %v5592_v39 = vsel %vm3782_vm3, %v76_v37, 0 }
 0x215   :  { %v4760_v26 = vand.u32 4294901760, %v4759_v5  ;;  %7944 = vmatprep.subr.mxu0 %v8418_v0  ;;  %v5210_v28 = vand.u32 4294901760, %v5209_v24 }
 0x217   :  { %7937 = vmatmul.mubr.f32.vlgmr.msra.gmra.mrb[8].mxu1 %v8843_v44  ;;  %7942 = vmatmul.mubr.f32.vlgmr.msra.gmra.mrb[10].mxu0 %v4760_v26  ;;  %v5211_v29 = vsub.f32 %v5209_v24, %v5210_v28 }
 0x218   :  { %7970 = vmatpush3.msra.mxu1 %v8881_v4  ;;  %7971 = vmatprep.mubr.msk.f32.mxu1 %vm8419_vm0, %v8418_v0 }
 0x219   :  { %7974 = vmatprep.subr.mxu1 %v8418_v0  ;;  %7945 = vmatpush3.msra.mxu0 %v4771_v27  ;;  %v5212_v31 = vand.u32 4294901760, %v5211_v29 }
 0x21a   :  { %7946 = vmatprep.mubr.msk.f32.mxu0 %vm8419_vm0, %v8418_v0  ;;  %7949 = vmatprep.subr.mxu0 %v8418_v0 }
 0x21b   :  { %7972 = vmatmul.mubr.f32.vlgmr.msra.gmra.mrb[10].mxu1 %v5212_v31 }
 0x21c   :  { %7975 = vmatpush3.msra.mxu1 %v5223_v30  ;;  %7976 = vmatprep.mubr.msk.f32.mxu1 %vm8419_vm0, %v8418_v0 }
 0x21d   :  { %7979 = vmatprep.subr.mxu1 %v8418_v0 }
 0x21f   :  { %7947 = vmatmul.mubr.f32.vlgmr.msra.gmra.mrb[10].mxu0 %v8896_v12 }
 0x220   :  { %7950 = vmatpush3.msra.mxu0 %v8885_v6  ;;  %7951 = vmatprep.mubr.msk.f32.mxu0 %vm8419_vm0, %v8418_v0 }
 0x221   :  { %7954 = vmatprep.subr.mxu0 %v8418_v0 }
 0x223   :  { %7977 = vmatmul.mubr.f32.vlgmr.msra.gmra.mrb[10].mxu1 %v8910_v20 }
 0x224   :  { %7980 = vmatpush3.msra.mxu1 %v8894_v11  ;;  %7981 = vmatprep.mubr.msk.f32.mxu1 %vm8419_vm0, %v8418_v0  ;;  %v78_v11 = vld [vmem:[#allocation7 + $0x18] sm:$0xf] }
 0x225   :  { %7984 = vmatprep.subr.mxu1 %v8418_v0 }
 0x227   :  { %7952 = vmatmul.mubr.f32.vlgmr.msra.gmra.mrb[10].mxu0 %v8902_v16 }
 0x228   :  { %v3720_v32 = vpop.xlane.xlu0 %3719  ;;  %7955 = vmatpush3.msra.mxu0 %v8876_v2  ;;  %7956 = vmatprep.mubr.msk.f32.mxu0 %vm8419_vm0, %v8418_v0  ;;  %v3723_v33 = vpop.xlane.xlu1 %3722 }
 0x229   :  { %v3734_v34 = vsub.f32 %v8815_v10, %v3720_v32  ;;  %7959 = vmatprep.subr.mxu0 %v8418_v0  ;;  %v3735_v35 = vsub.f32 %v8817_v13, %v3723_v33  ;;  %v77_v10 = vld [vmem:[#allocation7 + $0x14] sm:$0xf]  ;;  %v8965_v13 = vand.u32 4294901760, %v5592_v39 }
 0x22a   :  { %v6044_v40 = vsel %vm3782_vm3, %v77_v10, 0 }
 0x22b   :  { %v3746_v36 = vmul.f32 1.442695, %v3734_v34  ;;  %7982 = vmatmul.mubr.f32.vlgmr.msra.gmra.mrb[10].mxu1 %v5209_v24  ;;  %v3748_v38 = vmul.f32 1.442695, %v3735_v35  ;;  %v8972_v41 = vand.u32 4294901760, %v6044_v40  ;;  %v8976_v42 = vsub.f32 %v5592_v39, %v8965_v13 }
 0x22c   :  { %7985 = vmatpush3.msra.mxu1 %v8881_v4  ;;  %7986 = vmatprep.mubr.msk.f32.mxu1 %vm8419_vm0, %v8418_v0 }
 0x22d   :  { %8295 = vpow2.f32 %v3746_v36  ;;  %7989 = vmatprep.subr.mxu1 %v8418_v0  ;;  %v8985_v47 = vsub.f32 %v6044_v40, %v8972_v41  ;;  %v5673_v51 = vand.u32 4294901760, %v8976_v42 }
 0x22e   :  { %8297 = vpow2.f32 %v3748_v38 }
 0x22f   :  { %7957 = vmatmul.mubr.f32.vlgmr.msra.gmra.mrb[10].mxu0 %v4758_v22  ;;  %v6125_v55 = vand.u32 4294901760, %v8985_v47  ;;  %v5674_v57 = vsub.f32 %v8976_v42, %v5673_v51 }
 0x230   :  { %7960 = vmatpush3.msra.mxu0 %v4769_v14  ;;  %7961 = vmatprep.mubr.msk.f32.mxu0 %vm8419_vm0, %v8418_v0  ;;  %v6496_v14 = vsel %vm3782_vm3, %v78_v11, 0 }
 0x231   :  { %7964 = vmatprep.subr.mxu0 %v8418_v0  ;;  %v6126_v61 = vsub.f32 %v8985_v47, %v6125_v55  ;;  %v5675_v1 = vand.u32 4294901760, %v5674_v57 }
 0x233   :  { %7987 = vmatmul.mubr.f32.vlgmr.msra.gmra.mrb[10].mxu1 %v5210_v28 }
 0x234   :  { %7990 = vmatpush3.msra.mxu1 %v5221_v19  ;;  %7991 = vmatprep.mubr.msk.f32.mxu1 %vm8419_vm0, %v8418_v0 }
 0x235   :  { %7994 = vmatprep.subr.mxu1 %v8418_v0 }
 0x237   :  { %v8296_v43 = vpop.eup %8295  ;;  %7962 = vmatmul.mubr.f32.vlgmr.msra.gmra.mrb[10].mxu0 %v8896_v12 }
 0x238   :  { %v8298_v44 = vpop.eup %8297  ;;  %v5589_v45 = vsel %vm3778_vm4, %v8296_v43, 0  ;;  %v3766_v46 = vsel %vm3705_vm2, %v8296_v43, 0.0  ;;  %7965 = vmatpush3.msra.mxu0 %v8876_v2  ;;  %7966 = vmatprep.mubr.msk.f32.mxu0 %vm8419_vm0, %v8418_v0  ;;  %v6127_v2 = vand.u32 4294901760, %v6126_v61 }
 0x239   :  { %v6041_v48 = vsel %vm3778_vm4, %v8298_v44, 0  ;;  %v8988_v49 = vand.u32 4294901760, %v5589_v45  ;;  %v3769_v50 = vsel %vm3705_vm2, %v8298_v44, 0.0  ;;  %3767 = vadd.xlane.f32.xlu0 %v3766_v46  ;;  %7999 = vmatprep.subr.mxu0 %v8418_v0 }
 0x23a   :  { %v8993_v52 = vand.u32 4294901760, %v6041_v48  ;;  %3770 = vadd.xlane.f32.xlu1 %v3769_v50 }
 0x23b   :  { %7992 = vmatmul.mubr.f32.vlgmr.msra.gmra.mrb[10].mxu1 %v8910_v20  ;;  %v5661_v53 = vsub.f32 %v5589_v45, %v8988_v49 }
 0x23c   :  { %7995 = vmatpush3.msra.mxu1 %v8881_v4  ;;  %7996 = vmatprep.mubr.msk.f32.mxu1 %vm8419_vm0, %v8418_v0  ;;  %v6113_v54 = vsub.f32 %v6041_v48, %v8993_v52 }
 0x23d   :  { %8029 = vmatprep.subr.mxu1 %v8418_v0  ;;  %v5662_v56 = vand.u32 4294901760, %v5661_v53 }
 0x23e   :  { %v6114_v58 = vand.u32 4294901760, %v6113_v54 }
 0x23f   :  { %7967 = vmatmul.mubr.f32.vlgmr.msra.gmra.mrb[10].mxu0 %v8896_v12  ;;  %v5663_v59 = vsub.f32 %v5661_v53, %v5662_v56 }
 0x240   :  { %8000 = vmatpush3.msra.mxu0 %v8965_v13  ;;  %8001 = vmatprep.mubr.msk.f32.mxu0 %vm8419_vm0, %v8418_v0  ;;  %v6115_v63 = vsub.f32 %v6113_v54, %v6114_v58 }
 0x241   :  { %v5664_v62 = vand.u32 4294901760, %v5663_v59  ;;  %8004 = vmatprep.subr.mxu0 %v8418_v0 }
 0x242   :  { %v6116_v3 = vand.u32 4294901760, %v6115_v63 }
 0x243   :  { %7997 = vmatmul.mubr.f32.vlgmr.msra.gmra.mrb[10].mxu1 %v8910_v20  ;;  %8002 = vmatmul.mubr.f32.vlgmr.msra.gmra.mrb[12].mxu0 %v5664_v62 }
 0x244   :  { %8030 = vmatpush3.msra.mxu1 %v8972_v41  ;;  %8031 = vmatprep.mubr.msk.f32.mxu1 %vm8419_vm0, %v8418_v0 }
 0x245   :  { %8034 = vmatprep.subr.mxu1 %v8418_v0  ;;  %8005 = vmatpush3.msra.mxu0 %v5675_v1 }
 0x246   :  { %8006 = vmatprep.mubr.msk.f32.mxu0 %vm8419_vm0, %v8418_v0  ;;  %8009 = vmatprep.subr.mxu0 %v8418_v0 }
 0x247   :  { %8032 = vmatmul.mubr.f32.vlgmr.msra.gmra.mrb[12].mxu1 %v6116_v3 }
 0x248   :  { %8035 = vmatpush3.msra.mxu1 %v6127_v2  ;;  %8036 = vmatprep.mubr.msk.f32.mxu1 %vm8419_vm0, %v8418_v0 }
 0x249   :  { %8039 = vmatprep.subr.mxu1 %v8418_v0 }
 0x24b   :  { %8007 = vmatmul.mubr.f32.vlgmr.msra.gmra.mrb[12].mxu0 %v8988_v49 }
 0x24c   :  { %8010 = vmatpush3.msra.mxu0 %v8976_v42  ;;  %8011 = vmatprep.mubr.msk.f32.mxu0 %vm8419_vm0, %v8418_v0 }
 0x24d   :  { %8014 = vmatprep.subr.mxu0 %v8418_v0 }
 0x24f   :  { %8037 = vmatmul.mubr.f32.vlgmr.msra.gmra.mrb[12].mxu1 %v8993_v52 }
 0x250   :  { %8040 = vmatpush3.msra.mxu1 %v8985_v47  ;;  %8041 = vmatprep.mubr.msk.f32.mxu1 %vm8419_vm0, %v8418_v0 }
 0x251   :  { %8044 = vmatprep.subr.mxu1 %v8418_v0 }
 0x253   :  { %8012 = vmatmul.mubr.f32.vlgmr.msra.gmra.mrb[12].mxu0 %v5661_v53 }
 0x254   :  { %v3726_v4 = vpop.xlane.xlu0 %3725  ;;  %8015 = vmatpush3.msra.mxu0 %v8965_v13  ;;  %8016 = vmatprep.mubr.msk.f32.mxu0 %vm8419_vm0, %v8418_v0  ;;  %v3729_v6 = vpop.xlane.xlu1 %3728 }
 0x255   :  { %v3736_v7 = vsub.f32 %v8823_v18, %v3726_v4  ;;  %8019 = vmatprep.subr.mxu0 %v8418_v0  ;;  %v3737_v8 = vsub.f32 %v8825_v21, %v3729_v6  ;;  %v79_v18 = vld [vmem:[#allocation7 + $0x1c] sm:$0xf]  ;;  %v9049_v21 = vand.u32 4294901760, %v6496_v14 }
 0x256   :  { %v6948_v15 = vsel %vm3782_vm3, %v79_v18, 0 }
 0x257   :  { %v3750_v9 = vmul.f32 1.442695, %v3736_v7  ;;  %8042 = vmatmul.mubr.f32.vlgmr.msra.gmra.mrb[12].mxu1 %v6113_v54  ;;  %v3752_v12 = vmul.f32 1.442695, %v3737_v8  ;;  %v9054_v16 = vand.u32 4294901760, %v6948_v15  ;;  %v9058_v60 = vsub.f32 %v6496_v14, %v9049_v21 }
 0x258   :  { %8045 = vmatpush3.msra.mxu1 %v8972_v41  ;;  %8046 = vmatprep.mubr.msk.f32.mxu1 %vm8419_vm0, %v8418_v0 }
 0x259   :  { %8299 = vpow2.f32 %v3750_v9  ;;  %8049 = vmatprep.subr.mxu1 %v8418_v0  ;;  %v9067_v23 = vsub.f32 %v6948_v15, %v9054_v16  ;;  %v6577_v26 = vand.u32 4294901760, %v9058_v60 }
 0x25a   :  { %8301 = vpow2.f32 %v3752_v12 }
 0x25b   :  { %8017 = vmatmul.mubr.f32.vlgmr.msra.gmra.mrb[12].mxu0 %v5662_v56  ;;  %v7029_v30 = vand.u32 4294901760, %v9067_v23  ;;  %v6578_v32 = vsub.f32 %v9058_v60, %v6577_v26 }
 0x25c   :  { %8020 = vmatpush3.msra.mxu0 %v5673_v51  ;;  %8021 = vmatprep.mubr.msk.f32.mxu0 %vm8419_vm0, %v8418_v0 }
 0x25d   :  { %8024 = vmatprep.subr.mxu0 %v8418_v0  ;;  %v7030_v35 = vsub.f32 %v9067_v23, %v7029_v30  ;;  %v6579_v37 = vand.u32 4294901760, %v6578_v32 }
 0x25f   :  { %8047 = vmatmul.mubr.f32.vlgmr.msra.gmra.mrb[12].mxu1 %v6114_v58  ;;  %v7031_v39 = vand.u32 4294901760, %v7030_v35 }
 0x260   :  { %8050 = vmatpush3.msra.mxu1 %v6125_v55  ;;  %8051 = vmatprep.mubr.msk.f32.mxu1 %vm8419_vm0, %v8418_v0 }
 0x261   :  { %8054 = vmatprep.subr.mxu1 %v8418_v0 }
 0x263   :  { %v8300_v17 = vpop.eup %8299  ;;  %8022 = vmatmul.mubr.f32.vlgmr.msra.gmra.mrb[12].mxu0 %v8988_v49 }
 0x264   :  { %v8302_v19 = vpop.eup %8301  ;;  %v6493_v20 = vsel %vm3778_vm4, %v8300_v17, 0  ;;  %v3772_v22 = vsel %vm3705_vm2, %v8300_v17, 0.0  ;;  %8025 = vmatpush3.msra.mxu0 %v8965_v13  ;;  %8026 = vmatprep.mubr.msk.f32.mxu0 %vm8419_vm0, %v8418_v0 }
 0x265   :  { %v6945_v5 = vsel %vm3778_vm4, %v8302_v19, 0  ;;  %v9070_v24 = vand.u32 4294901760, %v6493_v20  ;;  %v3775_v25 = vsel %vm3705_vm2, %v8302_v19, 0.0  ;;  %3773 = vadd.xlane.f32.xlu0 %v3772_v22  ;;  %8059 = vmatprep.subr.mxu0 %v8418_v0 }
 0x266   :  { %v9075_v27 = vand.u32 4294901760, %v6945_v5  ;;  %3776 = vadd.xlane.f32.xlu1 %v3775_v25 }
 0x267   :  { %8052 = vmatmul.mubr.f32.vlgmr.msra.gmra.mrb[12].mxu1 %v8993_v52  ;;  %v6565_v28 = vsub.f32 %v6493_v20, %v9070_v24 }
 0x268   :  { %8055 = vmatpush3.msra.mxu1 %v8972_v41  ;;  %8056 = vmatprep.mubr.msk.f32.mxu1 %vm8419_vm0, %v8418_v0  ;;  %v7017_v29 = vsub.f32 %v6945_v5, %v9075_v27 }
 0x269   :  { %8089 = vmatprep.subr.mxu1 %v8418_v0  ;;  %v6566_v31 = vand.u32 4294901760, %v6565_v28 }
 0x26a   :  { %v7018_v33 = vand.u32 4294901760, %v7017_v29 }
 0x26b   :  { %8027 = vmatmul.mubr.f32.vlgmr.msra.gmra.mrb[12].mxu0 %v8988_v49  ;;  %v6567_v34 = vsub.f32 %v6565_v28, %v6566_v31 }
 0x26c   :  { %8060 = vmatpush3.msra.mxu0 %v9049_v21  ;;  %8061 = vmatprep.mubr.msk.f32.mxu0 %vm8419_vm0, %v8418_v0  ;;  %v7019_v38 = vsub.f32 %v7017_v29, %v7018_v33 }
 0x26d   :  { %v6568_v36 = vand.u32 4294901760, %v6567_v34  ;;  %8064 = vmatprep.subr.mxu0 %v8418_v0 }
 0x26e   :  { %v7020_v10 = vand.u32 4294901760, %v7019_v38  ;;  %v3756_v13 = vpop.xlane.xlu0 %3755 }
 0x26f   :  { %8057 = vmatmul.mubr.f32.vlgmr.msra.gmra.mrb[12].mxu1 %v8993_v52  ;;  %8062 = vmatmul.mubr.f32.vlgmr.msra.gmra.mrb[14].mxu0 %v6568_v36  ;;  %8303 = vrcp.f32 %v3756_v13 }
 0x270   :  { %8090 = vmatpush3.msra.mxu1 %v9054_v16  ;;  %8091 = vmatprep.mubr.msk.f32.mxu1 %vm8419_vm0, %v8418_v0 }
 0x271   :  { %8094 = vmatprep.subr.mxu1 %v8418_v0  ;;  %8065 = vmatpush3.msra.mxu0 %v6579_v37 }
 0x272   :  { %8066 = vmatprep.mubr.msk.f32.mxu0 %vm8419_vm0, %v8418_v0  ;;  %8069 = vmatprep.subr.mxu0 %v8418_v0  ;;  %v3759_v40 = vpop.xlane.xlu1 %3758 }
 0x273   :  { %8092 = vmatmul.mubr.f32.vlgmr.msra.gmra.mrb[14].mxu1 %v7020_v10  ;;  %8305 = vrcp.f32 %v3759_v40 }
 0x274   :  { %8095 = vmatpush3.msra.mxu1 %v7031_v39  ;;  %8096 = vmatprep.mubr.msk.f32.mxu1 %vm8419_vm0, %v8418_v0 }
 0x275   :  { %8099 = vmatprep.subr.mxu1 %v8418_v0 }
 0x277   :  { %8067 = vmatmul.mubr.f32.vlgmr.msra.gmra.mrb[14].mxu0 %v9070_v24 }
 0x278   :  { %8070 = vmatpush3.msra.mxu0 %v9058_v60  ;;  %8071 = vmatprep.mubr.msk.f32.mxu0 %vm8419_vm0, %v8418_v0 }
 0x279   :  { %8074 = vmatprep.subr.mxu0 %v8418_v0  ;;  %v8304_v41 = vpop.eup %8303 }
 0x27a   :  { %v7397_v42 = vmul.f32 0.5, %v8304_v41 }
 0x27b   :  { %8097 = vmatmul.mubr.f32.vlgmr.msra.gmra.mrb[14].mxu1 %v9075_v27 }
 0x27c   :  { %8100 = vmatpush3.msra.mxu1 %v9067_v23  ;;  %8101 = vmatprep.mubr.msk.f32.mxu1 %vm8419_vm0, %v8418_v0 }
 0x27d   :  { %8104 = vmatprep.subr.mxu1 %v8418_v0  ;;  %v8306_v43 = vpop.eup %8305 }
 0x27e   :  { %v7399_v47 = vmul.f32 0.5, %v8306_v43 }
 0x27f   :  { %8072 = vmatmul.mubr.f32.vlgmr.msra.gmra.mrb[14].mxu0 %v6565_v28 }
 0x280   :  { %8075 = vmatpush3.msra.mxu0 %v9049_v21  ;;  %8076 = vmatprep.mubr.msk.f32.mxu0 %vm8419_vm0, %v8418_v0 }
 0x281   :  { %8079 = vmatprep.subr.mxu0 %v8418_v0 }
 0x283   :  { %8102 = vmatmul.mubr.f32.vlgmr.msra.gmra.mrb[14].mxu1 %v7017_v29 }
 0x284   :  { %8105 = vmatpush3.msra.mxu1 %v9054_v16  ;;  %8106 = vmatprep.mubr.msk.f32.mxu1 %vm8419_vm0, %v8418_v0 }
 0x285   :  { %8109 = vmatprep.subr.mxu1 %v8418_v0 }
 0x287   :  { %8077 = vmatmul.mubr.f32.vlgmr.msra.gmra.mrb[14].mxu0 %v6566_v31 }
 0x288   :  { %8080 = vmatpush3.msra.mxu0 %v6577_v26  ;;  %8081 = vmatprep.mubr.msk.f32.mxu0 %vm8419_vm0, %v8418_v0 }
 0x289   :  { %8084 = vmatprep.subr.mxu0 %v8418_v0 }
 0x28b   :  { %8107 = vmatmul.mubr.f32.vlgmr.msra.gmra.mrb[14].mxu1 %v7018_v33 }
 0x28c   :  { %8110 = vmatpush3.msra.mxu1 %v7029_v30  ;;  %8111 = vmatprep.mubr.msk.f32.mxu1 %vm8419_vm0, %v8418_v0 }
 0x28d   :  { %8114 = vmatprep.subr.mxu1 %v8418_v0 }
 0x28f   :  { %8082 = vmatmul.mubr.f32.vlgmr.msra.gmra.mrb[14].mxu0 %v9070_v24 }
 0x290   :  { %8085 = vmatpush3.msra.mxu0 %v9049_v21  ;;  %8086 = vmatprep.mubr.msk.f32.mxu0 %vm8419_vm0, %v8418_v0 }
 0x293   :  { %8112 = vmatmul.mubr.f32.vlgmr.msra.gmra.mrb[14].mxu1 %v9075_v27 }
 0x294   :  { %8115 = vmatpush3.msra.mxu1 %v9054_v16  ;;  %8116 = vmatprep.mubr.msk.f32.mxu1 %vm8419_vm0, %v8418_v0 }
 0x297   :  { %8087 = vmatmul.mubr.f32.vlgmr.msra.gmra.mrb[14].mxu0 %v9070_v24 }
 0x29a   :  { %v3762_v50 = vpop.xlane.xlu0 %3761 }
 0x29b   :  { %8117 = vmatmul.mubr.f32.vlgmr.msra.gmra.mrb[14].mxu1 %v9075_v27  ;;  %8307 = vrcp.f32 %v3762_v50 }
 0x29e   :  { %v3765_v51 = vpop.xlane.xlu1 %3764 }
 0x29f   :  { %8309 = vrcp.f32 %v3765_v51 }
 0x2a5   :  { %v8308_v52 = vpop.eup %8307 }
 0x2a6   :  { %v7401_v53 = vmul.f32 0.5, %v8308_v52 }
 0x2a9   :  { %v8310_v54 = vpop.eup %8309 }
 0x2aa   :  { %v7403_v58 = vmul.f32 0.5, %v8310_v54 }
 0x2c6   :  { %v3768_v1 = vpop.xlane.xlu0 %3767 }
 0x2c7   :  { %8311 = vrcp.f32 %v3768_v1  ;;  %v3771_v63 = vpop.xlane.xlu1 %3770 }
 0x2c8   :  { %8313 = vrcp.f32 %v3771_v63 }
 0x2d1   :  { %v8312_v2 = vpop.eup %8311 }
 0x2d2   :  { %v7405_v3 = vmul.f32 0.5, %v8312_v2  ;;  %v8314_v4 = vpop.eup %8313 }
 0x2d3   :  { %v7407_v9 = vmul.f32 0.5, %v8314_v4 }
 0x2e6   :  { %v4228_v44 = vpop.f32.mrb[8].mxu0 }
 0x2e7   :  { %v7412_v45 = vmul.f32 %v7397_v42, %v4228_v44  ;;  %v7908_v46 = vpop.f32.mrb[9].mxu0 }
 0x2e9   :  { %7421 = vst.msk [vmem:[#allocation8] sm:$0xf] %vm7420_vm5, %v7412_v45 }
 0x2ea   :  { %v4680_v48 = vpop.f32.mrb[8].mxu1 }
 0x2eb   :  { %v7413_v0 = vmul.f32 %v7399_v47, %v4680_v48  ;;  %v7938_v49 = vpop.f32.mrb[9].mxu1 }
 0x2ed   :  { %7422 = vst.msk [vmem:[#allocation8 + $0x4] sm:$0xf] %vm7420_vm5, %v7413_v0 }
 0x2f2   :  { %v3774_v18 = vpop.xlane.xlu0 %3773 }
 0x2f3   :  { %8315 = vrcp.f32 %v3774_v18  ;;  %v3777_v21 = vpop.xlane.xlu1 %3776 }
 0x2f4   :  { %8317 = vrcp.f32 %v3777_v21 }
 0x2fd   :  { %v8316_v15 = vpop.eup %8315 }
 0x2fe   :  { %v7409_v16 = vmul.f32 0.5, %v8316_v15  ;;  %v8318_v60 = vpop.eup %8317 }
 0x2ff   :  { %v7411_v22 = vmul.f32 0.5, %v8318_v60 }
 0x312   :  { %v5132_v55 = vpop.f32.mrb[10].mxu0 }
 0x313   :  { %v7414_v56 = vmul.f32 %v7401_v53, %v5132_v55  ;;  %v7968_v57 = vpop.f32.mrb[11].mxu0 }
 0x315   :  { %7423 = vst.msk [vmem:[#allocation8 + $0x8] sm:$0xf] %vm7420_vm5, %v7414_v56 }
 0x316   :  { %v5584_v59 = vpop.f32.mrb[10].mxu1 }
 0x317   :  { %v7415_v61 = vmul.f32 %v7403_v58, %v5584_v59  ;;  %v7998_v62 = vpop.f32.mrb[11].mxu1 }
 0x319   :  { %7424 = vst.msk [vmem:[#allocation8 + $0xc] sm:$0xf] %vm7420_vm5, %v7415_v61 }
 0x33e   :  { %v6036_v6 = vpop.f32.mrb[12].mxu0 }
 0x33f   :  { %v7416_v7 = vmul.f32 %v7405_v3, %v6036_v6  ;;  %v8028_v8 = vpop.f32.mrb[13].mxu0 }
 0x341   :  { %7425 = vst.msk [vmem:[#allocation8 + $0x10] sm:$0xf] %vm7420_vm5, %v7416_v7 }
 0x342   :  { %v6488_v11 = vpop.f32.mrb[12].mxu1 }
 0x343   :  { %v7417_v12 = vmul.f32 %v7407_v9, %v6488_v11  ;;  %v8058_v14 = vpop.f32.mrb[13].mxu1 }
 0x345   :  { %7426 = vst.msk [vmem:[#allocation8 + $0x14] sm:$0xf] %vm7420_vm5, %v7417_v12 }
 0x36a   :  { %v6940_v17 = vpop.f32.mrb[14].mxu0 }
 0x36b   :  { %v7418_v19 = vmul.f32 %v7409_v16, %v6940_v17  ;;  %v8088_v20 = vpop.f32.mrb[15].mxu0 }
 0x36d   :  { %7427 = vst.msk [vmem:[#allocation8 + $0x18] sm:$0xf] %vm7420_vm5, %v7418_v19 }
 0x36e   :  { %v7392_v23 = vpop.f32.mrb[14].mxu1 }
 0x36f   :  { %v7419_v5 = vmul.f32 %v7411_v22, %v7392_v23  ;;  %v8118_v24 = vpop.f32.mrb[15].mxu1 }
 0x371   :  { %7428 = vst.msk [vmem:[#allocation8 + $0x1c] sm:$0xf] %vm7420_vm5, %v7419_v5 }
 0x372   :  { %8396 = shalt.err (!%p8393_p0)
}
 0x373   :  { %s8397_s27 = scalar_lea.hbm %s9163_s3, 512 }
 0x374   :  { %p8398_p1 = scmp.ne.s32.totalorder %s9163_s3, %s8397_s27  ;;  %p8401_p2 = scmp.lt.u32.totalorder %s8397_s27, %s9163_s3 }
 0x376   :  { %p8403_p3 = pnand %p8401_p2, %p8398_p1 }
 0x378   :  { %8406 = shalt.err (!%p8403_p3)
}
 0x379   :  { %7440 = dma.vmem_to_hbm [thread:$0]  %s7435_s21, 512, %s9163_s3, [#allocation4], %s8415_s24, %s8415_s24, %s8416_s25  }
 0x37a   :  { %8411 = dma.done.wait [#allocation4], 512  }
 0x37b   :  { %8412 = vsyncadd [#allocation4], 4294966784 }
 0x37c   :  { %7444 = vsyncpa [#allocation3], 1 }
 0x37d   :  { %7445 = vsyncpa [#allocation6], 1 }
 0x37e   :  { %7446 = vsyncpa [#allocation4], 1 }

</bundles_post_ra>
